<compile_context>
chip_gen: v5e
topology: v5e:2x2
jax: 0.10.0
libtpu: 0.0.40
codegen_flags: <defaults>
</compile_context>

<pallas_src>
import functools

import jax
import jax.numpy as jnp
from jax.experimental import pallas as pl
from jax.experimental.pallas import tpu as pltpu

X_IN = 28
H = 300
OUT = 100

X_IN_PAD = 32    # 28  -> 32        (sublane-multiple K for first layer)
H_PAD = 384      # 300 -> 384=3*128 (lane-dense hidden tiles; v5e-MXU aligned)
OUT_PAD = 128    # 100 -> 128       (lane-dense output slab, unmasked vst)

LAYER_DIMS = [(X_IN, H), (H, H), (H, H), (H, H), (H, H), (H, OUT)]
PADDED_DIMS = [(X_IN_PAD, H_PAD)] + [(H_PAD, H_PAD)] * 4 + [(H_PAD, OUT_PAD)]


def _round_up(n, m):
    return ((n + m - 1) // m) * m


def dn_kernel(x_ref,
              w1, b1, w2, b2, w3, b3, w4, b4, w5, b5, w6, b6,
              o_ref):
    """Whole 6-layer MLP for one batch tile; all bf16 weights resident in VMEM.

    Matmuls: bf16 x bf16 -> f32 accumulation on the MXU.
    Epilogue (bias add, ReLU): f32 on the VPU.
    """

    def lin(h, w_ref, b_ref):
        return (jnp.dot(h.astype(jnp.bfloat16), w_ref[...],
                        preferred_element_type=jnp.float32)
                + b_ref[...])

    h = x_ref[...]                                   # (tb, 32) f32
    h = jnp.maximum(lin(h, w1, b1), 0.0)
    h = jnp.maximum(lin(h, w2, b2), 0.0)
    h = jnp.maximum(lin(h, w3, b3), 0.0)
    h = jnp.maximum(lin(h, w4, b4), 0.0)
    h = jnp.maximum(lin(h, w5, b5), 0.0)
    # final layer: no ReLU
    o_ref[...] = lin(h, w6, b6).astype(o_ref.dtype)


def prepare_params(params):
    """Pad params to lane-dense shapes and cast weights to bf16.

    Run ONCE at init / on parameter update (outside the jitted forward path),
    so the per-call forward does no zero-init + scatter work.

    Exactness of the zero padding: padded bias columns are 0 -> padded
    activations are ReLU(0)=0, and the padded (zero) rows of the following
    weight matrix contribute nothing.
    """
    flat = []
    n = len(params)
    for i, (w, b) in enumerate(params):
        fi, fo = w.shape
        fi_p = X_IN_PAD if i == 0 else H_PAD
        fo_p = OUT_PAD if i == n - 1 else H_PAD
        wp = jnp.zeros((fi_p, fo_p), jnp.float32).at[:fi, :fo].set(w)
        bp = jnp.zeros((1, fo_p), jnp.float32).at[:, :fo].set(b)
        flat.append(wp.astype(jnp.bfloat16))   # MXU operand: bf16
        flat.append(bp)                        # epilogue bias: f32
    return tuple(flat)


def _choose_tb(B):
    """Batch-tile heuristic.

    Small/ragged batches -> tb=128 (minimizes zero-row waste on single-core
    v5e/v6e).  Larger batches -> biggest tile in {512, 256, 128} that still
    yields >= 2 grid steps, so v7x can shard the 'parallel' batch axis across
    its two TensorCores while amortizing the ~0.35us/step grid overhead.
    """
    if B <= 128:
        return 128
    for tb in (512, 256, 128):
        if B >= 2 * tb:
            return tb
    return 128


@functools.partial(jax.jit, static_argnames=("tb",))
def _dn_forward_impl(x, flat_params, tb):
    B = x.shape[0]
    B_pad = max(_round_up(B, tb), tb)

    # Pad batch rows (ragged batch) and input columns 28 -> 32.
    xp = jnp.pad(x, ((0, B_pad - B), (0, X_IN_PAD - X_IN)))

    in_specs = [pl.BlockSpec((tb, X_IN_PAD), lambda i: (i, 0))]  # batch tile
    for p in flat_params:
        # weights / biases: full-array blocks, grid-invariant index_map
        in_specs.append(pl.BlockSpec(p.shape, lambda i: (0, 0)))

    mac = sum(fi * fo for fi, fo in PADDED_DIMS)
    cost = pl.CostEstimate(
        flops=2 * B_pad * mac,
        transcendentals=0,
        bytes_accessed=(mac * 2                                  # bf16 weights
                        + sum(fo for _, fo in PADDED_DIMS) * 4   # f32 biases
                        + B_pad * (X_IN_PAD + OUT_PAD) * 4))     # x + out

    out = pl.pallas_call(
        dn_kernel,
        out_shape=jax.ShapeDtypeStruct((B_pad, OUT_PAD), jnp.float32),
        grid=(B_pad // tb,),
        in_specs=in_specs,
        out_specs=pl.BlockSpec((tb, OUT_PAD), lambda i: (i, 0)),
        compiler_params=pltpu.CompilerParams(
            dimension_semantics=("parallel",),
            vmem_limit_bytes=48 * 1024 * 1024),
        cost_estimate=cost,
    )(xp, *flat_params)

    # strip batch padding and the 100->128 lane padding
    return out[:B, :OUT]


def dn_forward(x, flat_params, tb=None):
    """x: (B, 28) f32. flat_params: output of prepare_params()."""
    if tb is None:
        tb = _choose_tb(x.shape[0])
    return _dn_forward_impl(x, flat_params, tb=tb)


def init_params(key):
    """Deterministic init mimicking PyTorch Linear's U(-1/sqrt(fan_in), +1/sqrt(fan_in))."""
    params = []
    for (fan_in, fan_out) in LAYER_DIMS:
        key, kw, kb = jax.random.split(key, 3)
        bound = 1.0 / jnp.sqrt(jnp.float32(fan_in))
        w = jax.random.uniform(kw, (fan_in, fan_out), jnp.float32,
                               minval=-bound, maxval=bound)
        b = jax.random.uniform(kb, (1, fan_out), jnp.float32,
                               minval=-bound, maxval=bound)
        params.append((w, b))
    return params


def dn_reference(x, params):
    h = x
    for i, (w, b) in enumerate(params):
        h = h @ w + b
        if i < len(params) - 1:
            h = jnp.maximum(h, 0.0)
    return h


if __name__ == "__main__":
    key = jax.random.PRNGKey(0)
    key, kx = jax.random.split(key)

    # Non-multiple batch to exercise batch padding + adaptive tb
    # (B=300 -> tb=128, padded to 384 rows -> 3 grid steps).
    B = 300
    x = jax.random.normal(kx, (B, X_IN), dtype=jnp.float32)
    params = init_params(key)

    flat_params = prepare_params(params)          # pad + bf16-cast once
    out = dn_forward(x, flat_params)
    out = jax.block_until_ready(out)

    ref = dn_reference(x, params)
    assert out.shape == (B, OUT)
    # bf16 matmul operands with f32 accumulation -> slightly looser tolerance
    # than the pure-f32 reference.
    assert jnp.allclose(out, ref, atol=5e-2, rtol=5e-2), "mismatch vs pure-JAX reference"

    print("KERNEL_OK")
</pallas_src>

<mosaic_0001>
module attributes {stable_mosaic.version = 11 : i64} {
  func.func @dn_kernel(%arg0: i32, %arg1: memref<128x32xf32, #tpu.memory_space<vmem>>, %arg2: memref<32x384xbf16, #tpu.memory_space<vmem>>, %arg3: memref<1x384xf32, #tpu.memory_space<vmem>>, %arg4: memref<384x384xbf16, #tpu.memory_space<vmem>>, %arg5: memref<1x384xf32, #tpu.memory_space<vmem>>, %arg6: memref<384x384xbf16, #tpu.memory_space<vmem>>, %arg7: memref<1x384xf32, #tpu.memory_space<vmem>>, %arg8: memref<384x384xbf16, #tpu.memory_space<vmem>>, %arg9: memref<1x384xf32, #tpu.memory_space<vmem>>, %arg10: memref<384x384xbf16, #tpu.memory_space<vmem>>, %arg11: memref<1x384xf32, #tpu.memory_space<vmem>>, %arg12: memref<384x128xbf16, #tpu.memory_space<vmem>>, %arg13: memref<1x128xf32, #tpu.memory_space<vmem>>, %arg14: memref<128x128xf32, #tpu.memory_space<vmem>>) attributes {dimension_semantics = [#tpu.dimension_semantics<parallel>], iteration_bounds = array<i64: 3>, scalar_prefetch = 0 : i64, scratch_operands = 0 : i64, tpu.core_type = #tpu.core_type<tc>, window_params = [{transform_indices = @transform_0, window_bounds = array<i64: 128, 32>}, {pipeline_mode = #tpu.pipeline_mode<synchronous>, transform_indices = @transform_1, window_bounds = array<i64: 32, 384>}, {pipeline_mode = #tpu.pipeline_mode<synchronous>, transform_indices = @transform_2, window_bounds = array<i64: 1, 384>}, {pipeline_mode = #tpu.pipeline_mode<synchronous>, transform_indices = @transform_3, window_bounds = array<i64: 384, 384>}, {pipeline_mode = #tpu.pipeline_mode<synchronous>, transform_indices = @transform_4, window_bounds = array<i64: 1, 384>}, {pipeline_mode = #tpu.pipeline_mode<synchronous>, transform_indices = @transform_5, window_bounds = array<i64: 384, 384>}, {pipeline_mode = #tpu.pipeline_mode<synchronous>, transform_indices = @transform_6, window_bounds = array<i64: 1, 384>}, {pipeline_mode = #tpu.pipeline_mode<synchronous>, transform_indices = @transform_7, window_bounds = array<i64: 384, 384>}, {pipeline_mode = #tpu.pipeline_mode<synchronous>, transform_indices = @transform_8, window_bounds = array<i64: 1, 384>}, {pipeline_mode = #tpu.pipeline_mode<synchronous>, transform_indices = @transform_9, window_bounds = array<i64: 384, 384>}, {pipeline_mode = #tpu.pipeline_mode<synchronous>, transform_indices = @transform_10, window_bounds = array<i64: 1, 384>}, {pipeline_mode = #tpu.pipeline_mode<synchronous>, transform_indices = @transform_11, window_bounds = array<i64: 384, 128>}, {pipeline_mode = #tpu.pipeline_mode<synchronous>, transform_indices = @transform_12, window_bounds = array<i64: 1, 128>}, {transform_indices = @transform_13, window_bounds = array<i64: 128, 128>}]} {
    %c0 = arith.constant 0 : index
    %c0_0 = arith.constant 0 : index
    %0 = vector.load %arg1[%c0, %c0_0] : memref<128x32xf32, #tpu.memory_space<vmem>>, vector<128x32xf32>
    %1 = arith.truncf %0 : vector<128x32xf32> to vector<128x32xbf16>
    %c0_1 = arith.constant 0 : index
    %c0_2 = arith.constant 0 : index
    %2 = vector.load %arg2[%c0_1, %c0_2] : memref<32x384xbf16, #tpu.memory_space<vmem>>, vector<32x384xbf16>
    %cst = arith.constant dense<0.000000e+00> : vector<128x384xf32>
    %3 = tpu.matmul %1, %2, %cst {dimension_numbers = #tpu.dot_dimension_numbers<[1], [0], [0], [1], [0, 0, 1, 1], [], []>} : vector<128x32xbf16>, vector<32x384xbf16>, vector<128x384xf32> -> vector<128x384xf32>
    %c0_3 = arith.constant 0 : index
    %c0_4 = arith.constant 0 : index
    %4 = vector.load %arg3[%c0_3, %c0_4] : memref<1x384xf32, #tpu.memory_space<vmem>>, vector<1x384xf32>
    %5 = vector.broadcast %4 : vector<1x384xf32> to vector<128x384xf32>
    %6 = arith.addf %3, %5 : vector<128x384xf32>
    %cst_5 = arith.constant 0.000000e+00 : f32
    %7 = vector.broadcast %cst_5 : f32 to vector<128x384xf32>
    %8 = arith.maximumf %6, %7 : vector<128x384xf32>
    %9 = arith.truncf %8 : vector<128x384xf32> to vector<128x384xbf16>
    %c0_6 = arith.constant 0 : index
    %c0_7 = arith.constant 0 : index
    %10 = vector.load %arg4[%c0_6, %c0_7] : memref<384x384xbf16, #tpu.memory_space<vmem>>, vector<384x384xbf16>
    %cst_8 = arith.constant dense<0.000000e+00> : vector<128x384xf32>
    %11 = tpu.matmul %9, %10, %cst_8 {dimension_numbers = #tpu.dot_dimension_numbers<[1], [0], [0], [1], [0, 0, 1, 1], [], []>} : vector<128x384xbf16>, vector<384x384xbf16>, vector<128x384xf32> -> vector<128x384xf32>
    %c0_9 = arith.constant 0 : index
    %c0_10 = arith.constant 0 : index
    %12 = vector.load %arg5[%c0_9, %c0_10] : memref<1x384xf32, #tpu.memory_space<vmem>>, vector<1x384xf32>
    %13 = vector.broadcast %12 : vector<1x384xf32> to vector<128x384xf32>
    %14 = arith.addf %11, %13 : vector<128x384xf32>
    %cst_11 = arith.constant 0.000000e+00 : f32
    %15 = vector.broadcast %cst_11 : f32 to vector<128x384xf32>
    %16 = arith.maximumf %14, %15 : vector<128x384xf32>
    %17 = arith.truncf %16 : vector<128x384xf32> to vector<128x384xbf16>
    %c0_12 = arith.constant 0 : index
    %c0_13 = arith.constant 0 : index
    %18 = vector.load %arg6[%c0_12, %c0_13] : memref<384x384xbf16, #tpu.memory_space<vmem>>, vector<384x384xbf16>
    %cst_14 = arith.constant dense<0.000000e+00> : vector<128x384xf32>
    %19 = tpu.matmul %17, %18, %cst_14 {dimension_numbers = #tpu.dot_dimension_numbers<[1], [0], [0], [1], [0, 0, 1, 1], [], []>} : vector<128x384xbf16>, vector<384x384xbf16>, vector<128x384xf32> -> vector<128x384xf32>
    %c0_15 = arith.constant 0 : index
    %c0_16 = arith.constant 0 : index
    %20 = vector.load %arg7[%c0_15, %c0_16] : memref<1x384xf32, #tpu.memory_space<vmem>>, vector<1x384xf32>
    %21 = vector.broadcast %20 : vector<1x384xf32> to vector<128x384xf32>
    %22 = arith.addf %19, %21 : vector<128x384xf32>
    %cst_17 = arith.constant 0.000000e+00 : f32
    %23 = vector.broadcast %cst_17 : f32 to vector<128x384xf32>
    %24 = arith.maximumf %22, %23 : vector<128x384xf32>
    %25 = arith.truncf %24 : vector<128x384xf32> to vector<128x384xbf16>
    %c0_18 = arith.constant 0 : index
    %c0_19 = arith.constant 0 : index
    %26 = vector.load %arg8[%c0_18, %c0_19] : memref<384x384xbf16, #tpu.memory_space<vmem>>, vector<384x384xbf16>
    %cst_20 = arith.constant dense<0.000000e+00> : vector<128x384xf32>
    %27 = tpu.matmul %25, %26, %cst_20 {dimension_numbers = #tpu.dot_dimension_numbers<[1], [0], [0], [1], [0, 0, 1, 1], [], []>} : vector<128x384xbf16>, vector<384x384xbf16>, vector<128x384xf32> -> vector<128x384xf32>
    %c0_21 = arith.constant 0 : index
    %c0_22 = arith.constant 0 : index
    %28 = vector.load %arg9[%c0_21, %c0_22] : memref<1x384xf32, #tpu.memory_space<vmem>>, vector<1x384xf32>
    %29 = vector.broadcast %28 : vector<1x384xf32> to vector<128x384xf32>
    %30 = arith.addf %27, %29 : vector<128x384xf32>
    %cst_23 = arith.constant 0.000000e+00 : f32
    %31 = vector.broadcast %cst_23 : f32 to vector<128x384xf32>
    %32 = arith.maximumf %30, %31 : vector<128x384xf32>
    %33 = arith.truncf %32 : vector<128x384xf32> to vector<128x384xbf16>
    %c0_24 = arith.constant 0 : index
    %c0_25 = arith.constant 0 : index
    %34 = vector.load %arg10[%c0_24, %c0_25] : memref<384x384xbf16, #tpu.memory_space<vmem>>, vector<384x384xbf16>
    %cst_26 = arith.constant dense<0.000000e+00> : vector<128x384xf32>
    %35 = tpu.matmul %33, %34, %cst_26 {dimension_numbers = #tpu.dot_dimension_numbers<[1], [0], [0], [1], [0, 0, 1, 1], [], []>} : vector<128x384xbf16>, vector<384x384xbf16>, vector<128x384xf32> -> vector<128x384xf32>
    %c0_27 = arith.constant 0 : index
    %c0_28 = arith.constant 0 : index
    %36 = vector.load %arg11[%c0_27, %c0_28] : memref<1x384xf32, #tpu.memory_space<vmem>>, vector<1x384xf32>
    %37 = vector.broadcast %36 : vector<1x384xf32> to vector<128x384xf32>
    %38 = arith.addf %35, %37 : vector<128x384xf32>
    %cst_29 = arith.constant 0.000000e+00 : f32
    %39 = vector.broadcast %cst_29 : f32 to vector<128x384xf32>
    %40 = arith.maximumf %38, %39 : vector<128x384xf32>
    %41 = arith.truncf %40 : vector<128x384xf32> to vector<128x384xbf16>
    %c0_30 = arith.constant 0 : index
    %c0_31 = arith.constant 0 : index
    %42 = vector.load %arg12[%c0_30, %c0_31] : memref<384x128xbf16, #tpu.memory_space<vmem>>, vector<384x128xbf16>
    %cst_32 = arith.constant dense<0.000000e+00> : vector<128x128xf32>
    %43 = tpu.matmul %41, %42, %cst_32 {dimension_numbers = #tpu.dot_dimension_numbers<[1], [0], [0], [1], [0, 0, 1, 1], [], []>} : vector<128x384xbf16>, vector<384x128xbf16>, vector<128x128xf32> -> vector<128x128xf32>
    %c0_33 = arith.constant 0 : index
    %c0_34 = arith.constant 0 : index
    %44 = vector.load %arg13[%c0_33, %c0_34] : memref<1x128xf32, #tpu.memory_space<vmem>>, vector<1x128xf32>
    %45 = vector.broadcast %44 : vector<1x128xf32> to vector<128x128xf32>
    %46 = arith.addf %43, %45 : vector<128x128xf32>
    %c0_35 = arith.constant 0 : index
    %c0_36 = arith.constant 0 : index
    %47 = vector.load %arg14[%c0_35, %c0_36] : memref<128x128xf32, #tpu.memory_space<vmem>>, vector<128x128xf32>
    tpu.vector_store %arg14[%c0_35, %c0_36], %46 {strides = array<i32>} : memref<128x128xf32, #tpu.memory_space<vmem>>, vector<128x128xf32>,
    return
  }
  func.func @transform_0(%arg0: i32) -> (i32, i32) {
    %c0_i32 = arith.constant 0 : i32
    %c0_i32_0 = arith.constant 0 : i32
    return %arg0, %c0_i32 : i32, i32
  }
  func.func @transform_1(%arg0: i32) -> (i32, i32) {
    %c0_i32 = arith.constant 0 : i32
    %c0_i32_0 = arith.constant 0 : i32
    %c0_i32_1 = arith.constant 0 : i32
    return %c0_i32, %c0_i32_0 : i32, i32
  }
  func.func @transform_2(%arg0: i32) -> (i32, i32) {
    %c0_i32 = arith.constant 0 : i32
    %c0_i32_0 = arith.constant 0 : i32
    %c0_i32_1 = arith.constant 0 : i32
    return %c0_i32, %c0_i32_0 : i32, i32
  }
  func.func @transform_3(%arg0: i32) -> (i32, i32) {
    %c0_i32 = arith.constant 0 : i32
    %c0_i32_0 = arith.constant 0 : i32
    %c0_i32_1 = arith.constant 0 : i32
    return %c0_i32, %c0_i32_0 : i32, i32
  }
  func.func @transform_4(%arg0: i32) -> (i32, i32) {
    %c0_i32 = arith.constant 0 : i32
    %c0_i32_0 = arith.constant 0 : i32
    %c0_i32_1 = arith.constant 0 : i32
    return %c0_i32, %c0_i32_0 : i32, i32
  }
  func.func @transform_5(%arg0: i32) -> (i32, i32) {
    %c0_i32 = arith.constant 0 : i32
    %c0_i32_0 = arith.constant 0 : i32
    %c0_i32_1 = arith.constant 0 : i32
    return %c0_i32, %c0_i32_0 : i32, i32
  }
  func.func @transform_6(%arg0: i32) -> (i32, i32) {
    %c0_i32 = arith.constant 0 : i32
    %c0_i32_0 = arith.constant 0 : i32
    %c0_i32_1 = arith.constant 0 : i32
    return %c0_i32, %c0_i32_0 : i32, i32
  }
  func.func @transform_7(%arg0: i32) -> (i32, i32) {
    %c0_i32 = arith.constant 0 : i32
    %c0_i32_0 = arith.constant 0 : i32
    %c0_i32_1 = arith.constant 0 : i32
    return %c0_i32, %c0_i32_0 : i32, i32
  }
  func.func @transform_8(%arg0: i32) -> (i32, i32) {
    %c0_i32 = arith.constant 0 : i32
    %c0_i32_0 = arith.constant 0 : i32
    %c0_i32_1 = arith.constant 0 : i32
    return %c0_i32, %c0_i32_0 : i32, i32
  }
  func.func @transform_9(%arg0: i32) -> (i32, i32) {
    %c0_i32 = arith.constant 0 : i32
    %c0_i32_0 = arith.constant 0 : i32
    %c0_i32_1 = arith.constant 0 : i32
    return %c0_i32, %c0_i32_0 : i32, i32
  }
  func.func @transform_10(%arg0: i32) -> (i32, i32) {
    %c0_i32 = arith.constant 0 : i32
    %c0_i32_0 = arith.constant 0 : i32
    %c0_i32_1 = arith.constant 0 : i32
    return %c0_i32, %c0_i32_0 : i32, i32
  }
  func.func @transform_11(%arg0: i32) -> (i32, i32) {
    %c0_i32 = arith.constant 0 : i32
    %c0_i32_0 = arith.constant 0 : i32
    %c0_i32_1 = arith.constant 0 : i32
    return %c0_i32, %c0_i32_0 : i32, i32
  }
  func.func @transform_12(%arg0: i32) -> (i32, i32) {
    %c0_i32 = arith.constant 0 : i32
    %c0_i32_0 = arith.constant 0 : i32
    %c0_i32_1 = arith.constant 0 : i32
    return %c0_i32, %c0_i32_0 : i32, i32
  }
  func.func @transform_13(%arg0: i32) -> (i32, i32) {
    %c0_i32 = arith.constant 0 : i32
    %c0_i32_0 = arith.constant 0 : i32
    return %arg0, %c0_i32 : i32, i32
  }
}

</mosaic_0001>

<bundles_post_ra>
// kernel: _dn_forward_impl.1
= control target key start
LH: loop header
LB: loop body
LE: loop exit
PB: predicated region body
PF: predicated region fallthrough
CT: control target
= control target key end

     0   :  { %18 = vsyncpa [#allocation3], 0  ;;  %s9357_s0 = inlined_call_operand.vmem [shape: f32[384,32], index: 0, kind: input, shape index: {}]   ;;  %s9358_s1 = inlined_call_operand.vmem [shape: bf16[32,384], index: 1, kind: input, shape index: {}]   ;;  %s9359_s2 = inlined_call_operand.vmem [shape: f32[1,384], index: 2, kind: input, shape index: {}]   ;;  %s9360_s3 = inlined_call_operand.vmem [shape: bf16[384,384], index: 3, kind: input, shape index: {}]   ;;  %s9361_s4 = inlined_call_operand.vmem [shape: f32[1,384], index: 4, kind: input, shape index: {}]   ;;  %s9362_s5 = inlined_call_operand.hbm [shape: bf16[384,384], index: 5, kind: input, shape index: {}]   ;;  %s9363_s6 = inlined_call_operand.vmem [shape: f32[1,384], index: 6, kind: input, shape index: {}]   ;;  %s9364_s7 = inlined_call_operand.hbm [shape: bf16[384,384], index: 7, kind: input, shape index: {}]   ;;  %s9365_s8 = inlined_call_operand.vmem [shape: f32[1,384], index: 8, kind: input, shape index: {}]   ;;  %s9366_s9 = inlined_call_operand.hbm [shape: bf16[384,384], index: 9, kind: input, shape index: {}]   ;;  %s9367_s10 = inlined_call_operand.vmem [shape: f32[1,384], index: 10, kind: input, shape index: {}]   ;;  %s9368_s11 = inlined_call_operand.vmem [shape: bf16[384,128], index: 11, kind: input, shape index: {}]   ;;  %s9369_s12 = inlined_call_operand.vmem [shape: f32[1,128], index: 12, kind: input, shape index: {}]   ;;  %s9370_s13 = inlined_call_operand.vmem [shape: f32[384,128], index: 13, kind: output, shape index: {}]  }
   0x1   :  { %19 = vsyncpa [#allocation5], 0  ;;  %s7121_s25 = smov 0  }
   0x2 LB: > { %s5261_s26 = sadd.s32 4294967295, %s7044_s25   ;;  %p5263_p0 = scmp.ge.s32.totalorder %s7044_s25, 1  ;;  %s7044_s25 = sphi %s7121_s25, %s25_s25  }
   0x3   : > { %p334_p1 = scmp.lt.s32.totalorder %s7044_s25, 4  ;;  %p7131_p2 = scmp.eq.s32.totalorder %s5261_s26, 0 }
   0x4   : > { %s374_s30 = sshll.u32 %s9364_s7, 4  ;;  %s357_s17 = sshll.u32 %s9362_s5, 4  ;;  %s375_s30 = int_to_ptr.hbm [resolvable:$true] %s374_s30  ;;  %s358_s17 = int_to_ptr.hbm [resolvable:$true] %s357_s17 }
   0x5   : > { %p7138_p3 = pnand %p5263_p0, %p334_p1  ;;  %s7046_s18 = smov [#allocation4]  }
   0x6   : > { %s376_s19 = sshll.u32 %s7046_s18, 4  ;;  %s7047_s20 = smov [#allocation2]   ;;  %s377_s19 = int_to_ptr.vmem [resolvable:$true] %s376_s19 }
   0x7   : > { %p6908_p4 = pneg %p7138_p3  ;;  %s359_s21 = sshll.u32 %s7047_s20, 4  ;;  %s360_s21 = int_to_ptr.vmem [resolvable:$true] %s359_s21 }
   0x8   : > { %s391_s24 = sshll.u32 %s9366_s9, 4  ;;  %s7048_s28 = smov 192   ;;  %s392_s24 = int_to_ptr.hbm [resolvable:$true] %s391_s24 }
   0x9   : > { %p6909_p5 = pnand %p7131_p2, %p6908_p4  ;;  %s7049_s29 = smov 12  }
   0xa   : > { %s7050_s15 = smov [#allocation6]   ;;  %427 = sbr.rel (%p7138_p3) target bundleno = 1734 (0x6c6), region = 72 }
   0xb   : > { %6914 = dma.hbm_to_vmem [thread:$0]  (!%p6909_p5), %s375_s30, 9216, %s377_s19, [#allocation5], %s7048_s28, %s7048_s28, %s7049_s29  }
   0xc   : > { %6911 = dma.hbm_to_vmem [thread:$0]  (!%p6909_p5), %s358_s17, 9216, %s360_s21, [#allocation3], %s7048_s28, %s7048_s28, %s7049_s29  }
   0xd   : > { %s393_s16 = sshll.u32 %s7050_s15, 4  ;;  %s394_s16 = int_to_ptr.vmem [resolvable:$true] %s393_s16 }
   0xe   : > { %6917 = dma.hbm_to_vmem [thread:$0]  (!%p6909_p5), %s392_s24, 9216, %s394_s16, [#allocation5], %s7048_s28, %s7048_s28, %s7049_s29  }
   0xf   : > { %7035 = dma.done.wait (%p7131_p2), [#allocation3], 9216  }
  0x10   : > { %7037 = vsyncadd (%p7131_p2), [#allocation3], 4294958080 }
  0x11   : > { %7039 = dma.done.wait (%p7131_p2), [#allocation5], 18432  }
  0x12   : > { %7041 = vsyncadd (%p7131_p2), [#allocation5], 4294948864  ;;  %s5272_s30 = sshll.u32 %s5261_s26, 4  ;;  %v5290_v0 = vld [vmem:[%s9358_s1 + $0x18] sm:$0xf]  ;;  %vm567_vm0 = vcmask 261120  }
  0x13   : > { %p483_p6 = scmp.lt.s32.totalorder %s5272_s30, 47  ;;  %v6578_v1 = vld [vmem:[%s9358_s1 + $0x20] sm:$0xf0]  ;;  %v6577_v2 = vld [vmem:[%s9358_s1 + $0x1c] sm:$0xf] }
  0x14   : > { %v5291_v3 = vor.u32 %v6578_v1, %v5290_v0  ;;  %v5292_v4 = vld [vmem:[%s9358_s1 + $0x24] sm:$0xf0]  ;;  %v5278_v5 = vld [vmem:[%s9358_s1] sm:$0xf]  ;;  %v6575_v6 = vld [vmem:[%s9358_s1 + $0x8] sm:$0xf0] }
  0x15   : > { %s9377_s30 = smov (!%p483_p6, %s5272_s30), 47  ;;  %v5295_v7 = vor.u32 %v6577_v2, %v5292_v4  ;;  %v6574_v8 = vld [vmem:[%s9358_s1 + $0x4] sm:$0xf]  ;;  %v5280_v9 = vld [vmem:[%s9358_s1 + $0xc] sm:$0xf0]  ;;  %v5279_v11 = vor.u32 %v6575_v6, %v5278_v5 }
  0x16   : > { %s5273_s14 = sshll.u32 %s9377_s30, 3  ;;  %598 = vmatpush.bf16.msra.mxu0 %v5291_v3  ;;  %6892 = vmatpush.bf16.msra.mxu2 %v5291_v3  ;;  %v5283_v15 = vor.u32 %v6574_v8, %v5280_v9  ;;  %v5298_v24 = vld [vmem:[%s9358_s1 + $0x20] sm:$0xf]  ;;  %v6579_v25 = vld [vmem:[%s9358_s1 + $0x28] sm:$0xf0] }
  0x17   : > { %s7172_s19 = scalar_lea.vmem %s9357_s0, %s5273_s14  ;;  %647 = vmatpush.bf16.msra.mxu1 %v5295_v7  ;;  %6894 = vmatpush.bf16.msra.mxu3 %v5295_v7  ;;  %v5286_v26 = vld [vmem:[%s9358_s1 + $0x8] sm:$0xf]  ;;  %v5299_v27 = vor.u32 %v6579_v25, %v5298_v24  ;;  %v6576_v28 = vld [vmem:[%s9358_s1 + $0x10] sm:$0xf0]  ;;  %v5398_v45 = vld [vmem:[%s9360_s3 + $0x90] sm:$0xf]  ;;  %s9321_s26 = scalar_lea.vmem %s9370_s13, %s5273_s14 }
  0x18   : > { %v495_v10 = vld [vmem:[%s7172_s19] sm:$0xff]  ;;  %v496_v12 = vld [vmem:[%s7172_s19 + $0x8] sm:$0xff]  ;;  %v497_v18 = vld [vmem:[%s7172_s19 + $0x10] sm:$0xff]  ;;  %v5287_v29 = vor.u32 %v6576_v28, %v5286_v26 }
  0x19   : > { %v503_v13 = vld [vmem:[%s7172_s19 + $0x40] sm:$0xff]  ;;  %v504_v14 = vld [vmem:[%s7172_s19 + $0x48] sm:$0xff]  ;;  %v511_v16 = vpack.c.bf16 %v496_v12, %v495_v10  ;;  %v498_v19 = vld [vmem:[%s7172_s19 + $0x18] sm:$0xff] }
  0x1a   : > { %v7202_v17 = vpack.c.bf16 %v504_v14, %v503_v13  ;;  %599 = vmatpush.bf16.msra.mxu0 %v5279_v11  ;;  %6893 = vmatpush.bf16.msra.mxu2 %v5279_v11  ;;  %v505_v20 = vld [vmem:[%s7172_s19 + $0x50] sm:$0xff]  ;;  %v506_v21 = vld [vmem:[%s7172_s19 + $0x58] sm:$0xff]  ;;  %v512_v22 = vpack.c.bf16 %v498_v19, %v497_v18  ;;  %v499_v30 = vld [vmem:[%s7172_s19 + $0x20] sm:$0xff] }
  0x1b   : > { %648 = vmatpush.bf16.msra.mxu1 %v5283_v15  ;;  %6895 = vmatpush.bf16.msra.mxu3 %v5283_v15  ;;  %v7214_v23 = vpack.c.bf16 %v506_v21, %v505_v20  ;;  %v500_v31 = vld [vmem:[%s7172_s19 + $0x28] sm:$0xff]  ;;  %v507_v32 = vld [vmem:[%s7172_s19 + $0x60] sm:$0xff]  ;;  %v6602_v37 = vld [vmem:[%s9360_s3 + $0xb0] sm:$0xf0] }
  0x1c   : > { %v508_v33 = vld [vmem:[%s7172_s19 + $0x68] sm:$0xff]  ;;  %v7238_v34 = vpack.c.bf16 %v500_v31, %v499_v30  ;;  %v501_v39 = vld [vmem:[%s7172_s19 + $0x30] sm:$0xff]  ;;  %v502_v40 = vld [vmem:[%s7172_s19 + $0x38] sm:$0xff] }
  0x1d   : > { %5300 = vmatmul.msk.bf16.vlgmr.msra.gmra.mxu0 %vm567_vm0, %v511_v16  ;;  %5304 = vmatmul.msk.bf16.vlgmr.msra.gmra.mxu2 %vm567_vm0, %v7202_v17  ;;  %v7240_v35 = vpack.c.bf16 %v508_v33, %v507_v32  ;;  %v5410_v36 = vld [vmem:[%s9360_s3 + $0xa8] sm:$0xf]  ;;  %v509_v41 = vld [vmem:[%s7172_s19 + $0x70] sm:$0xff]  ;;  %v510_v42 = vld [vmem:[%s7172_s19 + $0x78] sm:$0xff]  ;;  %v7260_v43 = vpack.c.bf16 %v502_v40, %v501_v39 }
  0x1e   : > { %5308 = vmatmul.msk.bf16.vlgmr.msra.gmra.mxu1 %vm567_vm0, %v511_v16  ;;  %5312 = vmatmul.msk.bf16.vlgmr.msra.gmra.mxu3 %vm567_vm0, %v7202_v17  ;;  %v5411_v38 = vor.u32 %v6602_v37, %v5410_v36  ;;  %v7262_v44 = vpack.c.bf16 %v510_v42, %v509_v41  ;;  %v6599_v46 = vld [vmem:[%s9360_s3 + $0x98] sm:$0xf0]  ;;  %v5386_v47 = vld [vmem:[%s9360_s3 + $0x78] sm:$0xf]  ;;  %v6596_v49 = vld [vmem:[%s9360_s3 + $0x80] sm:$0xf0] }
  0x1f   : > { %696 = vmatpush.bf16.msrb.mxu2 %v5299_v27  ;;  %v5399_v48 = vor.u32 %v6599_v46, %v5398_v45  ;;  %v5387_v50 = vor.u32 %v6596_v49, %v5386_v47  ;;  %v5374_v51 = vld [vmem:[%s9360_s3 + $0x60] sm:$0xf]  ;;  %v6593_v52 = vld [vmem:[%s9360_s3 + $0x68] sm:$0xf0]  ;;  %v5362_v53 = vld [vmem:[%s9360_s3 + $0x48] sm:$0xf] }
  0x20   : > { %1299 = vmatpush.bf16.msrb.mxu3 %v5411_v38  ;;  %v5375_v54 = vor.u32 %v6593_v52, %v5374_v51  ;;  %v6590_v55 = vld [vmem:[%s9360_s3 + $0x50] sm:$0xf0]  ;;  %v5506_v56 = vld [vmem:[%s9360_s3 + $0x168] sm:$0xf]  ;;  %v5494_v60 = vld [vmem:[%s9360_s3 + $0x150] sm:$0xf] }
  0x21   : > { %v6626_v57 = vld [vmem:[%s9360_s3 + $0x170] sm:$0xf0]  ;;  %v5363_v59 = vor.u32 %v6590_v55, %v5362_v53  ;;  %v6623_v61 = vld [vmem:[%s9360_s3 + $0x158] sm:$0xf0]  ;;  %v5350_v63 = vld [vmem:[%s9360_s3 + $0x30] sm:$0xf] }
  0x22   : > { %v5507_v58 = vor.u32 %v6626_v57, %v5506_v56  ;;  %v5495_v62 = vor.u32 %v6623_v61, %v5494_v60  ;;  %v6587_v0 = vld [vmem:[%s9360_s3 + $0x38] sm:$0xf0]  ;;  %v5482_v1 = vld [vmem:[%s9360_s3 + $0x138] sm:$0xf]  ;;  %v6620_v3 = vld [vmem:[%s9360_s3 + $0x140] sm:$0xf0] }
  0x23   : > { %697 = vmatpush.bf16.msrb.mxu2 %v5287_v29  ;;  %v5351_v2 = vor.u32 %v6587_v0, %v5350_v63  ;;  %v5483_v4 = vor.u32 %v6620_v3, %v5482_v1  ;;  %v5338_v5 = vld [vmem:[%s9360_s3 + $0x18] sm:$0xf]  ;;  %v6584_v6 = vld [vmem:[%s9360_s3 + $0x20] sm:$0xf0]  ;;  %v5470_v7 = vld [vmem:[%s9360_s3 + $0x120] sm:$0xf] }
  0x24   : > { %1300 = vmatpush.bf16.msrb.mxu3 %v5399_v48  ;;  %1348 = vmatpush.bf16.msrb.mxu0 %v5507_v58  ;;  %v6617_v8 = vld [vmem:[%s9360_s3 + $0x128] sm:$0xf0]  ;;  %v5339_v9 = vor.u32 %v6584_v6, %v5338_v5  ;;  %v5458_v11 = vld [vmem:[%s9360_s3 + $0x108] sm:$0xf]  ;;  %v6614_v12 = vld [vmem:[%s9360_s3 + $0x110] sm:$0xf0] }
  0x25   : > { %v5471_v10 = vor.u32 %v6617_v8, %v5470_v7  ;;  %v5459_v13 = vor.u32 %v6614_v12, %v5458_v11  ;;  %v5446_v14 = vld [vmem:[%s9360_s3 + $0xf0] sm:$0xf]  ;;  %v6611_v15 = vld [vmem:[%s9360_s3 + $0xf8] sm:$0xf0]  ;;  %v5434_v18 = vld [vmem:[%s9360_s3 + $0xd8] sm:$0xf] }
  0x26   : > { %v6608_v19 = vld [vmem:[%s9360_s3 + $0xe0] sm:$0xf0]  ;;  %v5326_v21 = vld [vmem:[%s9360_s3] sm:$0xf]  ;;  %v6605_v26 = vld [vmem:[%s9360_s3 + $0xc8] sm:$0xf0] }
  0x27   : > { %v5435_v20 = vor.u32 %v6608_v19, %v5434_v18  ;;  %v5422_v25 = vld [vmem:[%s9360_s3 + $0xc0] sm:$0xf]  ;;  %v6601_v28 = vld [vmem:[%s9360_s3 + $0xac] sm:$0xf]  ;;  %v5412_v29 = vld [vmem:[%s9360_s3 + $0xb4] sm:$0xf0] }
  0x28   : > { %1301 = vmatpush.bf16.msrb.mxu3 %v5387_v50  ;;  %1349 = vmatpush.bf16.msrb.mxu0 %v5495_v62  ;;  %v5423_v27 = vor.u32 %v6605_v26, %v5422_v25  ;;  %v5415_v30 = vor.u32 %v6601_v28, %v5412_v29  ;;  %v6625_v31 = vld [vmem:[%s9360_s3 + $0x16c] sm:$0xf]  ;;  %v5508_v32 = vld [vmem:[%s9360_s3 + $0x174] sm:$0xf0]  ;;  %v5400_v36 = vld [vmem:[%s9360_s3 + $0x9c] sm:$0xf0] }
  0x29   : > { %v5511_v33 = vor.u32 %v6625_v31, %v5508_v32  ;;  %v7389_v38 = vld [vmem:[%s9359_s2] sm:$0x7]  ;;  %v6622_v41 = vld [vmem:[%s9360_s3 + $0x154] sm:$0xf]  ;;  %v5388_v56 = vld [vmem:[%s9360_s3 + $0x84] sm:$0xf0] }
  0x2a   : > { %1446 = vmatpush.bf16.msra.mxu2 %v5415_v30  ;;  %v5496_v42 = vld [vmem:[%s9360_s3 + $0x15c] sm:$0xf0]  ;;  %v7401_v46 = vperm.slane %v7389_v38, 0  ;;  %v6592_v0 = vld [vmem:[%s9360_s3 + $0x64] sm:$0xf] }
  0x2b   : > { %v5499_v45 = vor.u32 %v6622_v41, %v5496_v42  ;;  %v5376_v1 = vld [vmem:[%s9360_s3 + $0x6c] sm:$0xf0]  ;;  %v6619_v5 = vld [vmem:[%s9360_s3 + $0x13c] sm:$0xf]  ;;  %v5484_v6 = vld [vmem:[%s9360_s3 + $0x144] sm:$0xf0] }
  0x2c   : > { %1302 = vmatpush.bf16.msrb.mxu3 %v5375_v54  ;;  %1350 = vmatpush.bf16.msrb.mxu0 %v5483_v4  ;;  %v5487_v7 = vor.u32 %v6619_v5, %v5484_v6  ;;  %v6589_v8 = vld [vmem:[%s9360_s3 + $0x4c] sm:$0xf]  ;;  %v5602_v11 = vld [vmem:[%s9360_s3 + $0x228] sm:$0xf]  ;;  %v6650_v12 = vld [vmem:[%s9360_s3 + $0x230] sm:$0xf0] }
  0x2d   : > { %5301 = vmatmul.msk.bf16.gmra.mxu0 %vm567_vm0, %v512_v22  ;;  %5305 = vmatmul.msk.bf16.gmra.mxu2 %vm567_vm0, %v7214_v23  ;;  %v6583_v30 = vld [vmem:[%s9360_s3 + $0x1c] sm:$0xf]  ;;  %v5340_v31 = vld [vmem:[%s9360_s3 + $0x24] sm:$0xf0]  ;;  %v5542_v6 = vld [vmem:[%s9360_s3 + $0x1b0] sm:$0xf] }
  0x2e   : > { %5309 = vmatmul.msk.bf16.gmra.mxu1 %vm567_vm0, %v512_v22  ;;  %5313 = vmatmul.msk.bf16.gmra.mxu3 %vm567_vm0, %v7214_v23 }
  0x30   : > { %1303 = vmatpush.bf16.msrb.mxu3 %v5363_v59  ;;  %1351 = vmatpush.bf16.msrb.mxu0 %v5471_v10 }
  0x34   : > { %1304 = vmatpush.bf16.msrb.mxu3 %v5351_v2  ;;  %1352 = vmatpush.bf16.msrb.mxu0 %v5459_v13  ;;  %v5379_v2 = vor.u32 %v6592_v0, %v5376_v1  ;;  %v5603_v13 = vor.u32 %v6650_v12, %v5602_v11  ;;  %v6638_v0 = vld [vmem:[%s9360_s3 + $0x1d0] sm:$0xf0] }
  0x36   : > { %1397 = vmatpush.bf16.msrb.mxu1 %v5603_v13 }
  0x38   : > { %1305 = vmatpush.bf16.msrb.mxu3 %v5339_v9  ;;  %v5364_v9 = vld [vmem:[%s9360_s3 + $0x54] sm:$0xf0] }
  0x39   : > { %v5367_v10 = vor.u32 %v6589_v8, %v5364_v9 }
  0x3d   : > { %5302 = vmatmul.msk.bf16.gmra.mxu0 %vm567_vm0, %v7238_v34  ;;  %5306 = vmatmul.msk.bf16.gmra.mxu2 %vm567_vm0, %v7240_v35 }
  0x3e   : > { %5310 = vmatmul.msk.bf16.gmra.mxu1 %vm567_vm0, %v7238_v34  ;;  %5314 = vmatmul.msk.bf16.gmra.mxu3 %vm567_vm0, %v7240_v35 }
  0x4d   : > { %5303 = vmatmul.msk.bf16.gmra.mxu0 %vm567_vm0, %v7260_v43  ;;  %5307 = vmatmul.msk.bf16.gmra.mxu2 %vm567_vm0, %v7262_v44 }
  0x4e   : > { %5311 = vmatmul.msk.bf16.gmra.mxu1 %vm567_vm0, %v7260_v43  ;;  %5315 = vmatmul.msk.bf16.gmra.mxu3 %vm567_vm0, %v7262_v44 }
  0x5d   : > { %5316 = vmatmul.msk.bf16.vlgmr.msrb.gmra.mxu2 %vm567_vm0, %v511_v16  ;;  %v5447_v16 = vor.u32 %v6611_v15, %v5446_v14 }
  0x5f   : > { %1353 = vmatpush.bf16.msrb.mxu0 %v5447_v16  ;;  %v6586_v16 = vld [vmem:[%s9360_s3 + $0x34] sm:$0xf] }
  0x63   : > { %1354 = vmatpush.bf16.msrb.mxu0 %v5435_v20 }
  0x67   : > { %1355 = vmatpush.bf16.msrb.mxu0 %v5423_v27 }
  0x6d   : > { %5317 = vmatmul.msk.bf16.gmra.mxu2 %vm567_vm0, %v512_v22  ;;  %v6581_v22 = vld [vmem:[%s9360_s3 + $0x8] sm:$0xf0] }
  0x6e   : > { %v5327_v24 = vor.u32 %v6581_v22, %v5326_v21  ;;  %v5590_v22 = vld [vmem:[%s9360_s3 + $0x210] sm:$0xf] }
  0x70   : > { %1306 = vmatpush.bf16.msrb.mxu3 %v5327_v24  ;;  %v6647_v24 = vld [vmem:[%s9360_s3 + $0x218] sm:$0xf0] }
  0x71   : > { %v5591_v27 = vor.u32 %v6647_v24, %v5590_v22 }
  0x73   : > { %1398 = vmatpush.bf16.msrb.mxu1 %v5591_v27  ;;  %v5518_v27 = vld [vmem:[%s9360_s3 + $0x180] sm:$0xf] }
  0x74   : > { %1495 = vmatpush.bf16.msra.mxu3 %v5511_v33 }
  0x78   : > { %1496 = vmatpush.bf16.msra.mxu3 %v5499_v45 }
  0x7c   : > { %1497 = vmatpush.bf16.msra.mxu3 %v5487_v7  ;;  %v6635_v7 = vld [vmem:[%s9360_s3 + $0x1b8] sm:$0xf0] }
  0x7d   : > { %5318 = vmatmul.msk.bf16.gmra.mxu2 %vm567_vm0, %v7238_v34  ;;  %v6598_v34 = vld [vmem:[%s9360_s3 + $0x94] sm:$0xf] }
  0x7e   : > { %v5403_v37 = vor.u32 %v6598_v34, %v5400_v36  ;;  %v5343_v34 = vor.u32 %v6583_v30, %v5340_v31  ;;  %v6613_v30 = vld [vmem:[%s9360_s3 + $0x10c] sm:$0xf]  ;;  %v5460_v31 = vld [vmem:[%s9360_s3 + $0x114] sm:$0xf0] }
  0x80   : > { %1447 = vmatpush.bf16.msra.mxu2 %v5403_v37  ;;  %v5578_v37 = vld [vmem:[%s9360_s3 + $0x1f8] sm:$0xf] }
  0x8d   : > { %5319 = vmatmul.msk.bf16.gmra.mxu2 %vm567_vm0, %v7260_v43  ;;  %v7398_v43 = vperm.slane %v7389_v38, 1 }
  0x9a   : > { %v601_v39 = vpop.f32.mrf.mxu0 }
  0x9b   : > { %v650_v40 = vpop.f32.mrf.mxu1  ;;  %v602_v49 = vadd.f32 %v601_v39, %v7401_v46  ;;  %v6644_v39 = vld [vmem:[%s9360_s3 + $0x200] sm:$0xf0] }
  0x9c   : > { %v651_v47 = vadd.f32 %v650_v40, %v7398_v43  ;;  %v5579_v41 = vor.u32 %v6644_v39, %v5578_v37 }
  0x9d   : > { %5320 = vmatmul.msk.bf16.gmra.mxu2 %vm567_vm0, %v7202_v17  ;;  %v6595_v17 = vld [vmem:[%s9360_s3 + $0x7c] sm:$0xf]  ;;  %v739_v57 = vmax.f32 %v602_v49, 0.0  ;;  %v5328_v49 = vld [vmem:[%s9360_s3 + $0xc] sm:$0xf0] }
  0x9e   : > { %v740_v54 = vmax.f32 %v651_v47, 0.0  ;;  %v5391_v59 = vor.u32 %v6595_v17, %v5388_v56  ;;  %1399 = vmatpush.bf16.msrb.mxu1 %v5579_v41  ;;  %v6616_v17 = vld [vmem:[%s9360_s3 + $0x124] sm:$0xf]  ;;  %v5472_v56 = vld [vmem:[%s9360_s3 + $0x12c] sm:$0xf0] }
  0xa0   : > { %v621_v48 = vpop.f32.mrf.mxu2  ;;  %1448 = vmatpush.bf16.msra.mxu2 %v5391_v59 }
  0xa1   : > { %v7408_v50 = vadd.f32 %v621_v48, %v7401_v46  ;;  %v6580_v48 = vld [vmem:[%s9360_s3 + $0x4] sm:$0xf] }
  0xa2   : > { %v603_v51 = vpop.f32.mrf.mxu0 }
  0xa3   : > { %v604_v52 = vadd.f32 %v603_v51, %v7401_v46  ;;  %v652_v53 = vpop.f32.mrf.mxu1  ;;  %v5331_v51 = vor.u32 %v6580_v48, %v5328_v49 }
  0xa4   : > { %v653_v55 = vadd.f32 %v652_v53, %v7398_v43  ;;  %1449 = vmatpush.bf16.msra.mxu2 %v5379_v2  ;;  %v5566_v53 = vld [vmem:[%s9360_s3 + $0x1e0] sm:$0xf] }
  0xa5   : > { %v742_v58 = vmax.f32 %v604_v52, 0.0 }
  0xa6   : > { %v743_v60 = vmax.f32 %v653_v55, 0.0 }
  0xa7   : > { %v7418_v61 = vpack.c.bf16 %v742_v58, %v739_v57  ;;  %v763_v58 = vmax.f32 %v7408_v50, 0.0 }
  0xa8   : > { %v623_v62 = vpop.f32.mrf.mxu2  ;;  %v7420_v63 = vpack.c.bf16 %v743_v60, %v740_v54  ;;  %1450 = vmatpush.bf16.msra.mxu2 %v5367_v10  ;;  %v6641_v54 = vld [vmem:[%s9360_s3 + $0x1e8] sm:$0xf0]  ;;  %v5475_v60 = vor.u32 %v6616_v17, %v5472_v56  ;;  %v5543_v10 = vor.u32 %v6635_v7, %v5542_v6  ;;  %v7587_v7 = vperm.slane %v7389_v38, 2 }
  0xa9   : > { %1307 = vmatmul.bf16.vlgmr.msrb.gmra.mxu3 %v7418_v61  ;;  %v624_v42 = vadd.f32 %v623_v62, %v7401_v46  ;;  %v5567_v57 = vor.u32 %v6641_v54, %v5566_v53  ;;  %v5554_v62 = vld [vmem:[%s9360_s3 + $0x1c8] sm:$0xf] }
  0xaa   : > { %1356 = vmatmul.bf16.vlgmr.msrb.gmra.mxu0 %v7420_v63  ;;  %v606_v3 = vpop.f32.mrf.mxu0  ;;  %1498 = vmatpush.bf16.msra.mxu3 %v5475_v60  ;;  %v5555_v1 = vor.u32 %v6638_v0, %v5554_v62  ;;  %v6610_v60 = vld [vmem:[%s9360_s3 + $0xf4] sm:$0xf]  ;;  %v5448_v62 = vld [vmem:[%s9360_s3 + $0xfc] sm:$0xf0] }
  0xab   : > { %v655_v4 = vpop.f32.mrf.mxu1  ;;  %v607_v18 = vadd.f32 %v606_v3, %v7401_v46  ;;  %v766_v59 = vmax.f32 %v624_v42, 0.0  ;;  %1400 = vmatpush.bf16.msrb.mxu1 %v5567_v57 }
  0xac   : > { %v656_v14 = vadd.f32 %v655_v4, %v7398_v43 }
  0xad   : > { %5321 = vmatmul.msk.bf16.gmra.mxu2 %vm567_vm0, %v7214_v23  ;;  %v5352_v23 = vld [vmem:[%s9360_s3 + $0x3c] sm:$0xf0]  ;;  %v745_v32 = vmax.f32 %v607_v18, 0.0  ;;  %v7516_v50 = vpack.c.bf16 %v766_v59, %v763_v58  ;;  %v6632_v18 = vld [vmem:[%s9360_s3 + $0x1a0] sm:$0xf0] }
  0xae   : > { %v5355_v20 = vor.u32 %v6586_v16, %v5352_v23  ;;  %v746_v28 = vmax.f32 %v656_v14, 0.0  ;;  %v5530_v23 = vld [vmem:[%s9360_s3 + $0x198] sm:$0xf] }
  0xaf   : > { %1401 = vmatpush.bf16.msrb.mxu1 %v5555_v1 }
  0xb0   : > { %v626_v15 = vpop.f32.mrf.mxu2  ;;  %1451 = vmatpush.bf16.msra.mxu2 %v5355_v20 }
  0xb1   : > { %v7459_v19 = vadd.f32 %v626_v15, %v7401_v46  ;;  %v670_v15 = vpop.f32.mrf.mxu3 }
  0xb2   : > { %v608_v21 = vpop.f32.mrf.mxu0 }
  0xb3   : > { %v609_v25 = vadd.f32 %v608_v21, %v7401_v46  ;;  %v657_v26 = vpop.f32.mrf.mxu1  ;;  %1402 = vmatpush.bf16.msrb.mxu1 %v5543_v10  ;;  %v5531_v21 = vor.u32 %v6632_v18, %v5530_v23 }
  0xb4   : > { %v658_v29 = vadd.f32 %v657_v26, %v7398_v43  ;;  %1452 = vmatpush.bf16.msra.mxu2 %v5343_v34 }
  0xb5   : > { %v748_v33 = vmax.f32 %v609_v25, 0.0 }
  0xb6   : > { %v749_v36 = vmax.f32 %v658_v29, 0.0 }
  0xb7   : > { %v7481_v40 = vpack.c.bf16 %v748_v33, %v745_v32  ;;  %1403 = vmatpush.bf16.msrb.mxu1 %v5531_v21  ;;  %v769_v33 = vmax.f32 %v7459_v19, 0.0  ;;  %v5436_v21 = vld [vmem:[%s9360_s3 + $0xe4] sm:$0xf0] }
  0xb8   : > { %v628_v45 = vpop.f32.mrf.mxu2  ;;  %v7484_v47 = vpack.c.bf16 %v749_v36, %v746_v28  ;;  %1453 = vmatpush.bf16.msra.mxu2 %v5331_v51  ;;  %v6629_v28 = vld [vmem:[%s9360_s3 + $0x188] sm:$0xf0]  ;;  %v5463_v36 = vor.u32 %v6613_v30, %v5460_v31 }
  0xb9   : > { %1312 = vmatmul.bf16.gmra.mxu3 %v7481_v40  ;;  %v629_v22 = vadd.f32 %v628_v45, %v7401_v46  ;;  %v5519_v32 = vor.u32 %v6629_v28, %v5518_v27  ;;  %v672_v37 = vpop.f32.mrf.mxu3  ;;  %v6646_v27 = vld [vmem:[%s9360_s3 + $0x214] sm:$0xf]  ;;  %v5592_v28 = vld [vmem:[%s9360_s3 + $0x21c] sm:$0xf0] }
  0xba   : > { %1361 = vmatmul.bf16.gmra.mxu0 %v7484_v47  ;;  %v611_v52 = vpop.f32.mrf.mxu0  ;;  %1499 = vmatpush.bf16.msra.mxu3 %v5463_v36  ;;  %v5595_v31 = vor.u32 %v6646_v27, %v5592_v28  ;;  %v6643_v36 = vld [vmem:[%s9360_s3 + $0x1fc] sm:$0xf] }
  0xbb   : > { %v660_v55 = vpop.f32.mrf.mxu1  ;;  %v612_v4 = vadd.f32 %v611_v52, %v7401_v46  ;;  %v772_v34 = vmax.f32 %v629_v22, 0.0  ;;  %1404 = vmatpush.bf16.msrb.mxu1 %v5519_v32 }
  0xbc   : > { %v661_v2 = vadd.f32 %v660_v55, %v7398_v43 }
  0xbd   : > { %5322 = vmatmul.msk.bf16.gmra.mxu2 %vm567_vm0, %v7240_v35  ;;  %v751_v13 = vmax.f32 %v612_v4, 0.0  ;;  %v7559_v42 = vpack.c.bf16 %v772_v34, %v769_v33  ;;  %v673_v4 = vadd.f32 %v672_v37, %v7398_v43  ;;  %v5580_v37 = vld [vmem:[%s9360_s3 + $0x204] sm:$0xf0] }
  0xbe   : > { %v752_v11 = vmax.f32 %v661_v2, 0.0  ;;  %v5451_v2 = vor.u32 %v6610_v60, %v5448_v62 }
  0xc0   : > { %v631_v3 = vpop.f32.mrf.mxu2  ;;  %1500 = vmatpush.bf16.msra.mxu3 %v5451_v2 }
  0xc1   : > { %v7520_v35 = vadd.f32 %v631_v3, %v7401_v46  ;;  %v675_v59 = vpop.f32.mrf.mxu3  ;;  %v671_v3 = vadd.f32 %v670_v15, %v7398_v43  ;;  %v5604_v15 = vld [vmem:[%s9360_s3 + $0x234] sm:$0xf0] }
  0xc2   : > { %v613_v5 = vpop.f32.mrf.mxu0  ;;  %v676_v32 = vadd.f32 %v675_v59, %v7398_v43 }
  0xc3   : > { %v614_v8 = vadd.f32 %v613_v5, %v7401_v46  ;;  %v662_v9 = vpop.f32.mrf.mxu1  ;;  %v775_v0 = vmax.f32 %v7520_v35, 0.0 }
  0xc4   : > { %v663_v12 = vadd.f32 %v662_v9, %v7398_v43  ;;  %v767_v9 = vmax.f32 %v673_v4, 0.0  ;;  %v5544_v4 = vld [vmem:[%s9360_s3 + $0x1bc] sm:$0xf0] }
  0xc5   : > { %v754_v14 = vmax.f32 %v614_v8, 0.0  ;;  %v764_v8 = vmax.f32 %v671_v3, 0.0  ;;  %v6634_v3 = vld [vmem:[%s9360_s3 + $0x1b4] sm:$0xf] }
  0xc6   : > { %v755_v16 = vmax.f32 %v663_v12, 0.0 }
  0xc7   : > { %v7536_v20 = vpack.c.bf16 %v754_v14, %v751_v13  ;;  %v6649_v14 = vld [vmem:[%s9360_s3 + $0x22c] sm:$0xf] }
  0xc8   : > { %v633_v24 = vpop.f32.mrf.mxu2  ;;  %v7539_v25 = vpack.c.bf16 %v755_v16, %v752_v11  ;;  %v7590_v11 = vpack.c.bf16 %v767_v9, %v764_v8  ;;  %v5607_v23 = vor.u32 %v6649_v14, %v5604_v15  ;;  %v5547_v8 = vor.u32 %v6634_v3, %v5544_v4  ;;  %v6648_v3 = vld [vmem:[%s9360_s3 + $0x220] sm:$0xf0] }
  0xc9   : > { %1317 = vmatmul.bf16.gmra.mxu3 %v7536_v20  ;;  %v634_v56 = vadd.f32 %v633_v24, %v7401_v46  ;;  %v677_v10 = vpop.f32.mrf.mxu3 }
  0xca   : > { %1366 = vmatmul.bf16.gmra.mxu0 %v7539_v25  ;;  %v616_v26 = vpop.f32.mrf.mxu0  ;;  %v678_v33 = vadd.f32 %v677_v10, %v7398_v43 }
  0xcb   : > { %v665_v29 = vpop.f32.mrf.mxu1  ;;  %v617_v45 = vadd.f32 %v616_v26, %v7401_v46  ;;  %v778_v1 = vmax.f32 %v634_v56, 0.0  ;;  %1544 = vmatpush.bf16.msra.mxu0 %v5607_v23  ;;  %v5556_v56 = vld [vmem:[%s9360_s3 + $0x1d4] sm:$0xf0]  ;;  %v6628_v23 = vld [vmem:[%s9360_s3 + $0x184] sm:$0xf] }
  0xcc   : > { %v666_v39 = vadd.f32 %v665_v29, %v7398_v43 }
  0xcd   : > { %5323 = vmatmul.msk.bf16.gmra.mxu2 %vm567_vm0, %v7262_v44  ;;  %v757_v53 = vmax.f32 %v617_v45, 0.0  ;;  %v7584_v6 = vpack.c.bf16 %v778_v1, %v775_v0  ;;  %v770_v45 = vmax.f32 %v676_v32, 0.0  ;;  %v6604_v0 = vld [vmem:[%s9360_s3 + $0xc4] sm:$0xf]  ;;  %v5424_v1 = vld [vmem:[%s9360_s3 + $0xcc] sm:$0xf0] }
  0xce   : > { %v758_v52 = vmax.f32 %v666_v39, 0.0  ;;  %v5427_v2 = vor.u32 %v6604_v0, %v5424_v1 }
  0xcf   : > { %1545 = vmatpush.bf16.msra.mxu0 %v5595_v31 }
  0xd0   : > { %v636_v41 = vpop.f32.mrf.mxu2 }
  0xd1   : > { %v7563_v48 = vadd.f32 %v636_v41, %v7401_v46  ;;  %v680_v30 = vpop.f32.mrf.mxu3  ;;  %v5583_v41 = vor.u32 %v6643_v36, %v5580_v37  ;;  %v6651_v36 = vld [vmem:[%s9360_s3 + $0x238] sm:$0xf0] }
  0xd2   : > { %v618_v49 = vpop.f32.mrf.mxu0  ;;  %v681_v9 = vadd.f32 %v680_v30, %v7398_v43 }
  0xd3   : > { %v619_v19 = vadd.f32 %v618_v49, %v7401_v46  ;;  %v667_v51 = vpop.f32.mrf.mxu1  ;;  %v781_v22 = vmax.f32 %v7563_v48, 0.0  ;;  %v773_v48 = vmax.f32 %v678_v33, 0.0  ;;  %1546 = vmatpush.bf16.msra.mxu0 %v5583_v41  ;;  %v6640_v49 = vld [vmem:[%s9360_s3 + $0x1e4] sm:$0xf]  ;;  %v5418_v41 = vld [vmem:[%s9360_s3 + $0xb0] sm:$0xf] }
  0xd4   : > { %v668_v44 = vadd.f32 %v667_v51, %v7398_v43 }
  0xd5   : > { %v760_v54 = vmax.f32 %v619_v19, 0.0  ;;  %v5568_v19 = vld [vmem:[%s9360_s3 + $0x1ec] sm:$0xf0] }
  0xd6   : > { %v761_v55 = vmax.f32 %v668_v44, 0.0  ;;  %v5571_v51 = vor.u32 %v6640_v49, %v5568_v19  ;;  %v7636_v44 = vpack.c.bf16 %v773_v48, %v770_v45  ;;  %v6603_v45 = vld [vmem:[%s9360_s3 + $0xb8] sm:$0xf0] }
  0xd7   : > { %v7567_v17 = vpack.c.bf16 %v760_v54, %v757_v53  ;;  %v5419_v49 = vor.u32 %v6603_v45, %v5418_v41  ;;  %v5466_v41 = vld [vmem:[%s9360_s3 + $0x110] sm:$0xf] }
  0xd8   : > { %v638_v57 = vpop.f32.mrf.mxu2  ;;  %v7570_v58 = vpack.c.bf16 %v761_v55, %v758_v52  ;;  %1547 = vmatpush.bf16.msra.mxu0 %v5571_v51  ;;  %v6637_v55 = vld [vmem:[%s9360_s3 + $0x1cc] sm:$0xf] }
  0xd9   : > { %1322 = vmatmul.bf16.gmra.mxu3 %v7567_v17  ;;  %v639_v12 = vadd.f32 %v638_v57, %v7401_v46  ;;  %v6607_v46 = vld [vmem:[%s9360_s3 + $0xdc] sm:$0xf]  ;;  %v682_v53 = vpop.f32.mrf.mxu3  ;;  %v5559_v60 = vor.u32 %v6637_v55, %v5556_v56  ;;  %1593 = vmatpush.bf16.msra.mxu1 %v5419_v49 }
  0xda   : > { %1371 = vmatmul.bf16.gmra.mxu0 %v7570_v58  ;;  %v5439_v26 = vor.u32 %v6607_v46, %v5436_v21  ;;  %v683_v10 = vadd.f32 %v682_v53, %v7398_v43 }
  0xdb   : > { %v784_v24 = vmax.f32 %v639_v12, 0.0  ;;  %v6631_v12 = vld [vmem:[%s9360_s3 + $0x19c] sm:$0xf] }
  0xdc   : > { %1501 = vmatpush.bf16.msra.mxu3 %v5439_v26  ;;  %1548 = vmatpush.bf16.msra.mxu0 %v5559_v60  ;;  %v6627_v26 = vld [vmem:[%s9360_s3 + $0x178] sm:$0xf0] }
  0xdd   : > { %1454 = vmatmul.bf16.vlgmr.msra.gmra.mxu2 %v7418_v61  ;;  %v7627_v39 = vpack.c.bf16 %v784_v24, %v781_v22  ;;  %v5514_v24 = vld [vmem:[%s9360_s3 + $0x170] sm:$0xf] }
  0xde   : > { %v5515_v28 = vor.u32 %v6627_v26, %v5514_v24 }
  0xe0   : > { %v699_v5 = vpop.f32.mrf.mxu2  ;;  %1502 = vmatpush.bf16.msra.mxu3 %v5427_v2  ;;  %1549 = vmatpush.bf16.msra.mxu0 %v5547_v8  ;;  %v5598_v2 = vld [vmem:[%s9360_s3 + $0x218] sm:$0xf] }
  0xe1   : > { %v700_v35 = vadd.f32 %v699_v5, %v7587_v7  ;;  %v685_v14 = vpop.f32.mrf.mxu3  ;;  %1642 = vmatpush.bf16.msrb.mxu2 %v5515_v28  ;;  %v5599_v4 = vor.u32 %v6648_v3, %v5598_v2  ;;  %v5406_v8 = vld [vmem:[%s9360_s3 + $0x98] sm:$0xf] }
  0xe2   : > { %v686_v19 = vadd.f32 %v685_v14, %v7398_v43  ;;  %v6621_v14 = vld [vmem:[%s9360_s3 + $0x148] sm:$0xf0] }
  0xe3   : > { %v741_v38 = vmax.f32 %v700_v35, 0.0 }
  0xe4   : > { %v782_v53 = vmax.f32 %v686_v19, 0.0 }
  0xe8   : > { %v701_v13 = vpop.f32.mrf.mxu2 }
  0xe9   : > { %v702_v16 = vadd.f32 %v701_v13, %v7587_v7  ;;  %1327 = vmatmul.bf16.gmra.mxu3 %v7516_v50  ;;  %v5532_v13 = vld [vmem:[%s9360_s3 + $0x1a4] sm:$0xf0]  ;;  %v687_v33 = vpop.f32.mrf.mxu3 }
  0xea   : > { %1376 = vmatmul.bf16.gmra.mxu0 %v7590_v11  ;;  %v5535_v15 = vor.u32 %v6631_v12, %v5532_v13  ;;  %v688_v51 = vadd.f32 %v687_v33, %v7398_v43  ;;  %v5490_v13 = vld [vmem:[%s9360_s3 + $0x140] sm:$0xf] }
  0xeb   : > { %v744_v18 = vmax.f32 %v702_v16, 0.0  ;;  %v779_v16 = vmax.f32 %v683_v10, 0.0 }
  0xec   : > { %1550 = vmatpush.bf16.msra.mxu0 %v5535_v15 }
  0xed   : > { %1459 = vmatmul.bf16.gmra.mxu2 %v7481_v40  ;;  %v7616_v29 = vpack.c.bf16 %v744_v18, %v741_v38  ;;  %v776_v38 = vmax.f32 %v681_v9, 0.0  ;;  %v5520_v18 = vld [vmem:[%s9360_s3 + $0x18c] sm:$0xf0]  ;;  %v6600_v9 = vld [vmem:[%s9360_s3 + $0xa0] sm:$0xf0] }
  0xee   : > { %v5523_v21 = vor.u32 %v6628_v23, %v5520_v18 }
  0xef   : > { %1405 = vmatmul.bf16.vlgmr.msrb.gmra.mxu1 %v7616_v29  ;;  %v7678_v22 = vpack.c.bf16 %v779_v16, %v776_v38  ;;  %v5491_v38 = vor.u32 %v6621_v14, %v5490_v13  ;;  %v7745_v16 = vld [vmem:[%s9361_s4] sm:$0x7] }
  0xf0   : > { %v704_v34 = vpop.f32.mrf.mxu2  ;;  %1551 = vmatpush.bf16.msra.mxu0 %v5523_v21  ;;  %v6618_v21 = vld [vmem:[%s9360_s3 + $0x130] sm:$0xf0] }
  0xf1   : > { %v705_v52 = vadd.f32 %v704_v34, %v7587_v7  ;;  %v5610_v34 = vld [vmem:[%s9360_s3 + $0x230] sm:$0xf] }
  0xf2   : > { %v5611_v37 = vor.u32 %v6651_v36, %v5610_v34  ;;  %v5394_v36 = vld [vmem:[%s9360_s3 + $0x80] sm:$0xf] }
  0xf3   : > { %v747_v57 = vmax.f32 %v705_v52, 0.0 }
  0xf4   : > { %1691 = vmatpush.bf16.msrb.mxu3 %v5611_v37  ;;  %v6597_v37 = vld [vmem:[%s9360_s3 + $0x88] sm:$0xf0] }
  0xf5   : > { %v5395_v19 = vor.u32 %v6597_v37, %v5394_v36 }
  0xf8   : > { %v706_v54 = vpop.f32.mrf.mxu2  ;;  %1692 = vmatpush.bf16.msrb.mxu3 %v5599_v4 }
  0xf9   : > { %v707_v59 = vadd.f32 %v706_v54, %v7587_v7  ;;  %1332 = vmatmul.bf16.gmra.mxu3 %v7559_v42  ;;  %v785_v54 = vmax.f32 %v688_v51, 0.0  ;;  %v6615_v51 = vld [vmem:[%s9360_s3 + $0x118] sm:$0xf0] }
  0xfa   : > { %1381 = vmatmul.bf16.gmra.mxu0 %v7636_v44 }
  0xfb   : > { %v750_v62 = vmax.f32 %v707_v59, 0.0  ;;  %v7708_v56 = vpack.c.bf16 %v785_v54, %v782_v53  ;;  %v6624_v59 = vld [vmem:[%s9360_s3 + $0x160] sm:$0xf0] }
  0xfd   : > { %1464 = vmatmul.bf16.gmra.mxu2 %v7536_v20  ;;  %v7660_v5 = vpack.c.bf16 %v750_v62, %v747_v57  ;;  %v5502_v57 = vld [vmem:[%s9360_s3 + $0x158] sm:$0xf] }
  0xfe   : > { %v5503_v60 = vor.u32 %v6624_v59, %v5502_v57  ;;  %v5454_v57 = vld [vmem:[%s9360_s3 + $0xf8] sm:$0xf]  ;;  %v6612_v59 = vld [vmem:[%s9360_s3 + $0x100] sm:$0xf0] }
  0xff   : > { %1410 = vmatmul.bf16.gmra.mxu1 %v7660_v5 }
 0x100   : > { %v709_v35 = vpop.f32.mrf.mxu2  ;;  %1643 = vmatpush.bf16.msrb.mxu2 %v5503_v60 }
 0x101   : > { %v710_v46 = vadd.f32 %v709_v35, %v7587_v7  ;;  %v5407_v35 = vor.u32 %v6600_v9, %v5406_v8 }
 0x103   : > { %v753_v30 = vmax.f32 %v710_v46, 0.0  ;;  %1594 = vmatpush.bf16.msra.mxu1 %v5407_v35  ;;  %v5478_v46 = vld [vmem:[%s9360_s3 + $0x128] sm:$0xf] }
 0x104   : > { %1644 = vmatpush.bf16.msrb.mxu2 %v5491_v38  ;;  %v5479_v28 = vor.u32 %v6618_v21, %v5478_v46  ;;  %v5430_v35 = vld [vmem:[%s9360_s3 + $0xc8] sm:$0xf]  ;;  %v6642_v21 = vld [vmem:[%s9360_s3 + $0x1f0] sm:$0xf0] }
 0x105   : > { %v5382_v38 = vld [vmem:[%s9360_s3 + $0x68] sm:$0xf] }
 0x106   : > { %v5574_v46 = vld [vmem:[%s9360_s3 + $0x1e8] sm:$0xf] }
 0x107   : > { %1595 = vmatpush.bf16.msra.mxu1 %v5395_v19  ;;  %v6588_v19 = vld [vmem:[%s9360_s3 + $0x40] sm:$0xf0] }
 0x108   : > { %v711_v27 = vpop.f32.mrf.mxu2  ;;  %1645 = vmatpush.bf16.msrb.mxu2 %v5479_v28  ;;  %v5575_v28 = vor.u32 %v6642_v21, %v5574_v46 }
 0x109   : > { %v712_v31 = vadd.f32 %v711_v27, %v7587_v7  ;;  %1337 = vmatmul.bf16.gmra.mxu3 %v7584_v6  ;;  %v7756_v27 = vperm.slane %v7745_v16, 0 }
 0x10a   : > { %1386 = vmatmul.bf16.gmra.mxu0 %v7678_v22 }
 0x10b   : > { %v756_v32 = vmax.f32 %v712_v31, 0.0  ;;  %v5586_v31 = vld [vmem:[%s9360_s3 + $0x200] sm:$0xf] }
 0x10d   : > { %1469 = vmatmul.bf16.gmra.mxu2 %v7567_v17  ;;  %v7702_v48 = vpack.c.bf16 %v756_v32, %v753_v30  ;;  %v6645_v32 = vld [vmem:[%s9360_s3 + $0x208] sm:$0xf0] }
 0x10e   : > { %v5587_v34 = vor.u32 %v6645_v32, %v5586_v31  ;;  %v5370_v32 = vld [vmem:[%s9360_s3 + $0x50] sm:$0xf] }
 0x10f   : > { %1415 = vmatmul.bf16.gmra.mxu1 %v7702_v48 }
 0x110   : > { %v714_v52 = vpop.f32.mrf.mxu2  ;;  %1693 = vmatpush.bf16.msrb.mxu3 %v5587_v34 }
 0x111   : > { %v715_v55 = vadd.f32 %v714_v52, %v7587_v7  ;;  %v5467_v52 = vor.u32 %v6615_v51, %v5466_v41 }
 0x113   : > { %v759_v62 = vmax.f32 %v715_v55, 0.0  ;;  %1646 = vmatpush.bf16.msrb.mxu2 %v5467_v52 }
 0x114   : > { %1694 = vmatpush.bf16.msrb.mxu3 %v5575_v28 }
 0x118   : > { %v716_v43 = vpop.f32.mrf.mxu2 }
 0x119   : > { %v717_v0 = vadd.f32 %v716_v43, %v7587_v7  ;;  %1342 = vmatmul.bf16.gmra.mxu3 %v7627_v39  ;;  %v5455_v43 = vor.u32 %v6612_v59, %v5454_v57  ;;  %v5346_v57 = vld [vmem:[%s9360_s3 + $0x20] sm:$0xf]  ;;  %v6585_v59 = vld [vmem:[%s9360_s3 + $0x28] sm:$0xf0] }
 0x11a   : > { %1391 = vmatmul.bf16.gmra.mxu0 %v7708_v56 }
 0x11b   : > { %v762_v1 = vmax.f32 %v717_v0, 0.0  ;;  %1647 = vmatpush.bf16.msrb.mxu2 %v5455_v43  ;;  %v6609_v0 = vld [vmem:[%s9360_s3 + $0xe8] sm:$0xf0] }
 0x11d   : > { %1474 = vmatmul.bf16.gmra.mxu2 %v7516_v50  ;;  %v7732_v10 = vpack.c.bf16 %v762_v1, %v759_v62  ;;  %v5442_v62 = vld [vmem:[%s9360_s3 + $0xe0] sm:$0xf] }
 0x11e   : > { %v5443_v3 = vor.u32 %v6609_v0, %v5442_v62 }
 0x11f   : > { %1420 = vmatmul.bf16.gmra.mxu1 %v7732_v10 }
 0x120   : > { %v719_v12 = vpop.f32.mrf.mxu2  ;;  %1648 = vmatpush.bf16.msrb.mxu2 %v5443_v3  ;;  %v5562_v3 = vld [vmem:[%s9360_s3 + $0x1d0] sm:$0xf] }
 0x121   : > { %v720_v15 = vadd.f32 %v719_v12, %v7587_v7  ;;  %v6606_v12 = vld [vmem:[%s9360_s3 + $0xd0] sm:$0xf0] }
 0x123   : > { %v765_v24 = vmax.f32 %v720_v15, 0.0  ;;  %v5431_v15 = vor.u32 %v6606_v12, %v5430_v35 }
 0x125   : > { %1649 = vmatpush.bf16.msrb.mxu2 %v5431_v15 }
 0x127   : > { %v1357_v23 = vpop.f32.mrf.mxu0 }
 0x128   : > { %v721_v18 = vpop.f32.mrf.mxu2 }
 0x129   : > { %v722_v26 = vadd.f32 %v721_v18, %v7587_v7  ;;  %1503 = vmatmul.bf16.vlgmr.msra.gmra.mxu3 %v7420_v63 }
 0x12a   : > { %1552 = vmatmul.bf16.vlgmr.msra.gmra.mxu0 %v7616_v29 }
 0x12b   : > { %v768_v30 = vmax.f32 %v722_v26, 0.0 }
 0x12c   : > { %v1308_v33 = vpop.f32.mrf.mxu3 }
 0x12d   : > { %v1309_v45 = vadd.f32 %v1308_v33, %v7756_v27  ;;  %1479 = vmatmul.bf16.gmra.mxu2 %v7559_v42  ;;  %v7776_v49 = vpack.c.bf16 %v768_v30, %v765_v24  ;;  %v6591_v33 = vld [vmem:[%s9360_s3 + $0x58] sm:$0xf0] }
 0x12e   : > { %v5371_v36 = vor.u32 %v6591_v33, %v5370_v32 }
 0x12f   : > { %v1359_v53 = vpop.f32.mrf.mxu0  ;;  %1425 = vmatmul.bf16.gmra.mxu1 %v7776_v49  ;;  %v7782_v54 = vadd.f32 %v1357_v23, %v1309_v45  ;;  %v6594_v23 = vld [vmem:[%s9360_s3 + $0x70] sm:$0xf0]  ;;  %v5358_v45 = vld [vmem:[%s9360_s3 + $0x38] sm:$0xf] }
 0x130   : > { %v724_v55 = vpop.f32.mrf.mxu2  ;;  %v5383_v24 = vor.u32 %v6594_v23, %v5382_v38  ;;  %v5359_v51 = vor.u32 %v6588_v19, %v5358_v45  ;;  %v6636_v45 = vld [vmem:[%s9360_s3 + $0x1c0] sm:$0xf0] }
 0x131   : > { %v725_v1 = vadd.f32 %v724_v55, %v7587_v7 }
 0x132   : > { %1596 = vmatpush.bf16.msra.mxu1 %v5383_v24 }
 0x133   : > { %v771_v13 = vmax.f32 %v725_v1, 0.0 }
 0x134   : > { %v1310_v60 = vpop.f32.mrf.mxu3 }
 0x135   : > { %v1311_v2 = vadd.f32 %v1310_v60, %v7756_v27  ;;  %v5347_v60 = vor.u32 %v6585_v59, %v5346_v57 }
 0x136   : > { %1597 = vmatpush.bf16.msra.mxu1 %v5371_v36 }
 0x137   : > { %v1362_v4 = vpop.f32.mrf.mxu0  ;;  %v7798_v8 = vadd.f32 %v1359_v53, %v1311_v2 }
 0x138   : > { %v726_v9 = vpop.f32.mrf.mxu2 }
 0x139   : > { %v727_v14 = vadd.f32 %v726_v9, %v7587_v7  ;;  %1508 = vmatmul.bf16.gmra.mxu3 %v7484_v47  ;;  %v5334_v9 = vld [vmem:[%s9360_s3 + $0x8] sm:$0xf] }
 0x13a   : > { %1557 = vmatmul.bf16.gmra.mxu0 %v7660_v5  ;;  %1598 = vmatpush.bf16.msra.mxu1 %v5359_v51 }
 0x13b   : > { %v774_v18 = vmax.f32 %v727_v14, 0.0 }
 0x13c   : > { %v1313_v26 = vpop.f32.mrf.mxu3 }
 0x13d   : > { %v1314_v30 = vadd.f32 %v1313_v26, %v7756_v27  ;;  %1484 = vmatmul.bf16.gmra.mxu2 %v7584_v6  ;;  %v7823_v31 = vpack.c.bf16 %v774_v18, %v771_v13  ;;  %v6582_v13 = vld [vmem:[%s9360_s3 + $0x10] sm:$0xf0] }
 0x13e   : > { %1599 = vmatpush.bf16.msra.mxu1 %v5347_v60  ;;  %v5335_v15 = vor.u32 %v6582_v13, %v5334_v9 }
 0x13f   : > { %v1364_v34 = vpop.f32.mrf.mxu0  ;;  %1430 = vmatmul.bf16.gmra.mxu1 %v7823_v31  ;;  %v7832_v37 = vadd.f32 %v1362_v4, %v1314_v30  ;;  %v6639_v4 = vld [vmem:[%s9360_s3 + $0x1d8] sm:$0xf0] }
 0x140   : > { %v729_v41 = vpop.f32.mrf.mxu2  ;;  %v5563_v12 = vor.u32 %v6639_v4, %v5562_v3  ;;  %v6633_v4 = vld [vmem:[%s9360_s3 + $0x1a8] sm:$0xf0] }
 0x141   : > { %v730_v53 = vadd.f32 %v729_v41, %v7587_v7  ;;  %v5550_v41 = vld [vmem:[%s9360_s3 + $0x1b8] sm:$0xf] }
 0x142   : > { %1695 = vmatpush.bf16.msrb.mxu3 %v5563_v12  ;;  %1600 = vmatpush.bf16.msra.mxu1 %v5335_v15  ;;  %v5551_v51 = vor.u32 %v6636_v45, %v5550_v41  ;;  %v6671_v15 = vld [vmem:[#allocation2 + $0x98] sm:$0xf0]  ;;  %v5662_v41 = vld [vmem:[#allocation2 + $0x60] sm:$0xf]  ;;  %v6665_v45 = vld [vmem:[#allocation2 + $0x68] sm:$0xf0] }
 0x143   : > { %v777_v1 = vmax.f32 %v730_v53, 0.0 }
 0x144   : > { %v1315_v52 = vpop.f32.mrf.mxu3 }
 0x145   : > { %v1316_v55 = vadd.f32 %v1315_v52, %v7756_v27 }
 0x146   : > { %1696 = vmatpush.bf16.msrb.mxu3 %v5551_v51 }
 0x147   : > { %v1367_v43 = vpop.f32.mrf.mxu0  ;;  %v7848_v62 = vadd.f32 %v1364_v34, %v1316_v55 }
 0x148   : > { %v731_v0 = vpop.f32.mrf.mxu2 }
 0x149   : > { %v732_v2 = vadd.f32 %v731_v0, %v7587_v7  ;;  %1513 = vmatmul.bf16.gmra.mxu3 %v7539_v25 }
 0x14a   : > { %1562 = vmatmul.bf16.gmra.mxu0 %v7702_v48 }
 0x14b   : > { %v780_v35 = vmax.f32 %v732_v2, 0.0  ;;  %v6674_v2 = vld [vmem:[#allocation2 + $0xb0] sm:$0xf0] }
 0x14c   : > { %v1318_v14 = vpop.f32.mrf.mxu3 }
 0x14d   : > { %v1319_v38 = vadd.f32 %v1318_v14, %v7756_v27  ;;  %1489 = vmatmul.bf16.gmra.mxu2 %v7627_v39  ;;  %v7867_v23 = vpack.c.bf16 %v780_v35, %v777_v1  ;;  %v5698_v1 = vld [vmem:[#allocation2 + $0xa8] sm:$0xf]  ;;  %v5686_v14 = vld [vmem:[#allocation2 + $0x90] sm:$0xf] }
 0x14e   : > { %v5699_v3 = vor.u32 %v6674_v2, %v5698_v1  ;;  %v6630_v2 = vld [vmem:[%s9360_s3 + $0x190] sm:$0xf0] }
 0x14f   : > { %v1369_v18 = vpop.f32.mrf.mxu0  ;;  %1435 = vmatmul.bf16.gmra.mxu1 %v7867_v23  ;;  %v7870_v46 = vadd.f32 %v1367_v43, %v1319_v38 }
 0x150   : > { %v734_v21 = vpop.f32.mrf.mxu2  ;;  %2300 = vmatpush.bf16.msrb.mxu0 %v5699_v3 }
 0x151   : > { %v735_v26 = vadd.f32 %v734_v21, %v7587_v7 }
 0x153   : > { %v783_v34 = vmax.f32 %v735_v26, 0.0  ;;  %v5674_v26 = vld [vmem:[#allocation2 + $0x78] sm:$0xf] }
 0x154   : > { %v1320_v24 = vpop.f32.mrf.mxu3 }
 0x155   : > { %v1321_v28 = vadd.f32 %v1320_v24, %v7756_v27 }
 0x157   : > { %v1372_v30 = vpop.f32.mrf.mxu0  ;;  %v7874_v32 = vadd.f32 %v1369_v18, %v1321_v28  ;;  %v5687_v18 = vor.u32 %v6671_v15, %v5686_v14  ;;  %v6668_v28 = vld [vmem:[#allocation2 + $0x80] sm:$0xf0] }
 0x158   : > { %v736_v33 = vpop.f32.mrf.mxu2 }
 0x159   : > { %v737_v36 = vadd.f32 %v736_v33, %v7587_v7  ;;  %1518 = vmatmul.bf16.gmra.mxu3 %v7570_v58  ;;  %2301 = vmatpush.bf16.msrb.mxu0 %v5687_v18 }
 0x15a   : > { %1567 = vmatmul.bf16.gmra.mxu0 %v7732_v10 }
 0x15b   : > { %v786_v19 = vmax.f32 %v737_v36, 0.0 }
 0x15c   : > { %v1323_v52 = vpop.f32.mrf.mxu3 }
 0x15d   : > { %v1324_v53 = vadd.f32 %v1323_v52, %v7756_v27  ;;  %1650 = vmatmul.bf16.vlgmr.msrb.gmra.mxu2 %v7420_v63  ;;  %v7887_v7 = vpack.c.bf16 %v786_v19, %v783_v34  ;;  %v5538_v63 = vld [vmem:[%s9360_s3 + $0x1a0] sm:$0xf] }
 0x15e   : > { %v5539_v35 = vor.u32 %v6633_v4, %v5538_v63 }
 0x15f   : > { %v1374_v55 = vpop.f32.mrf.mxu0  ;;  %1440 = vmatmul.bf16.gmra.mxu1 %v7887_v7  ;;  %v7890_v57 = vadd.f32 %v1372_v30, %v1324_v53  ;;  %v5675_v30 = vor.u32 %v6668_v28, %v5674_v26  ;;  %v6656_v26 = vld [vmem:[#allocation2 + $0x20] sm:$0xf0] }
 0x160   : > { %v7903_v9 = vpop.f32.mrf.mxu2  ;;  %1697 = vmatpush.bf16.msrb.mxu3 %v5539_v35  ;;  %v5638_v35 = vld [vmem:[#allocation2 + $0x30] sm:$0xf] }
 0x161   : > { %2302 = vmatpush.bf16.msrb.mxu0 %v5675_v30 }
 0x164   : > { %v1325_v59 = vpop.f32.mrf.mxu3 }
 0x165   : > { %v1326_v43 = vadd.f32 %v1325_v59, %v7756_v27 }
 0x167   : > { %v1377_v60 = vpop.f32.mrf.mxu0  ;;  %v7893_v0 = vadd.f32 %v1374_v55, %v1326_v43  ;;  %v5650_v43 = vld [vmem:[#allocation2 + $0x48] sm:$0xf] }
 0x168   : > { %v7911_v19 = vpop.f32.mrf.mxu2 }
 0x169   : > { %1523 = vmatmul.bf16.gmra.mxu3 %v7590_v11 }
 0x16a   : > { %1572 = vmatmul.bf16.gmra.mxu0 %v7776_v49 }
 0x16c   : > { %v1328_v12 = vpop.f32.mrf.mxu3  ;;  %v1406_v13 = vpop.f32.mrf.mxu1 }
 0x16d   : > { %v1329_v38 = vadd.f32 %v1328_v12, %v7756_v27  ;;  %1655 = vmatmul.bf16.gmra.mxu2 %v7484_v47  ;;  %v1407_v33 = vadd.f32 %v1406_v13, %v7782_v54  ;;  %v6662_v54 = vld [vmem:[#allocation2 + $0x50] sm:$0xf0]  ;;  %v6659_v12 = vld [vmem:[#allocation2 + $0x38] sm:$0xf0] }
 0x16e   : > { %v5651_v1 = vor.u32 %v6662_v54, %v5650_v43  ;;  %v5639_v14 = vor.u32 %v6659_v12, %v5638_v35 }
 0x16f   : > { %v1379_v21 = vpop.f32.mrf.mxu0  ;;  %1601 = vmatmul.bf16.vlgmr.msra.gmra.mxu1 %v7418_v61  ;;  %v7908_v24 = vadd.f32 %v1377_v60, %v1329_v38  ;;  %v5663_v61 = vor.u32 %v6665_v45, %v5662_v41  ;;  %v1740_v52 = vmax.f32 %v1407_v33, 0.0 }
 0x170   : > { %v7929_v15 = vpop.f32.mrf.mxu2 }
 0x171   : > { %2303 = vmatpush.bf16.msrb.mxu0 %v5663_v61 }
 0x174   : > { %v1330_v34 = vpop.f32.mrf.mxu3  ;;  %v1408_v36 = vpop.f32.mrf.mxu1 }
 0x175   : > { %v1331_v47 = vadd.f32 %v1330_v34, %v7756_v27  ;;  %v1409_v51 = vadd.f32 %v1408_v36, %v7798_v8  ;;  %v5526_v8 = vld [vmem:[%s9360_s3 + $0x188] sm:$0xf]  ;;  %2304 = vmatpush.bf16.msrb.mxu0 %v5651_v1  ;;  %v5614_v36 = vld [vmem:[#allocation2] sm:$0xf] }
 0x176   : > { %v5527_v3 = vor.u32 %v6630_v2, %v5526_v8  ;;  %v5794_v8 = vld [vmem:[#allocation2 + $0x168] sm:$0xf]  ;;  %v6698_v2 = vld [vmem:[#allocation2 + $0x170] sm:$0xf0] }
 0x177   : > { %v1743_v53 = vmax.f32 %v1409_v51, 0.0  ;;  %v1382_v55 = vpop.f32.mrf.mxu0  ;;  %v7915_v59 = vadd.f32 %v1379_v21, %v1331_v47  ;;  %v5626_v21 = vld [vmem:[#allocation2 + $0x18] sm:$0xf] }
 0x178   : > { %1698 = vmatpush.bf16.msrb.mxu3 %v5527_v3  ;;  %v5627_v28 = vor.u32 %v6656_v26, %v5626_v21  ;;  %v5795_v3 = vor.u32 %v6698_v2, %v5794_v8 }
 0x179   : > { %v7917_v60 = vpack.c.bf16 %v1743_v53, %v1740_v52  ;;  %1528 = vmatmul.bf16.gmra.mxu3 %v7636_v44  ;;  %2305 = vmatpush.bf16.msrb.mxu0 %v5639_v14  ;;  %v7939_v53 = vpop.f32.mrf.mxu2 }
 0x17a   : > { %1577 = vmatmul.bf16.gmra.mxu0 %v7823_v31  ;;  %2349 = vmatpush.bf16.msrb.mxu1 %v5795_v3 }
 0x17b   : > { %9374 = vst [vmem:[#allocation9_spill] sm:$0xff] %v7917_v60 }
 0x17c   : > { %v1333_v63 = vpop.f32.mrf.mxu3  ;;  %v1411_v4 = vpop.f32.mrf.mxu1 }
 0x17d   : > { %v1334_v13 = vadd.f32 %v1333_v63, %v7756_v27  ;;  %1660 = vmatmul.bf16.gmra.mxu2 %v7539_v25  ;;  %v1412_v30 = vadd.f32 %v1411_v4, %v7832_v37  ;;  %2306 = vmatpush.bf16.msrb.mxu0 %v5627_v28  ;;  %v6653_v25 = vld [vmem:[#allocation2 + $0x8] sm:$0xf0]  ;;  %v5890_v28 = vld [vmem:[#allocation2 + $0x228] sm:$0xf] }
 0x17e   : > { %v5615_v47 = vor.u32 %v6653_v25, %v5614_v36 }
 0x17f   : > { %v1384_v38 = vpop.f32.mrf.mxu0  ;;  %1606 = vmatmul.bf16.gmra.mxu1 %v7481_v40  ;;  %v7932_v18 = vadd.f32 %v1382_v55, %v1334_v13  ;;  %v1746_v51 = vmax.f32 %v1412_v30, 0.0 }
 0x181   : > { %2307 = vmatpush.bf16.msrb.mxu0 %v5615_v47  ;;  %v7950_v63 = vpop.f32.mrf.mxu2  ;;  %v6695_v47 = vld [vmem:[#allocation2 + $0x158] sm:$0xf0] }
 0x184   : > { %v1335_v33 = vpop.f32.mrf.mxu3  ;;  %v1413_v34 = vpop.f32.mrf.mxu1 }
 0x185   : > { %v1336_v41 = vadd.f32 %v1335_v33, %v7756_v27  ;;  %v1414_v45 = vadd.f32 %v1413_v34, %v7848_v62 }
 0x187   : > { %v1749_v40 = vmax.f32 %v1414_v45, 0.0  ;;  %v1387_v61 = vpop.f32.mrf.mxu0  ;;  %v7937_v52 = vadd.f32 %v1384_v38, %v1336_v41  ;;  %v5782_v45 = vld [vmem:[#allocation2 + $0x150] sm:$0xf] }
 0x189   : > { %1533 = vmatmul.bf16.gmra.mxu3 %v7678_v22  ;;  %v7942_v37 = vpack.c.bf16 %v1749_v40, %v1746_v51  ;;  %v7961_v36 = vpop.f32.mrf.mxu2  ;;  %v5783_v51 = vor.u32 %v6695_v47, %v5782_v45 }
 0x18a   : > { %1582 = vmatmul.bf16.gmra.mxu0 %v7867_v23 }
 0x18b   : > { %2350 = vmatpush.bf16.msrb.mxu1 %v5783_v51 }
 0x18c   : > { %v1338_v55 = vpop.f32.mrf.mxu3  ;;  %v1416_v43 = vpop.f32.mrf.mxu1 }
 0x18d   : > { %v1339_v54 = vadd.f32 %v1338_v55, %v7756_v27  ;;  %1665 = vmatmul.bf16.gmra.mxu2 %v7570_v58  ;;  %v1417_v4 = vadd.f32 %v1416_v43, %v7870_v46  ;;  %v6722_v46 = vld [vmem:[#allocation2 + $0x230] sm:$0xf0] }
 0x18e   : > { %v5891_v34 = vor.u32 %v6722_v46, %v5890_v28 }
 0x18f   : > { %v1389_v62 = vpop.f32.mrf.mxu0  ;;  %1611 = vmatmul.bf16.gmra.mxu1 %v7536_v20  ;;  %v7948_v1 = vadd.f32 %v1387_v61, %v1339_v54  ;;  %v1752_v58 = vmax.f32 %v1417_v4, 0.0  ;;  %v6719_v4 = vld [vmem:[#allocation2 + $0x218] sm:$0xf0] }
 0x190   : > { %2398 = vmatpush.bf16.msra.mxu2 %v5891_v34 }
 0x194   : > { %v1340_v35 = vpop.f32.mrf.mxu3  ;;  %v1418_v12 = vpop.f32.mrf.mxu1 }
 0x195   : > { %v1341_v13 = vadd.f32 %v1340_v35, %v7756_v27  ;;  %v1419_v14 = vadd.f32 %v1418_v12, %v7874_v32  ;;  %v7980_v35 = vperm.slane %v7745_v16, 1 }
 0x197   : > { %v1755_v38 = vmax.f32 %v1419_v14, 0.0  ;;  %v1392_v21 = vpop.f32.mrf.mxu0  ;;  %v7955_v20 = vadd.f32 %v1389_v62, %v1341_v13  ;;  %v7971_v62 = vpop.f32.mrf.mxu2  ;;  %v1456_v13 = vadd.f32 %v7903_v9, %v7980_v35  ;;  %v1458_v16 = vadd.f32 %v7911_v19, %v7980_v35  ;;  %v6716_v19 = vld [vmem:[#allocation2 + $0x200] sm:$0xf0] }
 0x199   : > { %1538 = vmatmul.bf16.gmra.mxu3 %v7708_v56  ;;  %v7958_v26 = vpack.c.bf16 %v1755_v38, %v1752_v58  ;;  %v5770_v38 = vld [vmem:[#allocation2 + $0x138] sm:$0xf] }
 0x19a   : > { %1587 = vmatmul.bf16.gmra.mxu0 %v7887_v7 }
 0x19c   : > { %v1343_v30 = vpop.f32.mrf.mxu3  ;;  %v1421_v33 = vpop.f32.mrf.mxu1 }
 0x19d   : > { %v1344_v32 = vadd.f32 %v1343_v30, %v7756_v27  ;;  %1670 = vmatmul.bf16.gmra.mxu2 %v7590_v11  ;;  %v1422_v40 = vadd.f32 %v1421_v33, %v7890_v57  ;;  %v5878_v57 = vld [vmem:[#allocation2 + $0x210] sm:$0xf] }
 0x19f   : > { %v1394_v25 = vpop.f32.mrf.mxu0  ;;  %1616 = vmatmul.bf16.gmra.mxu1 %v7567_v17  ;;  %v7966_v41 = vadd.f32 %v1392_v21, %v1344_v32  ;;  %v1758_v11 = vmax.f32 %v1422_v40, 0.0  ;;  %v6692_v21 = vld [vmem:[#allocation2 + $0x140] sm:$0xf0] }
 0x1a0   : > { %v5771_v28 = vor.u32 %v6692_v21, %v5770_v38 }
 0x1a2   : > { %2351 = vmatpush.bf16.msrb.mxu1 %v5771_v28 }
 0x1a4   : > { %v1345_v61 = vpop.f32.mrf.mxu3  ;;  %v1423_v55 = vpop.f32.mrf.mxu1 }
 0x1a5   : > { %v1346_v43 = vadd.f32 %v1345_v61, %v7756_v27  ;;  %v1424_v54 = vadd.f32 %v1423_v55, %v7893_v0  ;;  %v5879_v27 = vor.u32 %v6719_v4, %v5878_v57  ;;  %v5758_v61 = vld [vmem:[#allocation2 + $0x120] sm:$0xf]  ;;  %v6686_v57 = vld [vmem:[#allocation2 + $0x110] sm:$0xf0]  ;;  %v1461_v4 = vadd.f32 %v7929_v15, %v7980_v35 }
 0x1a7   : > { %v1761_v8 = vmax.f32 %v1424_v54, 0.0  ;;  %v1553_v2 = vpop.f32.mrf.mxu0  ;;  %v7973_v17 = vadd.f32 %v1394_v25, %v1346_v43  ;;  %2399 = vmatpush.bf16.msra.mxu2 %v5879_v27  ;;  %v6689_v54 = vld [vmem:[#allocation2 + $0x128] sm:$0xf0] }
 0x1a9   : > { %1699 = vmatmul.bf16.vlgmr.msrb.gmra.mxu3 %v7616_v29  ;;  %v7976_v3 = vpack.c.bf16 %v1761_v8, %v1758_v11  ;;  %v7986_v29 = vpop.f32.mrf.mxu2 }
 0x1aa   : > { %2308 = vmatmul.bf16.vlgmr.msrb.gmra.mxu0 %v7917_v60 }
 0x1ac   : > { %v1426_v0 = vpop.f32.mrf.mxu1  ;;  %v1504_v12 = vpop.f32.mrf.mxu3 }
 0x1ad   : > { %1675 = vmatmul.bf16.gmra.mxu2 %v7636_v44  ;;  %v1505_v58 = vadd.f32 %v1504_v12, %v1456_v13  ;;  %v1427_v46 = vadd.f32 %v1426_v0, %v7908_v24  ;;  %v5866_v24 = vld [vmem:[#allocation2 + $0x1f8] sm:$0xf]  ;;  %v5734_v13 = vld [vmem:[#allocation2 + $0xf0] sm:$0xf] }
 0x1af   : > { %v1555_v14 = vpop.f32.mrf.mxu0  ;;  %1621 = vmatmul.bf16.gmra.mxu1 %v7516_v50  ;;  %v1554_v33 = vadd.f32 %v1553_v2, %v1505_v58  ;;  %v1764_v32 = vmax.f32 %v1427_v46, 0.0  ;;  %v5759_v2 = vor.u32 %v6689_v54, %v5758_v61  ;;  %v1463_v58 = vadd.f32 %v7939_v53, %v7980_v35 }
 0x1b1   : > { %v1741_v47 = vmax.f32 %v1554_v33, 0.0  ;;  %v7996_v55 = vpop.f32.mrf.mxu2  ;;  %2352 = vmatpush.bf16.msrb.mxu1 %v5759_v2 }
 0x1b4   : > { %v1428_v30 = vpop.f32.mrf.mxu1  ;;  %v1506_v44 = vpop.f32.mrf.mxu3 }
 0x1b5   : > { %v1429_v9 = vadd.f32 %v1428_v30, %v7915_v59  ;;  %v1507_v34 = vadd.f32 %v1506_v44, %v1458_v16  ;;  %v5867_v59 = vor.u32 %v6716_v19, %v5866_v24  ;;  %v6680_v44 = vld [vmem:[#allocation2 + $0xe0] sm:$0xf0]  ;;  %v6677_v24 = vld [vmem:[#allocation2 + $0xc8] sm:$0xf0] }
 0x1b7   : > { %v1767_v50 = vmax.f32 %v1429_v9, 0.0  ;;  %v1556_v25 = vadd.f32 %v1555_v14, %v1507_v34  ;;  %v1558_v45 = vpop.f32.mrf.mxu0  ;;  %2400 = vmatpush.bf16.msra.mxu2 %v5867_v59  ;;  %v6683_v14 = vld [vmem:[#allocation2 + $0xf8] sm:$0xf0] }
 0x1b8   : > { %v5735_v38 = vor.u32 %v6683_v14, %v5734_v13 }
 0x1b9   : > { %v1744_v51 = vmax.f32 %v1556_v25, 0.0  ;;  %1704 = vmatmul.bf16.gmra.mxu3 %v7660_v5  ;;  %v7993_v40 = vpack.c.bf16 %v1767_v50, %v1764_v32  ;;  %v5746_v5 = vld [vmem:[#allocation2 + $0x108] sm:$0xf]  ;;  %v8007_v16 = vpop.f32.mrf.mxu2 }
 0x1ba   : > { %2313 = vmatmul.bf16.gmra.mxu0 %v7942_v37  ;;  %v5747_v0 = vor.u32 %v6686_v57, %v5746_v5  ;;  %v1468_v5 = vadd.f32 %v7961_v36, %v7980_v35  ;;  %v6710_v36 = vld [vmem:[#allocation2 + $0x1d0] sm:$0xf0] }
 0x1bb   : > { %v7998_v43 = vpack.c.bf16 %v1744_v51, %v1741_v47  ;;  %v5710_v47 = vld [vmem:[#allocation2 + $0xc0] sm:$0xf] }
 0x1bc   : > { %v1431_v11 = vpop.f32.mrf.mxu1  ;;  %v1509_v8 = vpop.f32.mrf.mxu3  ;;  %2353 = vmatpush.bf16.msrb.mxu1 %v5747_v0  ;;  %v5711_v54 = vor.u32 %v6677_v24, %v5710_v47  ;;  %v6697_v24 = vld [vmem:[#allocation2 + $0x16c] sm:$0xf] }
 0x1bd   : > { %1680 = vmatmul.bf16.gmra.mxu2 %v7678_v22  ;;  %v1510_v12 = vadd.f32 %v1509_v8, %v1461_v4  ;;  %v1432_v22 = vadd.f32 %v1431_v11, %v7932_v18 }
 0x1bf   : > { %v1560_v27 = vpop.f32.mrf.mxu0  ;;  %1626 = vmatmul.bf16.gmra.mxu1 %v7559_v42  ;;  %v1559_v46 = vadd.f32 %v1558_v45, %v1510_v12  ;;  %v5722_v42 = vld [vmem:[#allocation2 + $0xd8] sm:$0xf]  ;;  %v1770_v33 = vmax.f32 %v1432_v22, 0.0  ;;  %v5854_v45 = vld [vmem:[#allocation2 + $0x1e0] sm:$0xf] }
 0x1c0   : > { %2354 = vmatpush.bf16.msrb.mxu1 %v5735_v38  ;;  %v5723_v50 = vor.u32 %v6680_v44, %v5722_v42 }
 0x1c1   : > { %v1747_v53 = vmax.f32 %v1559_v46, 0.0  ;;  %v8019_v11 = vpop.f32.mrf.mxu2 }
 0x1c4   : > { %v1433_v21 = vpop.f32.mrf.mxu1  ;;  %v1511_v28 = vpop.f32.mrf.mxu3  ;;  %2355 = vmatpush.bf16.msrb.mxu1 %v5723_v50 }
 0x1c5   : > { %v1434_v15 = vadd.f32 %v1433_v21, %v7937_v52  ;;  %v1512_v30 = vadd.f32 %v1511_v28, %v1463_v58  ;;  %v6713_v52 = vld [vmem:[#allocation2 + $0x1e8] sm:$0xf0] }
 0x1c6   : > { %v5855_v51 = vor.u32 %v6713_v52, %v5854_v45 }
 0x1c7   : > { %v1773_v9 = vmax.f32 %v1434_v15, 0.0  ;;  %v1561_v34 = vadd.f32 %v1560_v27, %v1512_v30  ;;  %v1563_v32 = vpop.f32.mrf.mxu0  ;;  %v1471_v30 = vadd.f32 %v7971_v62, %v7980_v35 }
 0x1c8   : > { %2401 = vmatpush.bf16.msra.mxu2 %v5855_v51  ;;  %2356 = vmatpush.bf16.msrb.mxu1 %v5711_v54  ;;  %v5700_v51 = vld [vmem:[#allocation2 + $0xb4] sm:$0xf0] }
 0x1c9   : > { %v1750_v25 = vmax.f32 %v1561_v34, 0.0  ;;  %1709 = vmatmul.bf16.gmra.mxu3 %v7702_v48  ;;  %v8011_v18 = vpack.c.bf16 %v1773_v9, %v1770_v33  ;;  %v1466_v48 = vadd.f32 %v7950_v63, %v7980_v35  ;;  %v8026_v22 = vpop.f32.mrf.mxu2 }
 0x1ca   : > { %2318 = vmatmul.bf16.gmra.mxu0 %v7958_v26 }
 0x1cb   : > { %v8014_v19 = vpack.c.bf16 %v1750_v25, %v1747_v53 }
 0x1cc   : > { %v1436_v61 = vpop.f32.mrf.mxu1  ;;  %v1514_v59 = vpop.f32.mrf.mxu3 }
 0x1cd   : > { %1685 = vmatmul.bf16.gmra.mxu2 %v7708_v56  ;;  %v1515_v2 = vadd.f32 %v1514_v59, %v1466_v48  ;;  %v1437_v57 = vadd.f32 %v1436_v61, %v7948_v1  ;;  %v5842_v1 = vld [vmem:[#allocation2 + $0x1c8] sm:$0xf]  ;;  %v5830_v48 = vld [vmem:[#allocation2 + $0x1b0] sm:$0xf] }
 0x1ce   : > { %v5843_v28 = vor.u32 %v6710_v36, %v5842_v1  ;;  %v5772_v36 = vld [vmem:[#allocation2 + $0x144] sm:$0xf0] }
 0x1cf   : > { %v1565_v8 = vpop.f32.mrf.mxu0  ;;  %1631 = vmatmul.bf16.gmra.mxu1 %v7584_v6  ;;  %v1564_v0 = vadd.f32 %v1563_v32, %v1515_v2  ;;  %v1776_v13 = vmax.f32 %v1437_v57, 0.0 }
 0x1d0   : > { %2402 = vmatpush.bf16.msra.mxu2 %v5843_v28 }
 0x1d1   : > { %v1753_v38 = vmax.f32 %v1564_v0, 0.0  ;;  %v8039_v33 = vpop.f32.mrf.mxu2  ;;  %v6694_v0 = vld [vmem:[#allocation2 + $0x154] sm:$0xf] }
 0x1d4   : > { %v1438_v4 = vpop.f32.mrf.mxu1  ;;  %v1516_v27 = vpop.f32.mrf.mxu3 }
 0x1d5   : > { %v1439_v56 = vadd.f32 %v1438_v4, %v7955_v20  ;;  %v1517_v12 = vadd.f32 %v1516_v27, %v1468_v5  ;;  %v6670_v27 = vld [vmem:[#allocation2 + $0x94] sm:$0xf] }
 0x1d7   : > { %v1779_v14 = vmax.f32 %v1439_v56, 0.0  ;;  %v1566_v63 = vadd.f32 %v1565_v8, %v1517_v12  ;;  %v1568_v58 = vpop.f32.mrf.mxu0  ;;  %v6707_v8 = vld [vmem:[#allocation2 + $0x1b8] sm:$0xf0] }
 0x1d8   : > { %v5831_v2 = vor.u32 %v6707_v8, %v5830_v48  ;;  %v6682_v48 = vld [vmem:[#allocation2 + $0xf4] sm:$0xf] }
 0x1d9   : > { %v1756_v6 = vmax.f32 %v1566_v63, 0.0  ;;  %1714 = vmatmul.bf16.gmra.mxu3 %v7732_v10  ;;  %v8029_v21 = vpack.c.bf16 %v1779_v14, %v1776_v13  ;;  %v1473_v10 = vadd.f32 %v7986_v29, %v7980_v35  ;;  %v8055_v56 = vpop.f32.mrf.mxu2  ;;  %v5784_v13 = vld [vmem:[#allocation2 + $0x15c] sm:$0xf0] }
 0x1da   : > { %2323 = vmatmul.bf16.gmra.mxu0 %v7976_v3  ;;  %2403 = vmatpush.bf16.msra.mxu2 %v5831_v2  ;;  %v5787_v14 = vor.u32 %v6694_v0, %v5784_v13  ;;  %v5628_v0 = vld [vmem:[#allocation2 + $0x24] sm:$0xf0] }
 0x1db   : > { %v8032_v46 = vpack.c.bf16 %v1756_v6, %v1753_v38  ;;  %v5676_v38 = vld [vmem:[#allocation2 + $0x84] sm:$0xf0]  ;;  %v6691_v6 = vld [vmem:[#allocation2 + $0x13c] sm:$0xf] }
 0x1dc   : > { %v1441_v20 = vpop.f32.mrf.mxu1  ;;  %v1519_v15 = vpop.f32.mrf.mxu3  ;;  %v5775_v28 = vor.u32 %v6691_v6, %v5772_v36  ;;  %v6652_v36 = vld [vmem:[#allocation2 + $0x4] sm:$0xf] }
 0x1dd   : > { %v1520_v44 = vadd.f32 %v1519_v15, %v1471_v30  ;;  %v1442_v9 = vadd.f32 %v1441_v20, %v7966_v41  ;;  %v5796_v41 = vld [vmem:[#allocation2 + $0x174] sm:$0xf0]  ;;  %v6664_v30 = vld [vmem:[#allocation2 + $0x64] sm:$0xf] }
 0x1df   : > { %v1570_v42 = vpop.f32.mrf.mxu0  ;;  %1636 = vmatmul.bf16.gmra.mxu1 %v7627_v39  ;;  %v1569_v50 = vadd.f32 %v1568_v58, %v1520_v44  ;;  %v1782_v45 = vmax.f32 %v1442_v9, 0.0  ;;  %v6673_v39 = vld [vmem:[#allocation2 + $0xac] sm:$0xf]  ;;  %v6667_v58 = vld [vmem:[#allocation2 + $0x7c] sm:$0xf] }
 0x1e0   : > { %v5703_v59 = vor.u32 %v6673_v39, %v5700_v51  ;;  %v5679_v1 = vor.u32 %v6667_v58, %v5676_v38  ;;  %v6688_v44 = vld [vmem:[#allocation2 + $0x124] sm:$0xf]  ;;  %v5760_v9 = vld [vmem:[#allocation2 + $0x12c] sm:$0xf0]  ;;  %v5818_v51 = vld [vmem:[#allocation2 + $0x198] sm:$0xf] }
 0x1e1   : > { %v1759_v61 = vmax.f32 %v1569_v50, 0.0  ;;  %v5724_v58 = vld [vmem:[#allocation2 + $0xe4] sm:$0xf0] }
 0x1e2   : > { %2447 = vmatpush.bf16.msra.mxu3 %v5703_v59 }
 0x1e4   : > { %v1443_v34 = vpop.f32.mrf.mxu1  ;;  %v1521_v32 = vpop.f32.mrf.mxu3 }
 0x1e5   : > { %v1444_v53 = vadd.f32 %v1443_v34, %v7973_v17  ;;  %v1522_v25 = vadd.f32 %v1521_v32, %v1473_v10  ;;  %v5799_v17 = vor.u32 %v6697_v24, %v5796_v41  ;;  %v5763_v34 = vor.u32 %v6688_v44, %v5760_v9  ;;  %v8064_v32 = vpop.f32.mrf.mxu2  ;;  %v6704_v24 = vld [vmem:[#allocation2 + $0x1a0] sm:$0xf0]  ;;  %v6658_v41 = vld [vmem:[#allocation2 + $0x34] sm:$0xf]  ;;  %v5712_v44 = vld [vmem:[#allocation2 + $0xcc] sm:$0xf0] }
 0x1e7   : > { %v1785_v52 = vmax.f32 %v1444_v53, 0.0  ;;  %v1571_v62 = vadd.f32 %v1570_v42, %v1522_v25  ;;  %v8043_v47 = vpop.f32.mrf.mxu0  ;;  %2496 = vmatpush.bf16.msra.mxu0 %v5799_v17  ;;  %v5664_v42 = vld [vmem:[#allocation2 + $0x6c] sm:$0xf0]  ;;  %v6661_v53 = vld [vmem:[#allocation2 + $0x4c] sm:$0xf] }
 0x1e8   : > { %v5667_v10 = vor.u32 %v6664_v30, %v5664_v42  ;;  %v5652_v25 = vld [vmem:[#allocation2 + $0x54] sm:$0xf0]  ;;  %v5640_v17 = vld [vmem:[#allocation2 + $0x3c] sm:$0xf0]  ;;  %v6676_v30 = vld [vmem:[#allocation2 + $0xc4] sm:$0xf] }
 0x1e9   : > { %v1762_v29 = vmax.f32 %v1571_v62, 0.0  ;;  %1719 = vmatmul.bf16.gmra.mxu3 %v7776_v49  ;;  %v8046_v54 = vpack.c.bf16 %v1785_v52, %v1782_v45  ;;  %v5688_v49 = vld [vmem:[#allocation2 + $0x9c] sm:$0xf0]  ;;  %v6685_v45 = vld [vmem:[#allocation2 + $0x10c] sm:$0xf]  ;;  %v5655_v52 = vor.u32 %v6661_v53, %v5652_v25  ;;  %v5643_v8 = vor.u32 %v6658_v41, %v5640_v17 }
 0x1ea   : > { %2328 = vmatmul.bf16.gmra.mxu0 %v7993_v40  ;;  %v5691_v12 = vor.u32 %v6670_v27, %v5688_v49  ;;  %v5748_v62 = vld [vmem:[#allocation2 + $0x114] sm:$0xf0]  ;;  %v6655_v49 = vld [vmem:[#allocation2 + $0x1c] sm:$0xf]  ;;  %v6701_v53 = vld [vmem:[#allocation2 + $0x188] sm:$0xf0] }
 0x1eb   : > { %v8049_v5 = vpack.c.bf16 %v1762_v29, %v1759_v61  ;;  %2497 = vmatpush.bf16.msra.mxu0 %v5787_v14  ;;  %v5751_v39 = vor.u32 %v6685_v45, %v5748_v62  ;;  %v5819_v61 = vor.u32 %v6704_v24, %v5818_v51  ;;  %v5631_v14 = vor.u32 %v6655_v49, %v5628_v0  ;;  %v6721_v51 = vld [vmem:[#allocation2 + $0x22c] sm:$0xf]  ;;  %v5892_v24 = vld [vmem:[#allocation2 + $0x234] sm:$0xf0] }
 0x1ec   : > { %v8051_v57 = vpop.f32.mrf.mxu3  ;;  %v8053_v4 = vpop.f32.mrf.mxu1  ;;  %2448 = vmatpush.bf16.msra.mxu3 %v5691_v12  ;;  %v6679_v12 = vld [vmem:[#allocation2 + $0xdc] sm:$0xf] }
 0x1ed   : > { %2404 = vmatpush.bf16.msra.mxu2 %v5819_v61  ;;  %v8077_v13 = vpop.f32.mrf.mxu2  ;;  %v5727_v38 = vor.u32 %v6679_v12, %v5724_v58  ;;  %v5895_v61 = vor.u32 %v6721_v51, %v5892_v24  ;;  %v1478_v12 = vadd.f32 %v8007_v16, %v7980_v35  ;;  %v5694_v24 = vld [vmem:[#allocation2 + $0x98] sm:$0xf] }
 0x1ef   : > { %v8057_v63 = vpop.f32.mrf.mxu0  ;;  %2357 = vmatmul.bf16.vlgmr.msrb.gmra.mxu1 %v7998_v43  ;;  %2498 = vmatpush.bf16.msra.mxu0 %v5775_v28  ;;  %v5616_v28 = vld [vmem:[#allocation2 + $0xc] sm:$0xf0] }
 0x1f0   : > { %2449 = vmatpush.bf16.msra.mxu3 %v5679_v1  ;;  %v5619_v42 = vor.u32 %v6652_v36, %v5616_v28  ;;  %2545 = vmatpush.bf16.msra.mxu1 %v5895_v61  ;;  %v1476_v36 = vadd.f32 %v7996_v55, %v7980_v35  ;;  %v6938_v55 = vld [vmem:[%s9361_s4] sm:$0x7] }
 0x1f3   : > { %2499 = vmatpush.bf16.msra.mxu0 %v5763_v34  ;;  %v5806_v34 = vld [vmem:[#allocation2 + $0x180] sm:$0xf] }
 0x1f4   : > { %v8060_v20 = vpop.f32.mrf.mxu3  ;;  %v8062_v15 = vpop.f32.mrf.mxu1  ;;  %2450 = vmatpush.bf16.msra.mxu3 %v5667_v10  ;;  %v5715_v10 = vor.u32 %v6676_v30, %v5712_v44  ;;  %v5807_v45 = vor.u32 %v6701_v53, %v5806_v34 }
 0x1f5   : > { %v1651_v25 = vpop.f32.mrf.mxu2  ;;  %v1527_v28 = vadd.f32 %v8060_v20, %v1478_v12  ;;  %v1483_v12 = vadd.f32 %v8026_v22, %v7980_v35 }
 0x1f6   : > { %2405 = vmatpush.bf16.msra.mxu2 %v5807_v45  ;;  %v8128_v45 = vperm.slane %v6938_v55, 2 }
 0x1f7   : > { %v8066_v50 = vpop.f32.mrf.mxu0  ;;  %2500 = vmatpush.bf16.msra.mxu0 %v5751_v39 }
 0x1f8   : > { %2451 = vmatpush.bf16.msra.mxu3 %v5655_v52 }
 0x1f9   : > { %1724 = vmatmul.bf16.gmra.mxu3 %v7823_v31  ;;  %v5736_v31 = vld [vmem:[#allocation2 + $0xfc] sm:$0xf0] }
 0x1fa   : > { %2333 = vmatmul.bf16.gmra.mxu0 %v8011_v18  ;;  %v5739_v2 = vor.u32 %v6682_v48, %v5736_v31  ;;  %v6675_v31 = vld [vmem:[#allocation2 + $0xb8] sm:$0xf0] }
 0x1fc   : > { %v8070_v29 = vpop.f32.mrf.mxu3  ;;  %v8072_v59 = vpop.f32.mrf.mxu1  ;;  %2452 = vmatpush.bf16.msra.mxu3 %v5643_v8  ;;  %2501 = vmatpush.bf16.msra.mxu0 %v5739_v2  ;;  %v5706_v8 = vld [vmem:[#allocation2 + $0xb0] sm:$0xf] }
 0x1fd   : > { %v1653_v17 = vpop.f32.mrf.mxu2  ;;  %v5707_v0 = vor.u32 %v6675_v31, %v5706_v8  ;;  %v1603_v31 = vadd.f32 %v8053_v4, %v8128_v45 }
 0x1ff   : > { %v8074_v27 = vpop.f32.mrf.mxu0  ;;  %2362 = vmatmul.bf16.gmra.mxu1 %v8014_v19  ;;  %2594 = vmatpush.bf16.msrb.mxu2 %v5707_v0 }
 0x200   : > { %2453 = vmatpush.bf16.msra.mxu3 %v5631_v14  ;;  %2502 = vmatpush.bf16.msra.mxu0 %v5727_v38  ;;  %v5880_v38 = vld [vmem:[#allocation2 + $0x21c] sm:$0xf0] }
 0x204   : > { %v8079_v6 = vpop.f32.mrf.mxu3  ;;  %v8081_v1 = vpop.f32.mrf.mxu1  ;;  %2454 = vmatpush.bf16.msra.mxu3 %v5619_v42  ;;  %2503 = vmatpush.bf16.msra.mxu0 %v5715_v10  ;;  %v1525_v42 = vadd.f32 %v8051_v57, %v1476_v36  ;;  %v1576_v10 = vadd.f32 %v8057_v63, %v1527_v28  ;;  %v6672_v63 = vld [vmem:[#allocation2 + $0xa0] sm:$0xf0]  ;;  %v6715_v36 = vld [vmem:[#allocation2 + $0x1fc] sm:$0xf]  ;;  %v5868_v28 = vld [vmem:[#allocation2 + $0x204] sm:$0xf0] }
 0x205   : > { %v8108_v14 = vpop.f32.mrf.mxu2  ;;  %v5695_v8 = vor.u32 %v6672_v63, %v5694_v24  ;;  %v1532_v4 = vadd.f32 %v8079_v6, %v1483_v12  ;;  %v6669_v12 = vld [vmem:[#allocation2 + $0x88] sm:$0xf0] }
 0x206   : > { %v1574_v34 = vadd.f32 %v8043_v47, %v1525_v42  ;;  %v1768_v20 = vmax.f32 %v1576_v10, 0.0  ;;  %v1652_v42 = vadd.f32 %v1651_v25, %v1603_v31  ;;  %v5871_v10 = vor.u32 %v6715_v36, %v5868_v28 }
 0x207   : > { %v8083_v9 = vpop.f32.mrf.mxu0  ;;  %2595 = vmatpush.bf16.msrb.mxu2 %v5695_v8  ;;  %v1581_v24 = vadd.f32 %v8074_v27, %v1532_v4  ;;  %v5682_v27 = vld [vmem:[#allocation2 + $0x80] sm:$0xf] }
 0x208   : > { %v1765_v57 = vmax.f32 %v1574_v34, 0.0  ;;  %v5683_v28 = vor.u32 %v6669_v12, %v5682_v27 }
 0x209   : > { %1729 = vmatmul.bf16.gmra.mxu3 %v7867_v23  ;;  %v1774_v25 = vmax.f32 %v1581_v24, 0.0 }
 0x20a   : > { %2338 = vmatmul.bf16.gmra.mxu0 %v8029_v21  ;;  %v8138_v0 = vpack.c.bf16 %v1768_v20, %v1765_v57 }
 0x20b   : > { %2596 = vmatpush.bf16.msrb.mxu2 %v5683_v28 }
 0x20c   : > { %v8087_v52 = vpop.f32.mrf.mxu3  ;;  %v8089_v62 = vpop.f32.mrf.mxu1 }
 0x20d   : > { %v8130_v51 = vpop.f32.mrf.mxu2 }
 0x20f   : > { %v8091_v39 = vpop.f32.mrf.mxu0  ;;  %2367 = vmatmul.bf16.gmra.mxu1 %v8032_v46 }
 0x214   : > { %v8094_v23 = vpop.f32.mrf.mxu3  ;;  %v8096_v41 = vpop.f32.mrf.mxu1 }
 0x215   : > { %v8151_v55 = vpop.f32.mrf.mxu2 }
 0x217   : > { %v8098_v48 = vpop.f32.mrf.mxu0 }
 0x219   : > { %1734 = vmatmul.bf16.gmra.mxu3 %v7887_v7  ;;  %v6718_v7 = vld [vmem:[#allocation2 + $0x214] sm:$0xf] }
 0x21a   : > { %2343 = vmatmul.bf16.gmra.mxu0 %v8046_v54  ;;  %v5883_v30 = vor.u32 %v6718_v7, %v5880_v38  ;;  %v1605_v7 = vadd.f32 %v8062_v15, %v8128_v45 }
 0x21c   : > { %v8102_v2 = vpop.f32.mrf.mxu3  ;;  %v8104_v49 = vpop.f32.mrf.mxu1  ;;  %2546 = vmatpush.bf16.msra.mxu1 %v5883_v30  ;;  %v1481_v30 = vadd.f32 %v8019_v11, %v7980_v35  ;;  %v1654_v20 = vadd.f32 %v1653_v17, %v1605_v7  ;;  %v5856_v17 = vld [vmem:[#allocation2 + $0x1ec] sm:$0xf0] }
 0x21e   : > { %v1530_v34 = vadd.f32 %v8070_v29, %v1481_v30  ;;  %v6712_v29 = vld [vmem:[#allocation2 + $0x1e4] sm:$0xf]  ;;  %v8168_v30 = vpop.f32.mrf.mxu2 }
 0x21f   : > { %v8110_v58 = vpop.f32.mrf.mxu0  ;;  %2372 = vmatmul.bf16.gmra.mxu1 %v8049_v5  ;;  %v5859_v7 = vor.u32 %v6712_v29, %v5856_v17 }
 0x220   : > { %2547 = vmatpush.bf16.msra.mxu1 %v5871_v10  ;;  %v1579_v8 = vadd.f32 %v8066_v50, %v1530_v34  ;;  %v5844_v10 = vld [vmem:[#allocation2 + $0x1d4] sm:$0xf0]  ;;  %v1488_v34 = vadd.f32 %v8055_v56, %v7980_v35 }
 0x222   : > { %v1537_v24 = vadd.f32 %v8094_v23, %v1488_v34  ;;  %v5820_v23 = vld [vmem:[#allocation2 + $0x1a4] sm:$0xf0] }
 0x224   : > { %v8117_v44 = vpop.f32.mrf.mxu3  ;;  %v8119_v16 = vpop.f32.mrf.mxu1  ;;  %2548 = vmatpush.bf16.msra.mxu1 %v5859_v7  ;;  %v1586_v27 = vadd.f32 %v8091_v39, %v1537_v24  ;;  %v6700_v39 = vld [vmem:[#allocation2 + $0x184] sm:$0xf] }
 0x226   : > { %v1666_v7 = vpop.f32.mrf.mxu2 }
 0x227   : > { %v8123_v53 = vpop.f32.mrf.mxu0 }
 0x229   : > { %2455 = vmatmul.bf16.vlgmr.msra.gmra.mxu3 %v7917_v60 }
 0x22a   : > { %2504 = vmatmul.bf16.vlgmr.msra.gmra.mxu0 %v7998_v43 }
 0x22c   : > { %v8134_v61 = vpop.f32.mrf.mxu1  ;;  %v1700_v47 = vpop.f32.mrf.mxu3 }
 0x22d   : > { %v1701_v22 = vadd.f32 %v1700_v47, %v1652_v42  ;;  %v1771_v47 = vmax.f32 %v1579_v8, 0.0  ;;  %v6709_v42 = vld [vmem:[#allocation2 + $0x1cc] sm:$0xf]  ;;  %v6706_v8 = vld [vmem:[#allocation2 + $0x1b4] sm:$0xf] }
 0x22f   : > { %v8144_v38 = vpop.f32.mrf.mxu0  ;;  %2377 = vmatmul.bf16.gmra.mxu1 %v8138_v0  ;;  %v1742_v11 = vmax.f32 %v1701_v22, 0.0  ;;  %v8170_v4 = vpack.c.bf16 %v1774_v25, %v1771_v47  ;;  %v1610_v22 = vadd.f32 %v8081_v1, %v8128_v45 }
 0x231   : > { %v1659_v1 = vadd.f32 %v8130_v51, %v1610_v22  ;;  %v6666_v22 = vld [vmem:[#allocation2 + $0x70] sm:$0xf0] }
 0x234   : > { %v8153_v15 = vpop.f32.mrf.mxu1  ;;  %v1702_v57 = vpop.f32.mrf.mxu3 }
 0x235   : > { %v1703_v63 = vadd.f32 %v1702_v57, %v1654_v20  ;;  %v5847_v57 = vor.u32 %v6709_v42, %v5844_v10  ;;  %v5808_v10 = vld [vmem:[#allocation2 + $0x18c] sm:$0xf0] }
 0x237   : > { %v1745_v60 = vmax.f32 %v1703_v63, 0.0  ;;  %v8157_v6 = vpop.f32.mrf.mxu0  ;;  %2549 = vmatpush.bf16.msra.mxu1 %v5847_v57  ;;  %v5811_v57 = vor.u32 %v6700_v39, %v5808_v10 }
 0x239   : > { %v8159_v31 = vpack.c.bf16 %v1745_v60, %v1742_v11  ;;  %2460 = vmatmul.bf16.gmra.mxu3 %v7942_v37  ;;  %v1608_v60 = vadd.f32 %v8072_v59, %v8128_v45  ;;  %v1486_v59 = vadd.f32 %v8039_v33, %v7980_v35  ;;  %v5832_v11 = vld [vmem:[#allocation2 + $0x1bc] sm:$0xf0]  ;;  %v6703_v33 = vld [vmem:[#allocation2 + $0x19c] sm:$0xf] }
 0x23a   : > { %2509 = vmatmul.bf16.gmra.mxu0 %v8014_v19  ;;  %v5835_v29 = vor.u32 %v6706_v8, %v5832_v11  ;;  %v1613_v8 = vadd.f32 %v8089_v62, %v8128_v45 }
 0x23b   : > { %2406 = vmatmul.bf16.vlgmr.msra.gmra.mxu2 %v8159_v31  ;;  %v1657_v63 = vadd.f32 %v8108_v14, %v1608_v60  ;;  %v1535_v56 = vadd.f32 %v8087_v52, %v1486_v59  ;;  %v5823_v52 = vor.u32 %v6703_v33, %v5820_v23 }
 0x23c   : > { %v8164_v50 = vpop.f32.mrf.mxu1  ;;  %v1705_v36 = vpop.f32.mrf.mxu3  ;;  %2550 = vmatpush.bf16.msra.mxu1 %v5835_v29  ;;  %v1491_v29 = vadd.f32 %v8064_v32, %v7980_v35 }
 0x23d   : > { %v1706_v25 = vadd.f32 %v1705_v36, %v1657_v63  ;;  %v1584_v14 = vadd.f32 %v8083_v9, %v1535_v56  ;;  %v1780_v36 = vmax.f32 %v1586_v27, 0.0  ;;  %v5670_v9 = vld [vmem:[#allocation2 + $0x68] sm:$0xf]  ;;  %v1493_v56 = vadd.f32 %v8077_v13, %v7980_v35 }
 0x23e   : > { %v5671_v63 = vor.u32 %v6666_v22, %v5670_v9  ;;  %v1662_v27 = vadd.f32 %v8151_v55, %v1613_v8  ;;  %v1620_v22 = vadd.f32 %v8119_v16, %v8128_v45 }
 0x23f   : > { %v8176_v20 = vpop.f32.mrf.mxu0  ;;  %2382 = vmatmul.bf16.gmra.mxu1 %v8170_v4  ;;  %v1748_v28 = vmax.f32 %v1706_v25, 0.0  ;;  %v1777_v34 = vmax.f32 %v1584_v14, 0.0  ;;  %v1615_v25 = vadd.f32 %v8096_v41, %v8128_v45  ;;  %v1542_v62 = vadd.f32 %v8117_v44, %v1493_v56  ;;  %v8240_v56 = vld [vmem:[%s9363_s6] sm:$0x7] }
 0x240   : > { %2551 = vmatpush.bf16.msra.mxu1 %v5823_v52  ;;  %2597 = vmatpush.bf16.msrb.mxu2 %v5671_v63 }
 0x241   : > { %v8200_v11 = vpack.c.bf16 %v1780_v36, %v1777_v34  ;;  %v1664_v13 = vadd.f32 %v8168_v30, %v1615_v25  ;;  %v1591_v14 = vadd.f32 %v8110_v58, %v1542_v62  ;;  %v5658_v36 = vld [vmem:[#allocation2 + $0x50] sm:$0xf]  ;;  %v6663_v58 = vld [vmem:[#allocation2 + $0x58] sm:$0xf0]  ;;  %v1618_v34 = vadd.f32 %v8104_v49, %v8128_v45 }
 0x242   : > { %v5659_v10 = vor.u32 %v6663_v58, %v5658_v36 }
 0x243   : > { %v1786_v44 = vmax.f32 %v1591_v14, 0.0 }
 0x244   : > { %v8185_v17 = vpop.f32.mrf.mxu1  ;;  %v1707_v47 = vpop.f32.mrf.mxu3  ;;  %2552 = vmatpush.bf16.msra.mxu1 %v5811_v57  ;;  %2598 = vmatpush.bf16.msrb.mxu2 %v5659_v10  ;;  %v6696_v10 = vld [vmem:[#allocation2 + $0x160] sm:$0xf0] }
 0x245   : > { %v1708_v12 = vadd.f32 %v1707_v47, %v1659_v1  ;;  %v1668_v47 = vpop.f32.mrf.mxu2 }
 0x246   : > { %v1669_v8 = vadd.f32 %v1668_v47, %v1620_v22  ;;  %v5898_v47 = vld [vmem:[#allocation2 + $0x230] sm:$0xf]  ;;  %v1623_v22 = vadd.f32 %v8134_v61, %v8128_v45  ;;  %v5874_v61 = vld [vmem:[#allocation2 + $0x200] sm:$0xf] }
 0x247   : > { %v1751_v60 = vmax.f32 %v1708_v12, 0.0  ;;  %v8189_v42 = vpop.f32.mrf.mxu0  ;;  %v1540_v12 = vadd.f32 %v8102_v2, %v1491_v29 }
 0x249   : > { %2465 = vmatmul.bf16.gmra.mxu3 %v7958_v26  ;;  %v8192_v51 = vpack.c.bf16 %v1751_v60, %v1748_v28  ;;  %v1589_v60 = vadd.f32 %v8098_v48, %v1540_v12 }
 0x24a   : > { %2514 = vmatmul.bf16.gmra.mxu0 %v8032_v46 }
 0x24b   : > { %2411 = vmatmul.bf16.gmra.mxu2 %v8192_v51  ;;  %v1783_v2 = vmax.f32 %v1589_v60, 0.0 }
 0x24c   : > { %v8196_v59 = vpop.f32.mrf.mxu1  ;;  %v1710_v24 = vpop.f32.mrf.mxu3 }
 0x24d   : > { %v1711_v33 = vadd.f32 %v1710_v24, %v1662_v27  ;;  %v1671_v30 = vpop.f32.mrf.mxu2  ;;  %v8230_v9 = vpack.c.bf16 %v1786_v44, %v1783_v2  ;;  %v1667_v24 = vadd.f32 %v1666_v7, %v1618_v34  ;;  %v8245_v27 = vperm.slane %v8240_v56, 0  ;;  %v5802_v7 = vld [vmem:[#allocation2 + $0x170] sm:$0xf]  ;;  %v6660_v44 = vld [vmem:[#allocation2 + $0x40] sm:$0xf0] }
 0x24e   : > { %v5886_v34 = vld [vmem:[#allocation2 + $0x218] sm:$0xf] }
 0x24f   : > { %v8206_v1 = vpop.f32.mrf.mxu0  ;;  %2387 = vmatmul.bf16.gmra.mxu1 %v8200_v11  ;;  %v1754_v52 = vmax.f32 %v1711_v33, 0.0 }
 0x254   : > { %v8215_v23 = vpop.f32.mrf.mxu1  ;;  %v1712_v41 = vpop.f32.mrf.mxu3 }
 0x255   : > { %v1713_v28 = vadd.f32 %v1712_v41, %v1664_v13  ;;  %v1673_v29 = vpop.f32.mrf.mxu2  ;;  %v6699_v13 = vld [vmem:[#allocation2 + $0x178] sm:$0xf0] }
 0x256   : > { %v5803_v14 = vor.u32 %v6699_v13, %v5802_v7  ;;  %v6693_v7 = vld [vmem:[#allocation2 + $0x148] sm:$0xf0]  ;;  %v1672_v13 = vadd.f32 %v1671_v30, %v1623_v22  ;;  %v6714_v30 = vld [vmem:[#allocation2 + $0x1f0] sm:$0xf0] }
 0x257   : > { %v1757_v35 = vmax.f32 %v1713_v28, 0.0  ;;  %v8219_v32 = vpop.f32.mrf.mxu0  ;;  %v6723_v28 = vld [vmem:[#allocation2 + $0x238] sm:$0xf0] }
 0x258   : > { %v5899_v60 = vor.u32 %v6723_v28, %v5898_v47  ;;  %2643 = vmatpush.bf16.msrb.mxu3 %v5803_v14  ;;  %v6717_v14 = vld [vmem:[#allocation2 + $0x208] sm:$0xf0] }
 0x259   : > { %2470 = vmatmul.bf16.gmra.mxu3 %v7976_v3  ;;  %v8222_v55 = vpack.c.bf16 %v1757_v35, %v1754_v52  ;;  %v2310_v52 = vadd.f32 %v8123_v53, %v8245_v27  ;;  %v5646_v35 = vld [vmem:[#allocation2 + $0x38] sm:$0xf]  ;;  %v5875_v28 = vor.u32 %v6717_v14, %v5874_v61  ;;  %v2315_v14 = vadd.f32 %v8157_v6, %v8245_v27 }
 0x25a   : > { %2519 = vmatmul.bf16.gmra.mxu0 %v8049_v5  ;;  %v5647_v58 = vor.u32 %v6660_v44, %v5646_v35 }
 0x25b   : > { %2416 = vmatmul.bf16.gmra.mxu2 %v8222_v55  ;;  %2692 = vmatpush.bf16.msrb.mxu0 %v5899_v60  ;;  %v2312_v60 = vadd.f32 %v8144_v38, %v8245_v27  ;;  %v5754_v38 = vld [vmem:[#allocation2 + $0x110] sm:$0xf] }
 0x25c   : > { %v8226_v39 = vpop.f32.mrf.mxu1  ;;  %v1715_v48 = vpop.f32.mrf.mxu3  ;;  %2599 = vmatpush.bf16.msrb.mxu2 %v5647_v58  ;;  %v6690_v58 = vld [vmem:[#allocation2 + $0x130] sm:$0xf0] }
 0x25d   : > { %v1716_v63 = vadd.f32 %v1715_v48, %v1667_v24  ;;  %v5790_v48 = vld [vmem:[#allocation2 + $0x158] sm:$0xf] }
 0x25f   : > { %v8234_v57 = vpop.f32.mrf.mxu0  ;;  %2392 = vmatmul.bf16.gmra.mxu1 %v8230_v9  ;;  %v1760_v16 = vmax.f32 %v1716_v63, 0.0  ;;  %v5791_v63 = vor.u32 %v6696_v10, %v5790_v48  ;;  %v5862_v48 = vld [vmem:[#allocation2 + $0x1e8] sm:$0xf] }
 0x260   : > { %v5863_v22 = vor.u32 %v6714_v30, %v5862_v48  ;;  %v1628_v48 = vadd.f32 %v8164_v50, %v8128_v45  ;;  %v6708_v30 = vld [vmem:[#allocation2 + $0x1c0] sm:$0xf0] }
 0x261   : > { %2644 = vmatpush.bf16.msrb.mxu3 %v5791_v63 }
 0x264   : > { %v8242_v25 = vpop.f32.mrf.mxu1  ;;  %v1717_v49 = vpop.f32.mrf.mxu3 }
 0x265   : > { %v1718_v62 = vadd.f32 %v1717_v49, %v1669_v8  ;;  %v6720_v8 = vld [vmem:[#allocation2 + $0x220] sm:$0xf0]  ;;  %v8260_v49 = vpop.f32.mrf.mxu2 }
 0x266   : > { %v5887_v53 = vor.u32 %v6720_v8, %v5886_v34  ;;  %v1677_v50 = vadd.f32 %v8260_v49, %v1628_v48  ;;  %v6702_v48 = vld [vmem:[#allocation2 + $0x190] sm:$0xf0] }
 0x267   : > { %v1763_v12 = vmax.f32 %v1718_v62, 0.0  ;;  %v8247_v33 = vpop.f32.mrf.mxu0  ;;  %v1625_v62 = vadd.f32 %v8153_v15, %v8128_v45 }
 0x268   : > { %2693 = vmatpush.bf16.msrb.mxu0 %v5887_v53 }
 0x269   : > { %2475 = vmatmul.bf16.gmra.mxu3 %v7993_v40  ;;  %v8250_v41 = vpack.c.bf16 %v1763_v12, %v1760_v16  ;;  %v5778_v12 = vld [vmem:[#allocation2 + $0x140] sm:$0xf]  ;;  %v1674_v35 = vadd.f32 %v1673_v29, %v1625_v62  ;;  %v6687_v29 = vld [vmem:[#allocation2 + $0x118] sm:$0xf0] }
 0x26a   : > { %2524 = vmatmul.bf16.gmra.mxu0 %v8138_v0  ;;  %v5779_v47 = vor.u32 %v6693_v7, %v5778_v12  ;;  %v5755_v61 = vor.u32 %v6687_v29, %v5754_v38  ;;  %v6681_v38 = vld [vmem:[#allocation2 + $0xe8] sm:$0xf0]  ;;  %v5826_v29 = vld [vmem:[#allocation2 + $0x1a0] sm:$0xf] }
 0x26b   : > { %2421 = vmatmul.bf16.gmra.mxu2 %v8250_v41 }
 0x26c   : > { %v1720_v2 = vpop.f32.mrf.mxu3  ;;  %v2358_v36 = vpop.f32.mrf.mxu1  ;;  %2645 = vmatpush.bf16.msrb.mxu3 %v5779_v47  ;;  %2694 = vmatpush.bf16.msrb.mxu0 %v5875_v28  ;;  %v5634_v28 = vld [vmem:[#allocation2 + $0x20] sm:$0xf] }
 0x26d   : > { %v8258_v24 = vadd.f32 %v2358_v36, %v2310_v52  ;;  %v1721_v52 = vadd.f32 %v1720_v2, %v1672_v13  ;;  %v5766_v36 = vld [vmem:[#allocation2 + $0x128] sm:$0xf]  ;;  %v5850_v2 = vld [vmem:[#allocation2 + $0x1d0] sm:$0xf]  ;;  %v1678_v62 = vpop.f32.mrf.mxu2  ;;  %v6711_v13 = vld [vmem:[#allocation2 + $0x1d8] sm:$0xf0] }
 0x26e   : > { %v5767_v63 = vor.u32 %v6690_v58, %v5766_v36  ;;  %v5851_v47 = vor.u32 %v6711_v13, %v5850_v2  ;;  %v6684_v36 = vld [vmem:[#allocation2 + $0x100] sm:$0xf0]  ;;  %v5838_v58 = vld [vmem:[#allocation2 + $0x1b8] sm:$0xf] }
 0x26f   : > { %v8264_v16 = vpop.f32.mrf.mxu0  ;;  %2553 = vmatmul.bf16.vlgmr.msra.gmra.mxu1 %v8159_v31  ;;  %v1766_v8 = vmax.f32 %v1721_v52, 0.0  ;;  %v5839_v6 = vor.u32 %v6708_v30, %v5838_v58 }
 0x270   : > { %2646 = vmatpush.bf16.msrb.mxu3 %v5767_v63  ;;  %2695 = vmatpush.bf16.msrb.mxu0 %v5863_v22  ;;  %v1630_v22 = vadd.f32 %v8185_v17, %v8128_v45 }
 0x272   : > { %v1679_v17 = vadd.f32 %v1678_v62, %v1630_v22  ;;  %v2320_v62 = vadd.f32 %v8189_v42, %v8245_v27  ;;  %v6654_v22 = vld [vmem:[#allocation2 + $0x10] sm:$0xf0]  ;;  %v5986_v42 = vld [vmem:[#allocation4 + $0xa8] sm:$0xf] }
 0x274   : > { %v1722_v15 = vpop.f32.mrf.mxu3  ;;  %v2360_v44 = vpop.f32.mrf.mxu1  ;;  %2647 = vmatpush.bf16.msrb.mxu3 %v5755_v61  ;;  %2696 = vmatpush.bf16.msrb.mxu0 %v5851_v47  ;;  %v6705_v61 = vld [vmem:[#allocation2 + $0x1a8] sm:$0xf0]  ;;  %v2317_v47 = vadd.f32 %v8176_v20, %v8245_v27 }
 0x275   : > { %v1723_v10 = vadd.f32 %v1722_v15, %v1674_v35  ;;  %v8269_v34 = vadd.f32 %v2360_v44, %v2312_v60  ;;  %v6657_v60 = vld [vmem:[#allocation2 + $0x28] sm:$0xf0]  ;;  %v5742_v44 = vld [vmem:[#allocation2 + $0xf8] sm:$0xf]  ;;  %v5827_v13 = vor.u32 %v6705_v61, %v5826_v29  ;;  %v1633_v61 = vadd.f32 %v8196_v59, %v8128_v45 }
 0x276   : > { %v5635_v15 = vor.u32 %v6657_v60, %v5634_v28  ;;  %v5743_v63 = vor.u32 %v6684_v36, %v5742_v44  ;;  %v6678_v44 = vld [vmem:[#allocation2 + $0xd0] sm:$0xf0]  ;;  %v5814_v36 = vld [vmem:[#allocation2 + $0x188] sm:$0xf] }
 0x277   : > { %v1769_v53 = vmax.f32 %v1723_v10, 0.0  ;;  %v8271_v12 = vpop.f32.mrf.mxu0  ;;  %v5815_v30 = vor.u32 %v6702_v48, %v5814_v36 }
 0x278   : > { %2600 = vmatpush.bf16.msrb.mxu2 %v5635_v15  ;;  %2648 = vmatpush.bf16.msrb.mxu3 %v5743_v63  ;;  %v5718_v15 = vld [vmem:[#allocation2 + $0xc8] sm:$0xf] }
 0x279   : > { %2480 = vmatmul.bf16.gmra.mxu3 %v8011_v18  ;;  %v8274_v7 = vpack.c.bf16 %v1769_v53, %v1766_v8  ;;  %2697 = vmatpush.bf16.msrb.mxu0 %v5839_v6  ;;  %v5730_v53 = vld [vmem:[#allocation2 + $0xe0] sm:$0xf]  ;;  %v5719_v49 = vor.u32 %v6678_v44, %v5718_v15  ;;  %v2322_v44 = vadd.f32 %v8206_v1, %v8245_v27 }
 0x27a   : > { %2529 = vmatmul.bf16.gmra.mxu0 %v8170_v4  ;;  %v5731_v2 = vor.u32 %v6681_v38, %v5730_v53  ;;  %v2325_v1 = vadd.f32 %v8219_v32, %v8245_v27 }
 0x27b   : > { %2426 = vmatmul.bf16.gmra.mxu2 %v8274_v7 }
 0x27c   : > { %v1725_v52 = vpop.f32.mrf.mxu3  ;;  %v2363_v35 = vpop.f32.mrf.mxu1  ;;  %2649 = vmatpush.bf16.msrb.mxu3 %v5731_v2 }
 0x27d   : > { %v8282_v10 = vadd.f32 %v2363_v35, %v2315_v14  ;;  %v1681_v14 = vpop.f32.mrf.mxu2  ;;  %v1726_v28 = vadd.f32 %v1725_v52, %v1677_v50  ;;  %2698 = vmatpush.bf16.msrb.mxu0 %v5827_v13  ;;  %v5622_v52 = vld [vmem:[#allocation2 + $0x8] sm:$0xf] }
 0x27e   : > { %v5623_v2 = vor.u32 %v6654_v22, %v5622_v52  ;;  %v1682_v15 = vadd.f32 %v1681_v14, %v1633_v61  ;;  %v6082_v14 = vld [vmem:[#allocation4 + $0x168] sm:$0xf]  ;;  %v6770_v22 = vld [vmem:[#allocation4 + $0x170] sm:$0xf0]  ;;  %v1638_v61 = vadd.f32 %v8226_v39, %v8128_v45 }
 0x27f   : > { %v8286_v8 = vpop.f32.mrf.mxu0  ;;  %2558 = vmatmul.bf16.gmra.mxu1 %v8192_v51  ;;  %v1772_v6 = vmax.f32 %v1726_v28, 0.0  ;;  %v1635_v28 = vadd.f32 %v8215_v23, %v8128_v45 }
 0x280   : > { %2650 = vmatpush.bf16.msrb.mxu3 %v5719_v49  ;;  %2601 = vmatpush.bf16.msrb.mxu2 %v5623_v2  ;;  %v6083_v2 = vor.u32 %v6770_v22, %v6082_v14  ;;  %v6070_v14 = vld [vmem:[#allocation4 + $0x150] sm:$0xf]  ;;  %v6767_v22 = vld [vmem:[#allocation4 + $0x158] sm:$0xf0] }
 0x281   : > { %2699 = vmatpush.bf16.msrb.mxu0 %v5815_v30 }
 0x284   : > { %v1727_v60 = vpop.f32.mrf.mxu3  ;;  %v2365_v35 = vpop.f32.mrf.mxu1  ;;  %3350 = vmatpush.bf16.msra.mxu2 %v6083_v2  ;;  %v6071_v2 = vor.u32 %v6767_v22, %v6070_v14 }
 0x285   : > { %v1728_v58 = vadd.f32 %v1727_v60, %v1679_v17  ;;  %v8292_v63 = vadd.f32 %v2365_v35, %v2317_v47  ;;  %v1683_v47 = vpop.f32.mrf.mxu2  ;;  %v6746_v60 = vld [vmem:[#allocation4 + $0xb0] sm:$0xf0] }
 0x286   : > { %v5987_v35 = vor.u32 %v6746_v60, %v5986_v42  ;;  %v1684_v36 = vadd.f32 %v1683_v47, %v1635_v28  ;;  %v1640_v28 = vadd.f32 %v8242_v25, %v8128_v45  ;;  %v5974_v60 = vld [vmem:[#allocation4 + $0x90] sm:$0xf] }
 0x287   : > { %v1775_v53 = vmax.f32 %v1728_v58, 0.0  ;;  %v8294_v38 = vpop.f32.mrf.mxu0 }
 0x288   : > { %3301 = vmatpush.bf16.msrb.mxu1 %v5987_v35  ;;  %v6743_v35 = vld [vmem:[#allocation4 + $0x98] sm:$0xf0]  ;;  %3351 = vmatpush.bf16.msra.mxu2 %v6071_v2  ;;  %v6734_v2 = vld [vmem:[#allocation4 + $0x50] sm:$0xf0] }
 0x289   : > { %2485 = vmatmul.bf16.gmra.mxu3 %v8029_v21  ;;  %v8297_v20 = vpack.c.bf16 %v1775_v53, %v1772_v6 }
 0x28a   : > { %2534 = vmatmul.bf16.gmra.mxu0 %v8200_v11 }
 0x28b   : > { %2431 = vmatmul.bf16.gmra.mxu2 %v8297_v20 }
 0x28c   : > { %v1730_v29 = vpop.f32.mrf.mxu3  ;;  %v2368_v50 = vpop.f32.mrf.mxu1 }
 0x28d   : > { %v8305_v13 = vadd.f32 %v2368_v50, %v2320_v62  ;;  %v1731_v59 = vadd.f32 %v1730_v29, %v1682_v15  ;;  %v1686_v62 = vpop.f32.mrf.mxu2 }
 0x28e   : > { %v1687_v32 = vadd.f32 %v1686_v62, %v1638_v61 }
 0x28f   : > { %v8309_v17 = vpop.f32.mrf.mxu0  ;;  %2563 = vmatmul.bf16.gmra.mxu1 %v8222_v55  ;;  %v1778_v23 = vmax.f32 %v1731_v59, 0.0  ;;  %v2327_v59 = vadd.f32 %v8234_v57, %v8245_v27  ;;  %v2330_v57 = vadd.f32 %v8247_v33, %v8245_v27 }
 0x294   : > { %v1732_v58 = vpop.f32.mrf.mxu3  ;;  %v2370_v49 = vpop.f32.mrf.mxu1 }
 0x295   : > { %v1733_v48 = vadd.f32 %v1732_v58, %v1684_v36  ;;  %v8314_v30 = vadd.f32 %v2370_v49, %v2322_v44  ;;  %v1688_v15 = vpop.f32.mrf.mxu2  ;;  %v5975_v44 = vor.u32 %v6743_v35, %v5974_v60  ;;  %v2332_v60 = vadd.f32 %v8264_v16, %v8245_v27  ;;  %v9375_v16 = vld [vmem:[#allocation9_spill] sm:$0xff] }
 0x296   : > { %v1689_v39 = vadd.f32 %v1688_v15, %v1640_v28 }
 0x297   : > { %v1781_v6 = vmax.f32 %v1733_v48, 0.0  ;;  %v8316_v53 = vpop.f32.mrf.mxu0  ;;  %3302 = vmatpush.bf16.msrb.mxu1 %v5975_v44 }
 0x299   : > { %2490 = vmatmul.bf16.gmra.mxu3 %v8046_v54  ;;  %v8319_v52 = vpack.c.bf16 %v1781_v6, %v1778_v23 }
 0x29a   : > { %2539 = vmatmul.bf16.gmra.mxu0 %v8230_v9 }
 0x29b   : > { %2436 = vmatmul.bf16.gmra.mxu2 %v8319_v52 }
 0x29c   : > { %v1735_v29 = vpop.f32.mrf.mxu3  ;;  %v2373_v50 = vpop.f32.mrf.mxu1 }
 0x29d   : > { %v8327_v47 = vadd.f32 %v2373_v50, %v2325_v1  ;;  %v1736_v36 = vadd.f32 %v1735_v29, %v1687_v32  ;;  %v8342_v1 = vperm.slane %v8240_v56, 1  ;;  %v6740_v32 = vld [vmem:[#allocation4 + $0x80] sm:$0xf0] }
 0x29f   : > { %v8331_v42 = vpop.f32.mrf.mxu0  ;;  %2568 = vmatmul.bf16.gmra.mxu1 %v8250_v41  ;;  %v1784_v45 = vmax.f32 %v1736_v36, 0.0 }
 0x2a4   : > { %v1737_v58 = vpop.f32.mrf.mxu3  ;;  %v2375_v49 = vpop.f32.mrf.mxu1 }
 0x2a5   : > { %v1738_v48 = vadd.f32 %v1737_v58, %v1689_v39  ;;  %v8336_v23 = vadd.f32 %v2375_v49, %v2327_v59  ;;  %v5950_v58 = vld [vmem:[#allocation4 + $0x60] sm:$0xf]  ;;  %v6737_v49 = vld [vmem:[#allocation4 + $0x68] sm:$0xf0] }
 0x2a7   : > { %v1787_v25 = vmax.f32 %v1738_v48, 0.0  ;;  %v2505_v6 = vpop.f32.mrf.mxu0  ;;  %v2335_v48 = vadd.f32 %v8271_v12, %v8245_v27 }
 0x2a9   : > { %2651 = vmatmul.bf16.vlgmr.msrb.gmra.mxu3 %v7998_v43  ;;  %v8339_v62 = vpack.c.bf16 %v1787_v25, %v1784_v45  ;;  %v6058_v45 = vld [vmem:[#allocation4 + $0x138] sm:$0xf]  ;;  %v6764_v25 = vld [vmem:[#allocation4 + $0x140] sm:$0xf0] }
 0x2aa   : > { %2700 = vmatmul.bf16.vlgmr.msrb.gmra.mxu0 %v8159_v31  ;;  %v5962_v31 = vld [vmem:[#allocation4 + $0x78] sm:$0xf]  ;;  %v6059_v22 = vor.u32 %v6764_v25, %v6058_v45 }
 0x2ab   : > { %2441 = vmatmul.bf16.gmra.mxu2 %v8339_v62  ;;  %v5963_v33 = vor.u32 %v6740_v32, %v5962_v31  ;;  %v5926_v31 = vld [vmem:[#allocation4 + $0x30] sm:$0xf]  ;;  %v6731_v32 = vld [vmem:[#allocation4 + $0x38] sm:$0xf0] }
 0x2ac   : > { %v2378_v29 = vpop.f32.mrf.mxu1  ;;  %v2456_v50 = vpop.f32.mrf.mxu3  ;;  %3352 = vmatpush.bf16.msra.mxu2 %v6059_v22  ;;  %v6725_v22 = vld [vmem:[#allocation4 + $0x8] sm:$0xf0] }
 0x2ad   : > { %v8348_v61 = vadd.f32 %v2378_v29, %v2330_v57  ;;  %v2457_v43 = vadd.f32 %v2456_v50, %v8342_v1  ;;  %3303 = vmatpush.bf16.msrb.mxu1 %v5963_v33  ;;  %v2337_v33 = vadd.f32 %v8286_v8, %v8245_v27 }
 0x2af   : > { %v2507_v28 = vpop.f32.mrf.mxu0  ;;  %2573 = vmatmul.bf16.gmra.mxu1 %v8274_v7  ;;  %v8352_v56 = vadd.f32 %v2505_v6, %v2457_v43  ;;  %v5951_v6 = vor.u32 %v6737_v49, %v5950_v58 }
 0x2b1   : > { %3304 = vmatpush.bf16.msrb.mxu1 %v5951_v6 }
 0x2b4   : > { %v2380_v35 = vpop.f32.mrf.mxu1  ;;  %v2458_v15 = vpop.f32.mrf.mxu3 }
 0x2b5   : > { %v8356_v44 = vadd.f32 %v2380_v35, %v2332_v60  ;;  %v2459_v59 = vadd.f32 %v2458_v15, %v8342_v1  ;;  %v5927_v60 = vor.u32 %v6731_v32, %v5926_v31 }
 0x2b7   : > { %v2510_v36 = vpop.f32.mrf.mxu0  ;;  %v8359_v39 = vadd.f32 %v2507_v28, %v2459_v59 }
 0x2b9   : > { %2656 = vmatmul.bf16.gmra.mxu3 %v8014_v19 }
 0x2ba   : > { %2705 = vmatmul.bf16.gmra.mxu0 %v8192_v51  ;;  %v5938_v51 = vld [vmem:[#allocation4 + $0x48] sm:$0xf] }
 0x2bb   : > { %2602 = vmatmul.bf16.vlgmr.msrb.gmra.mxu2 %v9375_v16  ;;  %v5939_v12 = vor.u32 %v6734_v2, %v5938_v51  ;;  %v5914_v16 = vld [vmem:[#allocation4 + $0x18] sm:$0xf]  ;;  %v6761_v51 = vld [vmem:[#allocation4 + $0x128] sm:$0xf0] }
 0x2bc   : > { %v2383_v57 = vpop.f32.mrf.mxu1  ;;  %v2461_v14 = vpop.f32.mrf.mxu3 }
 0x2bd   : > { %v8366_v29 = vadd.f32 %v2383_v57, %v2335_v48  ;;  %v2462_v50 = vadd.f32 %v2461_v14, %v8342_v1  ;;  %3305 = vmatpush.bf16.msrb.mxu1 %v5939_v12 }
 0x2be   : > { %v2407_v19 = vpop.f32.mrf.mxu2 }
 0x2bf   : > { %v2512_v43 = vpop.f32.mrf.mxu0  ;;  %2578 = vmatmul.bf16.gmra.mxu1 %v8297_v20  ;;  %v8370_v28 = vadd.f32 %v2510_v36, %v2462_v50  ;;  %v2408_v59 = vadd.f32 %v2407_v19, %v8258_v24  ;;  %v6728_v36 = vld [vmem:[#allocation4 + $0x20] sm:$0xf0]  ;;  %v5902_v24 = vld [vmem:[#allocation4] sm:$0xf]  ;;  %v2340_v50 = vadd.f32 %v8294_v38, %v8245_v27 }
 0x2c0   : > { %v5915_v6 = vor.u32 %v6728_v36, %v5914_v16  ;;  %v5903_v2 = vor.u32 %v6725_v22, %v5902_v24 }
 0x2c1   : > { %3306 = vmatpush.bf16.msrb.mxu1 %v5927_v60  ;;  %v2741_v8 = vmax.f32 %v2408_v59, 0.0 }
 0x2c4   : > { %v2385_v35 = vpop.f32.mrf.mxu1  ;;  %v2463_v15 = vpop.f32.mrf.mxu3 }
 0x2c5   : > { %v8375_v58 = vadd.f32 %v2385_v35, %v2337_v33  ;;  %v2464_v49 = vadd.f32 %v2463_v15, %v8342_v1  ;;  %3307 = vmatpush.bf16.msrb.mxu1 %v5915_v6 }
 0x2c6   : > { %v2409_v48 = vpop.f32.mrf.mxu2 }
 0x2c7   : > { %v2410_v45 = vadd.f32 %v2409_v48, %v8269_v34  ;;  %v2515_v25 = vpop.f32.mrf.mxu0  ;;  %v8379_v57 = vadd.f32 %v2512_v43, %v2464_v49  ;;  %v6046_v34 = vld [vmem:[#allocation4 + $0x120] sm:$0xf] }
 0x2c8   : > { %v6047_v31 = vor.u32 %v6761_v51, %v6046_v34 }
 0x2c9   : > { %v2744_v14 = vmax.f32 %v2410_v45, 0.0  ;;  %2661 = vmatmul.bf16.gmra.mxu3 %v8032_v46  ;;  %3308 = vmatpush.bf16.msrb.mxu1 %v5903_v2 }
 0x2ca   : > { %2710 = vmatmul.bf16.gmra.mxu0 %v8222_v55  ;;  %3353 = vmatpush.bf16.msra.mxu2 %v6047_v31 }
 0x2cb   : > { %v8385_v19 = vpack.c.bf16 %v2744_v14, %v2741_v8  ;;  %2607 = vmatmul.bf16.gmra.mxu2 %v7942_v37  ;;  %v2342_v37 = vadd.f32 %v8309_v17, %v8245_v27  ;;  %v2345_v17 = vadd.f32 %v8316_v53, %v8245_v27  ;;  %v6758_v8 = vld [vmem:[#allocation4 + $0x110] sm:$0xf0] }
 0x2cc   : > { %v2388_v43 = vpop.f32.mrf.mxu1  ;;  %v2466_v12 = vpop.f32.mrf.mxu3 }
 0x2cd   : > { %v8388_v32 = vadd.f32 %v2388_v43, %v2340_v50  ;;  %v2467_v46 = vadd.f32 %v2466_v12, %v8342_v1 }
 0x2ce   : > { %v2412_v55 = vpop.f32.mrf.mxu2 }
 0x2cf   : > { %v2517_v33 = vpop.f32.mrf.mxu0  ;;  %2583 = vmatmul.bf16.gmra.mxu1 %v8319_v52  ;;  %v8392_v38 = vadd.f32 %v2515_v25, %v2467_v46  ;;  %v2413_v15 = vadd.f32 %v2412_v55, %v8282_v10  ;;  %v6034_v10 = vld [vmem:[#allocation4 + $0x108] sm:$0xf] }
 0x2d0   : > { %v6035_v22 = vor.u32 %v6758_v8, %v6034_v10 }
 0x2d1   : > { %v2747_v6 = vmax.f32 %v2413_v15, 0.0 }
 0x2d2   : > { %3354 = vmatpush.bf16.msra.mxu2 %v6035_v22 }
 0x2d4   : > { %v2390_v60 = vpop.f32.mrf.mxu1  ;;  %v2468_v35 = vpop.f32.mrf.mxu3 }
 0x2d5   : > { %v8397_v59 = vadd.f32 %v2390_v60, %v2342_v37  ;;  %v2469_v49 = vadd.f32 %v2468_v35, %v8342_v1  ;;  %v6745_v60 = vld [vmem:[#allocation4 + $0xac] sm:$0xf]  ;;  %v5988_v35 = vld [vmem:[#allocation4 + $0xb4] sm:$0xf0] }
 0x2d6   : > { %v2414_v48 = vpop.f32.mrf.mxu2 }
 0x2d7   : > { %v2415_v16 = vadd.f32 %v2414_v48, %v8292_v63  ;;  %v2520_v36 = vpop.f32.mrf.mxu0  ;;  %v8401_v45 = vadd.f32 %v2517_v33, %v2469_v49 }
 0x2d9   : > { %v2750_v25 = vmax.f32 %v2415_v16, 0.0  ;;  %2666 = vmatmul.bf16.gmra.mxu3 %v8049_v5 }
 0x2da   : > { %2715 = vmatmul.bf16.gmra.mxu0 %v8250_v41 }
 0x2db   : > { %2612 = vmatmul.bf16.gmra.mxu2 %v7958_v26  ;;  %v8408_v14 = vpack.c.bf16 %v2750_v25, %v2747_v6  ;;  %v2347_v26 = vadd.f32 %v8331_v42, %v8245_v27  ;;  %v5991_v27 = vor.u32 %v6745_v60, %v5988_v35  ;;  %v6755_v42 = vld [vmem:[#allocation4 + $0xf8] sm:$0xf0]  ;;  %v6742_v6 = vld [vmem:[#allocation4 + $0x94] sm:$0xf]  ;;  %v5976_v25 = vld [vmem:[#allocation4 + $0x9c] sm:$0xf0] }
 0x2dc   : > { %v2393_v24 = vpop.f32.mrf.mxu1  ;;  %v2471_v63 = vpop.f32.mrf.mxu3  ;;  %v6733_v60 = vld [vmem:[#allocation4 + $0x4c] sm:$0xf]  ;;  %v5940_v35 = vld [vmem:[#allocation4 + $0x54] sm:$0xf0] }
 0x2dd   : > { %v8410_v50 = vadd.f32 %v2393_v24, %v2345_v17  ;;  %v2472_v34 = vadd.f32 %v2471_v63, %v8342_v1  ;;  %3448 = vmatpush.bf16.msra.mxu0 %v5991_v27  ;;  %v6739_v24 = vld [vmem:[#allocation4 + $0x7c] sm:$0xf]  ;;  %v5964_v63 = vld [vmem:[#allocation4 + $0x84] sm:$0xf0] }
 0x2de   : > { %v2417_v51 = vpop.f32.mrf.mxu2  ;;  %v5967_v22 = vor.u32 %v6739_v24, %v5964_v63 }
 0x2df   : > { %v2522_v5 = vpop.f32.mrf.mxu0  ;;  %2588 = vmatmul.bf16.gmra.mxu1 %v8339_v62  ;;  %v8414_v41 = vadd.f32 %v2520_v36, %v2472_v34  ;;  %v2418_v43 = vadd.f32 %v2417_v51, %v8305_v13  ;;  %v6022_v13 = vld [vmem:[#allocation4 + $0xf0] sm:$0xf] }
 0x2e0   : > { %v6023_v36 = vor.u32 %v6755_v42, %v6022_v13  ;;  %v5943_v13 = vor.u32 %v6733_v60, %v5940_v35  ;;  %v6178_v60 = vld [vmem:[#allocation4 + $0x228] sm:$0xf]  ;;  %v6794_v35 = vld [vmem:[#allocation4 + $0x230] sm:$0xf0] }
 0x2e1   : > { %v2753_v15 = vmax.f32 %v2418_v43, 0.0 }
 0x2e2   : > { %3355 = vmatpush.bf16.msra.mxu2 %v6023_v36  ;;  %v6730_v36 = vld [vmem:[#allocation4 + $0x34] sm:$0xf] }
 0x2e4   : > { %v2395_v53 = vpop.f32.mrf.mxu1  ;;  %v2473_v2 = vpop.f32.mrf.mxu3 }
 0x2e5   : > { %v8419_v12 = vadd.f32 %v2395_v53, %v2347_v26  ;;  %v2474_v31 = vadd.f32 %v2473_v2, %v8342_v1  ;;  %v5952_v26 = vld [vmem:[#allocation4 + $0x6c] sm:$0xf0] }
 0x2e6   : > { %v2419_v46 = vpop.f32.mrf.mxu2 }
 0x2e7   : > { %v2420_v55 = vadd.f32 %v2419_v46, %v8314_v30  ;;  %v2525_v33 = vpop.f32.mrf.mxu0  ;;  %v8423_v37 = vadd.f32 %v2522_v5, %v2474_v31  ;;  %v6736_v5 = vld [vmem:[#allocation4 + $0x64] sm:$0xf] }
 0x2e8   : > { %v5955_v2 = vor.u32 %v6736_v5, %v5952_v26  ;;  %v5904_v5 = vld [vmem:[#allocation4 + $0xc] sm:$0xf0] }
 0x2e9   : > { %v2756_v49 = vmax.f32 %v2420_v55, 0.0  ;;  %2671 = vmatmul.bf16.gmra.mxu3 %v8138_v0  ;;  %v5979_v0 = vor.u32 %v6742_v6, %v5976_v25  ;;  %v5928_v6 = vld [vmem:[#allocation4 + $0x3c] sm:$0xf0] }
 0x2ea   : > { %2720 = vmatmul.bf16.gmra.mxu0 %v8274_v7 }
 0x2eb   : > { %2617 = vmatmul.bf16.gmra.mxu2 %v7976_v3  ;;  %v8428_v48 = vpack.c.bf16 %v2756_v49, %v2753_v15  ;;  %3449 = vmatpush.bf16.msra.mxu0 %v5979_v0  ;;  %v6727_v0 = vld [vmem:[#allocation4 + $0x1c] sm:$0xf] }
 0x2ec   : > { %v2476_v30 = vpop.f32.mrf.mxu3  ;;  %v2554_v16 = vpop.f32.mrf.mxu1 }
 0x2ed   : > { %v2477_v17 = vadd.f32 %v2476_v30, %v8342_v1  ;;  %v2555_v10 = vadd.f32 %v2554_v16, %v8352_v56 }
 0x2ee   : > { %v2422_v8 = vpop.f32.mrf.mxu2 }
 0x2ef   : > { %v8432_v7 = vpop.f32.mrf.mxu0  ;;  %3309 = vmatmul.bf16.vlgmr.msrb.gmra.mxu1 %v8385_v19  ;;  %v8435_v3 = vadd.f32 %v2525_v33, %v2477_v17  ;;  %3450 = vmatpush.bf16.msra.mxu0 %v5967_v22  ;;  %v2423_v56 = vadd.f32 %v2422_v8, %v8327_v47  ;;  %v2742_v31 = vmax.f32 %v2555_v10, 0.0  ;;  %v6010_v47 = vld [vmem:[#allocation4 + $0xd8] sm:$0xf]  ;;  %v5916_v8 = vld [vmem:[#allocation4 + $0x24] sm:$0xf0] }
 0x2f0   : > { %v5919_v24 = vor.u32 %v6727_v0, %v5916_v8 }
 0x2f1   : > { %v2759_v15 = vmax.f32 %v2423_v56, 0.0 }
 0x2f3   : > { %3451 = vmatpush.bf16.msra.mxu0 %v5955_v2 }
 0x2f4   : > { %v8437_v34 = vpop.f32.mrf.mxu3  ;;  %v2556_v51 = vpop.f32.mrf.mxu1 }
 0x2f5   : > { %v2557_v53 = vadd.f32 %v2556_v51, %v8359_v39  ;;  %v6752_v39 = vld [vmem:[#allocation4 + $0xe0] sm:$0xf0] }
 0x2f6   : > { %v2424_v43 = vpop.f32.mrf.mxu2  ;;  %v6011_v16 = vor.u32 %v6752_v39, %v6010_v47  ;;  %v6724_v51 = vld [vmem:[#allocation4 + $0x4] sm:$0xf] }
 0x2f7   : > { %v2745_v46 = vmax.f32 %v2557_v53, 0.0  ;;  %v2425_v55 = vadd.f32 %v2424_v43, %v8336_v23  ;;  %v2530_v33 = vpop.f32.mrf.mxu0  ;;  %3452 = vmatpush.bf16.msra.mxu0 %v5943_v13  ;;  %v5907_v56 = vor.u32 %v6724_v51, %v5904_v5 }
 0x2f8   : > { %3356 = vmatpush.bf16.msra.mxu2 %v6011_v16 }
 0x2f9   : > { %v8442_v49 = vpack.c.bf16 %v2745_v46, %v2742_v31  ;;  %v2762_v27 = vmax.f32 %v2425_v55, 0.0  ;;  %2676 = vmatmul.bf16.gmra.mxu3 %v8170_v4  ;;  %v5931_v4 = vor.u32 %v6730_v36, %v5928_v6  ;;  %v6084_v36 = vld [vmem:[#allocation4 + $0x174] sm:$0xf0] }
 0x2fa   : > { %2725 = vmatmul.bf16.gmra.mxu0 %v8297_v20 }
 0x2fb   : > { %2622 = vmatmul.bf16.gmra.mxu2 %v7993_v40  ;;  %v8447_v42 = vpack.c.bf16 %v2762_v27, %v2759_v15  ;;  %3453 = vmatpush.bf16.msra.mxu0 %v5931_v4  ;;  %v6749_v27 = vld [vmem:[#allocation4 + $0xc8] sm:$0xf0]  ;;  %v6166_v4 = vld [vmem:[#allocation4 + $0x210] sm:$0xf] }
 0x2fc   : > { %v2481_v23 = vpop.f32.mrf.mxu3  ;;  %v2559_v30 = vpop.f32.mrf.mxu1 }
 0x2fd   : > { %v2482_v25 = vadd.f32 %v2481_v23, %v8342_v1  ;;  %v2560_v17 = vadd.f32 %v2559_v30, %v8370_v28 }
 0x2fe   : > { %v2427_v10 = vpop.f32.mrf.mxu2 }
 0x2ff   : > { %v8451_v20 = vpop.f32.mrf.mxu0  ;;  %3314 = vmatmul.bf16.gmra.mxu1 %v8408_v14  ;;  %v8454_v40 = vadd.f32 %v2530_v33, %v2482_v25  ;;  %3454 = vmatpush.bf16.msra.mxu0 %v5919_v24  ;;  %v2428_v28 = vadd.f32 %v2427_v10, %v8348_v61  ;;  %v2748_v2 = vmax.f32 %v2560_v17, 0.0  ;;  %v6179_v61 = vor.u32 %v6794_v35, %v6178_v60  ;;  %v6791_v10 = vld [vmem:[#allocation4 + $0x218] sm:$0xf0]  ;;  %v6142_v60 = vld [vmem:[#allocation4 + $0x1e0] sm:$0xf] }
 0x300   : > { %v6167_v8 = vor.u32 %v6791_v10, %v6166_v4  ;;  %v6785_v35 = vld [vmem:[#allocation4 + $0x1e8] sm:$0xf0] }
 0x301   : > { %v2765_v55 = vmax.f32 %v2428_v28, 0.0  ;;  %3399 = vmatpush.bf16.msra.mxu3 %v6179_v61 }
 0x303   : > { %3455 = vmatpush.bf16.msra.mxu0 %v5907_v56  ;;  %v6788_v56 = vld [vmem:[#allocation4 + $0x200] sm:$0xf0] }
 0x304   : > { %v8456_v63 = vpop.f32.mrf.mxu3  ;;  %v2561_v22 = vpop.f32.mrf.mxu1 }
 0x305   : > { %v2562_v26 = vadd.f32 %v2561_v22, %v8379_v57  ;;  %v5998_v57 = vld [vmem:[#allocation4 + $0xc0] sm:$0xf]  ;;  %3400 = vmatpush.bf16.msra.mxu3 %v6167_v8 }
 0x306   : > { %v2429_v53 = vpop.f32.mrf.mxu2  ;;  %v5999_v39 = vor.u32 %v6749_v27, %v5998_v57  ;;  %v6143_v57 = vor.u32 %v6785_v35, %v6142_v60  ;;  %v6790_v60 = vld [vmem:[#allocation4 + $0x214] sm:$0xf] }
 0x307   : > { %v2751_v43 = vmax.f32 %v2562_v26, 0.0  ;;  %v2430_v31 = vadd.f32 %v2429_v53, %v8356_v44  ;;  %v2535_v46 = vpop.f32.mrf.mxu0  ;;  %v6154_v26 = vld [vmem:[#allocation4 + $0x1f8] sm:$0xf] }
 0x308   : > { %3357 = vmatpush.bf16.msra.mxu2 %v5999_v39 }
 0x309   : > { %v2768_v33 = vmax.f32 %v2430_v31, 0.0  ;;  %2681 = vmatmul.bf16.gmra.mxu3 %v8200_v11  ;;  %v8462_v15 = vpack.c.bf16 %v2751_v43, %v2748_v2  ;;  %v6155_v43 = vor.u32 %v6788_v56, %v6154_v26 }
 0x30a   : > { %2730 = vmatmul.bf16.gmra.mxu0 %v8319_v52 }
 0x30b   : > { %2627 = vmatmul.bf16.gmra.mxu2 %v8011_v18  ;;  %v8466_v13 = vpack.c.bf16 %v2768_v33, %v2765_v55  ;;  %v6769_v18 = vld [vmem:[#allocation4 + $0x16c] sm:$0xf]  ;;  %3401 = vmatpush.bf16.msra.mxu3 %v6155_v43 }
 0x30c   : > { %v2486_v44 = vpop.f32.mrf.mxu3  ;;  %v2564_v47 = vpop.f32.mrf.mxu1  ;;  %v6087_v6 = vor.u32 %v6769_v18, %v6084_v36  ;;  %v6779_v18 = vld [vmem:[#allocation4 + $0x1b8] sm:$0xf0]  ;;  %v6773_v43 = vld [vmem:[#allocation4 + $0x188] sm:$0xf0] }
 0x30d   : > { %v2487_v23 = vadd.f32 %v2486_v44, %v8342_v1  ;;  %v2565_v11 = vadd.f32 %v2564_v47, %v8392_v38  ;;  %v6130_v44 = vld [vmem:[#allocation4 + $0x1c8] sm:$0xf]  ;;  %v6782_v47 = vld [vmem:[#allocation4 + $0x1d0] sm:$0xf0] }
 0x30e   : > { %v2432_v30 = vpop.f32.mrf.mxu2  ;;  %3497 = vmatpush.bf16.msra.mxu1 %v6087_v6  ;;  %v6131_v39 = vor.u32 %v6782_v47, %v6130_v44  ;;  %v6766_v6 = vld [vmem:[#allocation4 + $0x154] sm:$0xf]  ;;  %v6763_v44 = vld [vmem:[#allocation4 + $0x13c] sm:$0xf]  ;;  %v6060_v47 = vld [vmem:[#allocation4 + $0x144] sm:$0xf0] }
 0x30f   : > { %v8470_v16 = vpop.f32.mrf.mxu0  ;;  %3319 = vmatmul.bf16.gmra.mxu1 %v8428_v48  ;;  %v8473_v52 = vadd.f32 %v2535_v46, %v2487_v23  ;;  %v2433_v0 = vadd.f32 %v2432_v30, %v8366_v29  ;;  %v2754_v22 = vmax.f32 %v2565_v11, 0.0  ;;  %v6793_v29 = vld [vmem:[#allocation4 + $0x22c] sm:$0xf]  ;;  %3402 = vmatpush.bf16.msra.mxu3 %v6143_v57  ;;  %v6118_v30 = vld [vmem:[#allocation4 + $0x1b0] sm:$0xf] }
 0x310   : > { %v6119_v4 = vor.u32 %v6779_v18, %v6118_v30 }
 0x311   : > { %v2771_v53 = vmax.f32 %v2433_v0, 0.0 }
 0x313   : > { %3403 = vmatpush.bf16.msra.mxu3 %v6131_v39 }
 0x314   : > { %v8475_v25 = vpop.f32.mrf.mxu3  ;;  %v2566_v17 = vpop.f32.mrf.mxu1 }
 0x315   : > { %v2567_v38 = vadd.f32 %v2566_v17, %v8401_v45  ;;  %v6180_v45 = vld [vmem:[#allocation4 + $0x234] sm:$0xf0]  ;;  %v6072_v17 = vld [vmem:[#allocation4 + $0x15c] sm:$0xf0] }
 0x316   : > { %v2434_v24 = vpop.f32.mrf.mxu2  ;;  %v6183_v33 = vor.u32 %v6793_v29, %v6180_v45  ;;  %v6075_v0 = vor.u32 %v6766_v6, %v6072_v17 }
 0x317   : > { %v2757_v51 = vmax.f32 %v2567_v38, 0.0  ;;  %v2435_v5 = vadd.f32 %v2434_v24, %v8375_v58  ;;  %v2540_v28 = vpop.f32.mrf.mxu0  ;;  %3404 = vmatpush.bf16.msra.mxu3 %v6119_v4  ;;  %v6787_v4 = vld [vmem:[#allocation4 + $0x1fc] sm:$0xf] }
 0x318   : > { %3546 = vmatpush.bf16.msrb.mxu2 %v6183_v33  ;;  %3498 = vmatpush.bf16.msra.mxu1 %v6075_v0 }
 0x319   : > { %v2774_v2 = vmax.f32 %v2435_v5, 0.0  ;;  %2686 = vmatmul.bf16.gmra.mxu3 %v8230_v9  ;;  %v8481_v31 = vpack.c.bf16 %v2757_v51, %v2754_v22  ;;  %v6106_v51 = vld [vmem:[#allocation4 + $0x198] sm:$0xf]  ;;  %v6776_v5 = vld [vmem:[#allocation4 + $0x1a0] sm:$0xf0] }
 0x31a   : > { %2735 = vmatmul.bf16.gmra.mxu0 %v8339_v62 }
 0x31b   : > { %2632 = vmatmul.bf16.gmra.mxu2 %v8029_v21  ;;  %v8485_v46 = vpack.c.bf16 %v2774_v2, %v2771_v53  ;;  %v6094_v2 = vld [vmem:[#allocation4 + $0x180] sm:$0xf] }
 0x31c   : > { %v2491_v58 = vpop.f32.mrf.mxu3  ;;  %v2569_v55 = vpop.f32.mrf.mxu1  ;;  %v6095_v45 = vor.u32 %v6773_v43, %v6094_v2  ;;  %v2484_v2 = vadd.f32 %v8456_v63, %v8342_v1  ;;  %v6751_v63 = vld [vmem:[#allocation4 + $0xdc] sm:$0xf] }
 0x31d   : > { %v2492_v61 = vadd.f32 %v2491_v58, %v8342_v1  ;;  %v2570_v9 = vadd.f32 %v2569_v55, %v8414_v41  ;;  %v2479_v55 = vadd.f32 %v8437_v34, %v8342_v1  ;;  %v6063_v34 = vor.u32 %v6763_v44, %v6060_v47 }
 0x31e   : > { %v2437_v27 = vpop.f32.mrf.mxu2 }
 0x31f   : > { %v8489_v62 = vpop.f32.mrf.mxu0  ;;  %3324 = vmatmul.bf16.gmra.mxu1 %v8447_v42  ;;  %v8492_v21 = vadd.f32 %v2540_v28, %v2492_v61  ;;  %v2438_v41 = vadd.f32 %v2437_v27, %v8388_v32  ;;  %v2760_v38 = vmax.f32 %v2570_v9, 0.0  ;;  %v6107_v32 = vor.u32 %v6776_v5, %v6106_v51  ;;  %v6939_v5 = vld [vmem:[%s9363_s6] sm:$0x7] }
 0x320   : > { %v2528_v61 = vadd.f32 %v8432_v7, %v2479_v55  ;;  %3499 = vmatpush.bf16.msra.mxu1 %v6063_v34  ;;  %v6760_v7 = vld [vmem:[#allocation4 + $0x124] sm:$0xf]  ;;  %v2533_v55 = vadd.f32 %v8451_v20, %v2484_v2 }
 0x321   : > { %v2777_v28 = vmax.f32 %v2438_v41, 0.0  ;;  %3405 = vmatpush.bf16.msra.mxu3 %v6107_v32  ;;  %v6757_v32 = vld [vmem:[#allocation4 + $0x10c] sm:$0xf] }
 0x324   : > { %v8494_v23 = vpop.f32.mrf.mxu3  ;;  %v2571_v11 = vpop.f32.mrf.mxu1 }
 0x325   : > { %v2572_v36 = vadd.f32 %v2571_v11, %v8423_v37  ;;  %3406 = vmatpush.bf16.msra.mxu3 %v6095_v45  ;;  %v6754_v45 = vld [vmem:[#allocation4 + $0xf4] sm:$0xf] }
 0x326   : > { %v2439_v10 = vpop.f32.mrf.mxu2 }
 0x327   : > { %v2763_v8 = vmax.f32 %v2572_v36, 0.0  ;;  %v2440_v24 = vadd.f32 %v2439_v10, %v8397_v59  ;;  %v8499_v22 = vpop.f32.mrf.mxu0  ;;  %v6156_v10 = vld [vmem:[#allocation4 + $0x204] sm:$0xf0] }
 0x329   : > { %v2780_v26 = vmax.f32 %v2440_v24, 0.0  ;;  %v8501_v56 = vpack.c.bf16 %v2763_v8, %v2760_v38  ;;  %v6159_v24 = vor.u32 %v6787_v4, %v6156_v10 }
 0x32a   : > { %3456 = vmatmul.bf16.vlgmr.msra.gmra.mxu0 %v8385_v19 }
 0x32b   : > { %2637 = vmatmul.bf16.gmra.mxu2 %v8046_v54  ;;  %v8505_v37 = vpack.c.bf16 %v2780_v26, %v2777_v28  ;;  %v6168_v54 = vld [vmem:[#allocation4 + $0x21c] sm:$0xf0]  ;;  %v8530_v28 = vperm.slane %v6939_v5, 2  ;;  %v2489_v5 = vadd.f32 %v8475_v25, %v8342_v1 }
 0x32c   : > { %v2574_v53 = vpop.f32.mrf.mxu1  ;;  %v2652_v59 = vpop.f32.mrf.mxu3  ;;  %v6171_v35 = vor.u32 %v6790_v60, %v6168_v54 }
 0x32d   : > { %v2575_v29 = vadd.f32 %v2574_v53, %v8435_v3  ;;  %v6036_v53 = vld [vmem:[#allocation4 + $0x114] sm:$0xf0] }
 0x32e   : > { %v2442_v58 = vpop.f32.mrf.mxu2  ;;  %3547 = vmatpush.bf16.msrb.mxu2 %v6171_v35 }
 0x32f   : > { %v8510_v33 = vpop.f32.mrf.mxu0  ;;  %3329 = vmatmul.bf16.gmra.mxu1 %v8466_v13  ;;  %v2443_v3 = vadd.f32 %v2442_v58, %v8410_v50  ;;  %v2766_v11 = vmax.f32 %v2575_v29, 0.0  ;;  %v6048_v50 = vld [vmem:[#allocation4 + $0x12c] sm:$0xf0]  ;;  %v6039_v29 = vor.u32 %v6757_v32, %v6036_v53  ;;  %v6024_v58 = vld [vmem:[#allocation4 + $0xfc] sm:$0xf0]  ;;  %v2538_v53 = vadd.f32 %v8470_v16, %v2489_v5 }
 0x330   : > { %v6051_v0 = vor.u32 %v6760_v7, %v6048_v50  ;;  %v6027_v60 = vor.u32 %v6754_v45, %v6024_v58  ;;  %v6784_v7 = vld [vmem:[#allocation4 + $0x1e4] sm:$0xf]  ;;  %v6144_v50 = vld [vmem:[#allocation4 + $0x1ec] sm:$0xf0] }
 0x331   : > { %v2783_v36 = vmax.f32 %v2443_v3, 0.0 }
 0x332   : > { %3500 = vmatpush.bf16.msra.mxu1 %v6051_v0  ;;  %3548 = vmatpush.bf16.msrb.mxu2 %v6159_v24 }
 0x334   : > { %v2576_v9 = vpop.f32.mrf.mxu1  ;;  %v2654_v57 = vpop.f32.mrf.mxu3 }
 0x335   : > { %v2577_v27 = vadd.f32 %v2576_v9, %v2528_v61 }
 0x336   : > { %v2444_v39 = vpop.f32.mrf.mxu2  ;;  %3501 = vmatpush.bf16.msra.mxu1 %v6039_v29 }
 0x337   : > { %v2769_v30 = vmax.f32 %v2577_v27, 0.0  ;;  %v2445_v18 = vadd.f32 %v2444_v39, %v8419_v12  ;;  %v8516_v41 = vpop.f32.mrf.mxu0  ;;  %v6012_v27 = vld [vmem:[#allocation4 + $0xe4] sm:$0xf0] }
 0x339   : > { %v2786_v6 = vmax.f32 %v2445_v18, 0.0  ;;  %v8518_v17 = vpack.c.bf16 %v2769_v30, %v2766_v11  ;;  %v6015_v11 = vor.u32 %v6751_v63, %v6012_v27 }
 0x33a   : > { %3461 = vmatmul.bf16.gmra.mxu0 %v8408_v14  ;;  %3502 = vmatpush.bf16.msra.mxu1 %v6027_v60 }
 0x33b   : > { %3358 = vmatmul.bf16.vlgmr.msra.gmra.mxu2 %v8442_v49  ;;  %v8522_v38 = vpack.c.bf16 %v2786_v6, %v2783_v36  ;;  %v6000_v36 = vld [vmem:[#allocation4 + $0xcc] sm:$0xf0] }
 0x33c   : > { %v2579_v8 = vpop.f32.mrf.mxu1  ;;  %v8524_v12 = vpop.f32.mrf.mxu3 }
 0x33d   : > { %v2580_v51 = vadd.f32 %v2579_v8, %v8454_v40  ;;  %v6147_v8 = vor.u32 %v6784_v7, %v6144_v50 }
 0x33e   : > { %v2603_v26 = vpop.f32.mrf.mxu2  ;;  %3503 = vmatpush.bf16.msra.mxu1 %v6015_v11 }
 0x33f   : > { %v8534_v43 = vpop.f32.mrf.mxu0  ;;  %3334 = vmatmul.bf16.gmra.mxu1 %v8485_v46  ;;  %v2604_v40 = vadd.f32 %v2603_v26, %v8530_v28  ;;  %v2772_v44 = vmax.f32 %v2580_v51, 0.0  ;;  %3549 = vmatpush.bf16.msrb.mxu2 %v6147_v8  ;;  %v6090_v8 = vld [vmem:[#allocation4 + $0x170] sm:$0xf] }
 0x341   : > { %v2653_v61 = vadd.f32 %v2652_v59, %v2604_v40  ;;  %v6748_v59 = vld [vmem:[#allocation4 + $0xc4] sm:$0xf] }
 0x342   : > { %v6003_v4 = vor.u32 %v6748_v59, %v6000_v36 }
 0x343   : > { %v2702_v30 = vadd.f32 %v8499_v22, %v2653_v61 }
 0x344   : > { %v2581_v54 = vpop.f32.mrf.mxu1  ;;  %v2659_v35 = vpop.f32.mrf.mxu3  ;;  %3504 = vmatpush.bf16.msra.mxu1 %v6003_v4 }
 0x345   : > { %v2582_v9 = vadd.f32 %v2581_v54, %v2533_v55  ;;  %v2743_v24 = vmax.f32 %v2702_v30, 0.0 }
 0x346   : > { %v2605_v3 = vpop.f32.mrf.mxu2 }
 0x347   : > { %v2775_v47 = vmax.f32 %v2582_v9, 0.0  ;;  %v2606_v39 = vadd.f32 %v2605_v3, %v8530_v28  ;;  %v8540_v34 = vpop.f32.mrf.mxu0  ;;  %v6132_v3 = vld [vmem:[#allocation4 + $0x1d4] sm:$0xf0] }
 0x349   : > { %v2655_v18 = vadd.f32 %v2654_v57, %v2606_v39  ;;  %v8543_v20 = vpack.c.bf16 %v2775_v47, %v2772_v44 }
 0x34a   : > { %3466 = vmatmul.bf16.gmra.mxu0 %v8428_v48 }
 0x34b   : > { %v2704_v6 = vadd.f32 %v8510_v33, %v2655_v18  ;;  %3363 = vmatmul.bf16.gmra.mxu2 %v8462_v15 }
 0x34c   : > { %v2584_v10 = vpop.f32.mrf.mxu1  ;;  %v2662_v0 = vpop.f32.mrf.mxu3 }
 0x34d   : > { %v2746_v22 = vmax.f32 %v2704_v6, 0.0  ;;  %v2585_v57 = vadd.f32 %v2584_v10, %v8473_v52 }
 0x34e   : > { %v2608_v51 = vpop.f32.mrf.mxu2 }
 0x34f   : > { %v8551_v26 = vpack.c.bf16 %v2746_v22, %v2743_v24  ;;  %v2713_v33 = vpop.f32.mrf.mxu0  ;;  %3339 = vmatmul.bf16.gmra.mxu1 %v8505_v37  ;;  %v2609_v32 = vadd.f32 %v2608_v51, %v8530_v28  ;;  %v2778_v58 = vmax.f32 %v2585_v57, 0.0  ;;  %v6771_v24 = vld [vmem:[#allocation4 + $0x178] sm:$0xf0] }
 0x350   : > { %v6091_v51 = vor.u32 %v6771_v24, %v6090_v8  ;;  %v6030_v24 = vld [vmem:[#allocation4 + $0xf8] sm:$0xf] }
 0x351   : > { %3407 = vmatmul.bf16.vlgmr.msra.gmra.mxu3 %v8551_v26  ;;  %v2658_v52 = vadd.f32 %v8524_v12, %v2609_v32  ;;  %v6781_v12 = vld [vmem:[#allocation4 + $0x1cc] sm:$0xf]  ;;  %v6120_v32 = vld [vmem:[#allocation4 + $0x1bc] sm:$0xf0] }
 0x352   : > { %v6135_v27 = vor.u32 %v6781_v12, %v6132_v3  ;;  %3644 = vmatpush.bf16.msrb.mxu0 %v6091_v51 }
 0x353   : > { %v2707_v54 = vadd.f32 %v8516_v41, %v2658_v52  ;;  %v2494_v41 = vadd.f32 %v8494_v23, %v8342_v1  ;;  %v6078_v52 = vld [vmem:[#allocation4 + $0x158] sm:$0xf] }
 0x354   : > { %v2586_v2 = vpop.f32.mrf.mxu1  ;;  %v2664_v29 = vpop.f32.mrf.mxu3  ;;  %3550 = vmatpush.bf16.msrb.mxu2 %v6135_v27  ;;  %v6762_v27 = vld [vmem:[#allocation4 + $0x130] sm:$0xf0] }
 0x355   : > { %v2587_v40 = vadd.f32 %v2586_v2, %v2538_v53  ;;  %v2749_v44 = vmax.f32 %v2707_v54, 0.0  ;;  %v2543_v59 = vadd.f32 %v8489_v62, %v2494_v41  ;;  %v6765_v54 = vld [vmem:[#allocation4 + $0x148] sm:$0xf0] }
 0x356   : > { %v2610_v45 = vpop.f32.mrf.mxu2 }
 0x357   : > { %v2781_v55 = vmax.f32 %v2587_v40, 0.0  ;;  %v2611_v25 = vadd.f32 %v2610_v45, %v8530_v28  ;;  %v8559_v60 = vpop.f32.mrf.mxu0  ;;  %v6768_v40 = vld [vmem:[#allocation4 + $0x160] sm:$0xf0] }
 0x359   : > { %v2660_v61 = vadd.f32 %v2659_v35, %v2611_v25  ;;  %v8562_v9 = vpack.c.bf16 %v2781_v55, %v2778_v58  ;;  %v6066_v25 = vld [vmem:[#allocation4 + $0x140] sm:$0xf] }
 0x35a   : > { %3471 = vmatmul.bf16.gmra.mxu0 %v8447_v42 }
 0x35b   : > { %v2709_v16 = vadd.f32 %v8534_v43, %v2660_v61  ;;  %3368 = vmatmul.bf16.gmra.mxu2 %v8481_v31 }
 0x35c   : > { %v2589_v63 = vpop.f32.mrf.mxu1  ;;  %v2667_v11 = vpop.f32.mrf.mxu3 }
 0x35d   : > { %v2590_v47 = vadd.f32 %v2589_v63, %v8492_v21  ;;  %v2752_v39 = vmax.f32 %v2709_v16, 0.0  ;;  %v6067_v16 = vor.u32 %v6765_v54, %v6066_v25  ;;  %v6054_v63 = vld [vmem:[#allocation4 + $0x128] sm:$0xf] }
 0x35e   : > { %v2613_v30 = vpop.f32.mrf.mxu2 }
 0x35f   : > { %v2718_v35 = vpop.f32.mrf.mxu0  ;;  %3344 = vmatmul.bf16.gmra.mxu1 %v8522_v38  ;;  %v8571_v43 = vpack.c.bf16 %v2752_v39, %v2749_v44  ;;  %v2614_v18 = vadd.f32 %v2613_v30, %v8530_v28  ;;  %v2784_v50 = vmax.f32 %v2590_v47, 0.0  ;;  %v6055_v47 = vor.u32 %v6762_v27, %v6054_v63 }
 0x361   : > { %3412 = vmatmul.bf16.gmra.mxu3 %v8571_v43  ;;  %v2663_v21 = vadd.f32 %v2662_v0, %v2614_v18  ;;  %v6778_v0 = vld [vmem:[#allocation4 + $0x1b4] sm:$0xf]  ;;  %v6042_v18 = vld [vmem:[#allocation4 + $0x110] sm:$0xf] }
 0x362   : > { %v6123_v2 = vor.u32 %v6778_v0, %v6120_v32  ;;  %v6018_v0 = vld [vmem:[#allocation4 + $0xe0] sm:$0xf]  ;;  %v6753_v32 = vld [vmem:[#allocation4 + $0xe8] sm:$0xf0] }
 0x363   : > { %v2712_v22 = vadd.f32 %v8540_v34, %v2663_v21  ;;  %v6079_v34 = vor.u32 %v6768_v40, %v6078_v52  ;;  %v6019_v52 = vor.u32 %v6753_v32, %v6018_v0 }
 0x364   : > { %v2591_v36 = vpop.f32.mrf.mxu1  ;;  %v2669_v23 = vpop.f32.mrf.mxu3  ;;  %3551 = vmatpush.bf16.msrb.mxu2 %v6123_v2 }
 0x365   : > { %v2592_v6 = vadd.f32 %v2591_v36, %v2543_v59  ;;  %v2755_v45 = vmax.f32 %v2712_v22, 0.0  ;;  %3645 = vmatpush.bf16.msrb.mxu0 %v6079_v34  ;;  %v6759_v59 = vld [vmem:[#allocation4 + $0x118] sm:$0xf0]  ;;  %v6756_v22 = vld [vmem:[#allocation4 + $0x100] sm:$0xf0] }
 0x366   : > { %v2615_v7 = vpop.f32.mrf.mxu2 }
 0x367   : > { %v2787_v4 = vmax.f32 %v2592_v6, 0.0  ;;  %v2616_v10 = vadd.f32 %v2615_v7, %v8530_v28  ;;  %v8577_v1 = vpop.f32.mrf.mxu0  ;;  %v6043_v6 = vor.u32 %v6759_v59, %v6042_v18  ;;  %v6096_v59 = vld [vmem:[#allocation4 + $0x18c] sm:$0xf0] }
 0x369   : > { %v2665_v57 = vadd.f32 %v2664_v29, %v2616_v10  ;;  %v8580_v5 = vpack.c.bf16 %v2787_v4, %v2784_v50  ;;  %3646 = vmatpush.bf16.msrb.mxu0 %v6067_v16  ;;  %v6108_v50 = vld [vmem:[#allocation4 + $0x1a4] sm:$0xf0] }
 0x36a   : > { %3476 = vmatmul.bf16.gmra.mxu0 %v8466_v13 }
 0x36b   : > { %v2714_v62 = vadd.f32 %v2713_v33, %v2665_v57  ;;  %3373 = vmatmul.bf16.gmra.mxu2 %v8501_v56 }
 0x36c   : > { %v8584_v53 = vpop.f32.mrf.mxu1  ;;  %v2672_v12 = vpop.f32.mrf.mxu3 }
 0x36d   : > { %v2758_v58 = vmax.f32 %v2714_v62, 0.0  ;;  %3647 = vmatpush.bf16.msrb.mxu0 %v6055_v47  ;;  %v6031_v62 = vor.u32 %v6756_v22, %v6030_v24  ;;  %v5994_v47 = vld [vmem:[#allocation4 + $0xb0] sm:$0xf]  ;;  %v6744_v24 = vld [vmem:[#allocation4 + $0xa0] sm:$0xf0] }
 0x36e   : > { %v2618_v29 = vpop.f32.mrf.mxu2 }
 0x36f   : > { %v8586_v55 = vpop.f32.mrf.mxu0  ;;  %3505 = vmatmul.bf16.vlgmr.msra.gmra.mxu1 %v8442_v49  ;;  %v8589_v33 = vpack.c.bf16 %v2758_v58, %v2755_v45  ;;  %v2619_v61 = vadd.f32 %v2618_v29, %v8530_v28  ;;  %v6006_v45 = vld [vmem:[#allocation4 + $0xc8] sm:$0xf]  ;;  %v6750_v58 = vld [vmem:[#allocation4 + $0xd0] sm:$0xf0] }
 0x370   : > { %v6007_v29 = vor.u32 %v6750_v58, %v6006_v45  ;;  %v6741_v45 = vld [vmem:[#allocation4 + $0x88] sm:$0xf0] }
 0x371   : > { %3417 = vmatmul.bf16.gmra.mxu3 %v8589_v33  ;;  %v2668_v44 = vadd.f32 %v2667_v11, %v2619_v61  ;;  %3648 = vmatpush.bf16.msrb.mxu0 %v6043_v6  ;;  %v6775_v11 = vld [vmem:[#allocation4 + $0x19c] sm:$0xf] }
 0x372   : > { %v6111_v8 = vor.u32 %v6775_v11, %v6108_v50 }
 0x373   : > { %v2717_v36 = vadd.f32 %v8559_v60, %v2668_v44 }
 0x374   : > { %v8593_v3 = vpop.f32.mrf.mxu1  ;;  %v2674_v4 = vpop.f32.mrf.mxu3  ;;  %3552 = vmatpush.bf16.msrb.mxu2 %v6111_v8  ;;  %v5982_v8 = vld [vmem:[#allocation4 + $0x98] sm:$0xf] }
 0x375   : > { %v2761_v57 = vmax.f32 %v2717_v36, 0.0  ;;  %3649 = vmatpush.bf16.msrb.mxu0 %v6031_v62  ;;  %v5983_v62 = vor.u32 %v6744_v24, %v5982_v8 }
 0x376   : > { %v2620_v39 = vpop.f32.mrf.mxu2 }
 0x377   : > { %v2621_v30 = vadd.f32 %v2620_v39, %v8530_v28  ;;  %v8596_v41 = vpop.f32.mrf.mxu0  ;;  %v6747_v39 = vld [vmem:[#allocation4 + $0xb8] sm:$0xf0] }
 0x378   : > { %v5995_v18 = vor.u32 %v6747_v39, %v5994_v47  ;;  %v5958_v47 = vld [vmem:[#allocation4 + $0x68] sm:$0xf]  ;;  %v6738_v39 = vld [vmem:[#allocation4 + $0x70] sm:$0xf0] }
 0x379   : > { %v2670_v21 = vadd.f32 %v2669_v23, %v2621_v30  ;;  %3650 = vmatpush.bf16.msrb.mxu0 %v6019_v52  ;;  %v5970_v52 = vld [vmem:[#allocation4 + $0x80] sm:$0xf] }
 0x37a   : > { %3481 = vmatmul.bf16.gmra.mxu0 %v8485_v46  ;;  %3595 = vmatpush.bf16.msrb.mxu3 %v5995_v18 }
 0x37b   : > { %v2719_v7 = vadd.f32 %v2718_v35, %v2670_v21  ;;  %3378 = vmatmul.bf16.gmra.mxu2 %v8518_v17 }
 0x37c   : > { %v8601_v10 = vpop.f32.mrf.mxu1  ;;  %v2677_v25 = vpop.f32.mrf.mxu3 }
 0x37d   : > { %v2764_v51 = vmax.f32 %v2719_v7, 0.0  ;;  %3651 = vmatpush.bf16.msrb.mxu0 %v6007_v29  ;;  %v5971_v29 = vor.u32 %v6741_v45, %v5970_v52  ;;  %v5922_v45 = vld [vmem:[#allocation4 + $0x20] sm:$0xf] }
 0x37e   : > { %v2623_v60 = vpop.f32.mrf.mxu2  ;;  %3596 = vmatpush.bf16.msrb.mxu3 %v5983_v62  ;;  %v6732_v62 = vld [vmem:[#allocation4 + $0x40] sm:$0xf0] }
 0x37f   : > { %v8603_v23 = vpop.f32.mrf.mxu0  ;;  %3510 = vmatmul.bf16.gmra.mxu1 %v8462_v15  ;;  %v8606_v35 = vpack.c.bf16 %v2764_v51, %v2761_v57  ;;  %v2624_v2 = vadd.f32 %v2623_v60, %v8530_v28  ;;  %v6186_v57 = vld [vmem:[#allocation4 + $0x230] sm:$0xf]  ;;  %v6795_v51 = vld [vmem:[#allocation4 + $0x238] sm:$0xf0] }
 0x380   : > { %v6187_v0 = vor.u32 %v6795_v51, %v6186_v57  ;;  %v5934_v51 = vld [vmem:[#allocation4 + $0x38] sm:$0xf] }
 0x381   : > { %3422 = vmatmul.bf16.gmra.mxu3 %v8606_v35  ;;  %v2673_v34 = vadd.f32 %v2672_v12, %v2624_v2  ;;  %v6772_v12 = vld [vmem:[#allocation4 + $0x184] sm:$0xf] }
 0x382   : > { %v6099_v6 = vor.u32 %v6772_v12, %v6096_v59  ;;  %3693 = vmatpush.bf16.msrb.mxu1 %v6187_v0  ;;  %3597 = vmatpush.bf16.msrb.mxu3 %v5971_v29  ;;  %v5935_v0 = vor.u32 %v6732_v62, %v5934_v51  ;;  %v8667_v51 = vld [vmem:[%s9365_s8] sm:$0x7] }
 0x383   : > { %v2722_v63 = vadd.f32 %v8577_v1, %v2673_v34 }
 0x384   : > { %v8610_v40 = vpop.f32.mrf.mxu1  ;;  %3553 = vmatpush.bf16.msrb.mxu2 %v6099_v6 }
 0x385   : > { %v2767_v36 = vmax.f32 %v2722_v63, 0.0  ;;  %v6818_v63 = vld [vmem:[#allocation6 + $0xb0] sm:$0xf0] }
 0x386   : > { %v2625_v54 = vpop.f32.mrf.mxu2 }
 0x387   : > { %v2626_v61 = vadd.f32 %v2625_v54, %v8530_v28  ;;  %v8613_v16 = vpop.f32.mrf.mxu0 }
 0x389   : > { %v2675_v27 = vadd.f32 %v2674_v4, %v2626_v61  ;;  %v6274_v61 = vld [vmem:[#allocation6 + $0xa8] sm:$0xf] }
 0x38a   : > { %3486 = vmatmul.bf16.gmra.mxu0 %v8505_v37 }
 0x38b   : > { %v2724_v44 = vadd.f32 %v8586_v55, %v2675_v27  ;;  %3383 = vmatmul.bf16.gmra.mxu2 %v8543_v20  ;;  %v2679_v55 = vpop.f32.mrf.mxu3 }
 0x38c   : > { %v8619_v30 = vpop.f32.mrf.mxu1 }
 0x38d   : > { %v2770_v21 = vmax.f32 %v2724_v44, 0.0  ;;  %v6275_v44 = vor.u32 %v6818_v63, %v6274_v61 }
 0x38e   : > { %v2628_v7 = vpop.f32.mrf.mxu2 }
 0x38f   : > { %v8621_v1 = vpop.f32.mrf.mxu0  ;;  %3515 = vmatmul.bf16.gmra.mxu1 %v8481_v31  ;;  %v8624_v11 = vpack.c.bf16 %v2770_v21, %v2767_v36  ;;  %v2629_v50 = vadd.f32 %v2628_v7, %v8530_v28  ;;  %4302 = vmatpush.bf16.msra.mxu2 %v6275_v44  ;;  %v6735_v21 = vld [vmem:[#allocation4 + $0x58] sm:$0xf0] }
 0x390   : > { %v6815_v44 = vld [vmem:[#allocation6 + $0x98] sm:$0xf0] }
 0x391   : > { %3427 = vmatmul.bf16.gmra.mxu3 %v8624_v11  ;;  %v2678_v22 = vadd.f32 %v2677_v25, %v2629_v50  ;;  %v6792_v50 = vld [vmem:[#allocation4 + $0x220] sm:$0xf0] }
 0x393   : > { %v2727_v58 = vadd.f32 %v8596_v41, %v2678_v22  ;;  %v2682_v54 = vpop.f32.mrf.mxu3  ;;  %v5959_v41 = vor.u32 %v6738_v39, %v5958_v47 }
 0x394   : > { %v8628_v4 = vpop.f32.mrf.mxu1 }
 0x395   : > { %v2773_v12 = vmax.f32 %v2727_v58, 0.0  ;;  %3598 = vmatpush.bf16.msrb.mxu3 %v5959_v41  ;;  %v6729_v58 = vld [vmem:[#allocation4 + $0x28] sm:$0xf0] }
 0x396   : > { %v2630_v60 = vpop.f32.mrf.mxu2 }
 0x397   : > { %v2631_v32 = vadd.f32 %v2630_v60, %v8530_v28  ;;  %v8631_v2 = vpop.f32.mrf.mxu0 }
 0x399   : > { %v2680_v34 = vadd.f32 %v2679_v55, %v2631_v32  ;;  %v6174_v55 = vld [vmem:[#allocation4 + $0x218] sm:$0xf] }
 0x39a   : > { %3491 = vmatmul.bf16.gmra.mxu0 %v8522_v38  ;;  %v6175_v24 = vor.u32 %v6792_v50, %v6174_v55  ;;  %v6789_v55 = vld [vmem:[#allocation4 + $0x208] sm:$0xf0] }
 0x39b   : > { %v2729_v25 = vadd.f32 %v8603_v23, %v2680_v34  ;;  %3388 = vmatmul.bf16.gmra.mxu2 %v8562_v9  ;;  %v5946_v23 = vld [vmem:[#allocation4 + $0x50] sm:$0xf]  ;;  %v2684_v22 = vpop.f32.mrf.mxu3 }
 0x39c   : > { %v8637_v27 = vpop.f32.mrf.mxu1  ;;  %v5947_v8 = vor.u32 %v6735_v21, %v5946_v23  ;;  %3694 = vmatpush.bf16.msrb.mxu1 %v6175_v24 }
 0x39d   : > { %v2776_v18 = vmax.f32 %v2729_v25, 0.0  ;;  %v5923_v25 = vor.u32 %v6729_v58, %v5922_v45  ;;  %v6150_v58 = vld [vmem:[#allocation4 + $0x1e8] sm:$0xf] }
 0x39e   : > { %v2633_v59 = vpop.f32.mrf.mxu2  ;;  %3599 = vmatpush.bf16.msrb.mxu3 %v5947_v8 }
 0x39f   : > { %3520 = vmatmul.bf16.gmra.mxu1 %v8501_v56  ;;  %v8640_v36 = vpack.c.bf16 %v2776_v18, %v2773_v12  ;;  %v2634_v6 = vadd.f32 %v2633_v59, %v8530_v28  ;;  %v2738_v7 = vpop.f32.mrf.mxu0  ;;  %v5910_v12 = vld [vmem:[#allocation4 + $0x8] sm:$0xf]  ;;  %v6726_v18 = vld [vmem:[#allocation4 + $0x10] sm:$0xf0] }
 0x3a0   : > { %v5911_v59 = vor.u32 %v6726_v18, %v5910_v12 }
 0x3a1   : > { %3432 = vmatmul.bf16.gmra.mxu3 %v8640_v36  ;;  %v2683_v60 = vadd.f32 %v2682_v54, %v2634_v6  ;;  %v6262_v54 = vld [vmem:[#allocation6 + $0x90] sm:$0xf]  ;;  %v6162_v6 = vld [vmem:[#allocation4 + $0x200] sm:$0xf] }
 0x3a2   : > { %3600 = vmatpush.bf16.msrb.mxu3 %v5935_v0  ;;  %v6263_v39 = vor.u32 %v6815_v44, %v6262_v54  ;;  %v6163_v50 = vor.u32 %v6789_v55, %v6162_v6 }
 0x3a3   : > { %v2732_v34 = vadd.f32 %v8613_v16, %v2683_v60  ;;  %v2687_v23 = vpop.f32.mrf.mxu3 }
 0x3a4   : > { %v8644_v57 = vpop.f32.mrf.mxu1  ;;  %4303 = vmatpush.bf16.msra.mxu2 %v6263_v39  ;;  %3695 = vmatpush.bf16.msrb.mxu1 %v6163_v50 }
 0x3a5   : > { %v2779_v41 = vmax.f32 %v2732_v34, 0.0  ;;  %v6786_v34 = vld [vmem:[#allocation4 + $0x1f0] sm:$0xf0] }
 0x3a6   : > { %v2635_v32 = vpop.f32.mrf.mxu2  ;;  %3601 = vmatpush.bf16.msrb.mxu3 %v5923_v25  ;;  %v6250_v25 = vld [vmem:[#allocation6 + $0x78] sm:$0xf]  ;;  %v6151_v54 = vor.u32 %v6786_v34, %v6150_v58  ;;  %v6774_v58 = vld [vmem:[#allocation4 + $0x190] sm:$0xf0]  ;;  %v6238_v34 = vld [vmem:[#allocation6 + $0x60] sm:$0xf] }
 0x3a7   : > { %v2636_v52 = vadd.f32 %v2635_v32, %v8530_v28  ;;  %v8650_v63 = vpop.f32.mrf.mxu0  ;;  %v8671_v32 = vperm.slane %v8667_v51, 0 }
 0x3a8   : > { %3696 = vmatpush.bf16.msrb.mxu1 %v6151_v54 }
 0x3a9   : > { %v2685_v29 = vadd.f32 %v2684_v22, %v2636_v52  ;;  %v3311_v39 = vadd.f32 %v8584_v53, %v8671_v32  ;;  %v6780_v53 = vld [vmem:[#allocation4 + $0x1c0] sm:$0xf0]  ;;  %v3313_v55 = vadd.f32 %v8593_v3, %v8671_v32  ;;  %v3316_v54 = vadd.f32 %v8601_v10, %v8671_v32  ;;  %v6226_v10 = vld [vmem:[#allocation6 + $0x48] sm:$0xf] }
 0x3aa   : > { %3652 = vmatmul.bf16.vlgmr.msrb.gmra.mxu0 %v8442_v49  ;;  %3602 = vmatpush.bf16.msrb.mxu3 %v5911_v59 }
 0x3ab   : > { %v2734_v61 = vadd.f32 %v8621_v1, %v2685_v29  ;;  %3393 = vmatmul.bf16.gmra.mxu2 %v8580_v5  ;;  %v2689_v0 = vpop.f32.mrf.mxu3 }
 0x3ac   : > { %v8653_v47 = vpop.f32.mrf.mxu1 }
 0x3ad   : > { %v2782_v16 = vmax.f32 %v2734_v61, 0.0  ;;  %v6812_v61 = vld [vmem:[#allocation6 + $0x80] sm:$0xf0] }
 0x3ae   : > { %v2638_v21 = vpop.f32.mrf.mxu2 }
 0x3af   : > { %3525 = vmatmul.bf16.gmra.mxu1 %v8518_v17  ;;  %v8656_v49 = vpack.c.bf16 %v2782_v16, %v2779_v41  ;;  %v2639_v1 = vadd.f32 %v2638_v21, %v8530_v28  ;;  %v8662_v22 = vpop.f32.mrf.mxu0  ;;  %v6783_v41 = vld [vmem:[#allocation4 + $0x1d8] sm:$0xf0]  ;;  %v6126_v21 = vld [vmem:[#allocation4 + $0x1b8] sm:$0xf] }
 0x3b1   : > { %3437 = vmatmul.bf16.gmra.mxu3 %v8656_v49  ;;  %v2688_v24 = vadd.f32 %v2687_v23, %v2639_v1  ;;  %v6127_v1 = vor.u32 %v6780_v53, %v6126_v21  ;;  %v6806_v21 = vld [vmem:[#allocation6 + $0x50] sm:$0xf0] }
 0x3b3   : > { %v2737_v52 = vadd.f32 %v8631_v2, %v2688_v24  ;;  %v6114_v24 = vld [vmem:[#allocation4 + $0x1a0] sm:$0xf] }
 0x3b4   : > { %v8660_v8 = vpop.f32.mrf.mxu1 }
 0x3b5   : > { %v2785_v12 = vmax.f32 %v2737_v52, 0.0 }
 0x3b6   : > { %v2640_v62 = vpop.f32.mrf.mxu2 }
 0x3b7   : > { %v2641_v60 = vadd.f32 %v2640_v62, %v8530_v28  ;;  %v6251_v28 = vor.u32 %v6812_v61, %v6250_v25  ;;  %v8680_v16 = vpop.f32.mrf.mxu0  ;;  %v6777_v62 = vld [vmem:[#allocation4 + $0x1a8] sm:$0xf0] }
 0x3b9   : > { %v2690_v45 = vadd.f32 %v2689_v0, %v2641_v60  ;;  %4304 = vmatpush.bf16.msra.mxu2 %v6251_v28  ;;  %v6115_v0 = vor.u32 %v6777_v62, %v6114_v24 }
 0x3ba   : > { %3657 = vmatmul.bf16.gmra.mxu0 %v8462_v15  ;;  %v6138_v15 = vld [vmem:[#allocation4 + $0x1d0] sm:$0xf] }
 0x3bb   : > { %v2739_v29 = vadd.f32 %v2738_v7, %v2690_v45  ;;  %3554 = vmatmul.bf16.vlgmr.msrb.gmra.mxu2 %v8551_v26  ;;  %v6139_v23 = vor.u32 %v6783_v41, %v6138_v15  ;;  %v6102_v45 = vld [vmem:[#allocation4 + $0x188] sm:$0xf] }
 0x3bc   : > { %v8676_v44 = vpop.f32.mrf.mxu1  ;;  %v6103_v25 = vor.u32 %v6774_v58, %v6102_v45 }
 0x3bd   : > { %v2788_v18 = vmax.f32 %v2739_v29, 0.0  ;;  %3697 = vmatpush.bf16.msrb.mxu1 %v6139_v23  ;;  %v6809_v29 = vld [vmem:[#allocation6 + $0x68] sm:$0xf0] }
 0x3be   : > { %v3359_v2 = vpop.f32.mrf.mxu2  ;;  %v6239_v3 = vor.u32 %v6809_v29, %v6238_v34 }
 0x3bf   : > { %v3360_v7 = vadd.f32 %v3359_v2, %v3311_v39  ;;  %3530 = vmatmul.bf16.gmra.mxu1 %v8543_v20  ;;  %v8683_v59 = vpack.c.bf16 %v2788_v18, %v2785_v12  ;;  %v8690_v52 = vpop.f32.mrf.mxu0  ;;  %v3318_v2 = vadd.f32 %v8610_v40, %v8671_v32 }
 0x3c0   : > { %4305 = vmatpush.bf16.msra.mxu2 %v6239_v3 }
 0x3c1   : > { %3442 = vmatmul.bf16.gmra.mxu3 %v8683_v59  ;;  %3698 = vmatpush.bf16.msrb.mxu1 %v6127_v1  ;;  %v6227_v1 = vor.u32 %v6806_v21, %v6226_v10 }
 0x3c4   : > { %v8686_v6 = vpop.f32.mrf.mxu1  ;;  %4306 = vmatpush.bf16.msra.mxu2 %v6227_v1 }
 0x3c5   : > { %3699 = vmatpush.bf16.msrb.mxu1 %v6115_v0 }
 0x3c6   : > { %v3361_v50 = vpop.f32.mrf.mxu2 }
 0x3c7   : > { %v3362_v60 = vadd.f32 %v3361_v50, %v3313_v55  ;;  %v3321_v55 = vadd.f32 %v8619_v30, %v8671_v32  ;;  %v3323_v30 = vadd.f32 %v8628_v4, %v8671_v32 }
 0x3c9   : > { %3700 = vmatpush.bf16.msrb.mxu1 %v6103_v25 }
 0x3ca   : > { %3662 = vmatmul.bf16.gmra.mxu0 %v8481_v31  ;;  %v8700_v31 = vpop.f32.mrf.mxu0 }
 0x3cb   : > { %3559 = vmatmul.bf16.gmra.mxu2 %v8571_v43 }
 0x3cc   : > { %v8694_v61 = vpop.f32.mrf.mxu1 }
 0x3ce   : > { %v3364_v28 = vpop.f32.mrf.mxu2 }
 0x3cf   : > { %v3365_v39 = vadd.f32 %v3364_v28, %v3316_v54  ;;  %3535 = vmatmul.bf16.gmra.mxu1 %v8562_v9  ;;  %v6803_v28 = vld [vmem:[#allocation6 + $0x38] sm:$0xf0] }
 0x3d1   : > { %3603 = vmatmul.bf16.vlgmr.msrb.gmra.mxu3 %v8385_v19 }
 0x3d2   : > { %v8712_v50 = vpop.f32.mrf.mxu0 }
 0x3d4   : > { %v8702_v12 = vpop.f32.mrf.mxu1  ;;  %v3408_v18 = vpop.f32.mrf.mxu3 }
 0x3d5   : > { %v3409_v15 = vadd.f32 %v3408_v18, %v3360_v7 }
 0x3d6   : > { %v3366_v41 = vpop.f32.mrf.mxu2 }
 0x3d7   : > { %v3367_v23 = vadd.f32 %v3366_v41, %v3318_v2  ;;  %v3742_v7 = vmax.f32 %v3409_v15, 0.0 }
 0x3da   : > { %3667 = vmatmul.bf16.gmra.mxu0 %v8501_v56  ;;  %v8725_v25 = vpop.f32.mrf.mxu0 }
 0x3db   : > { %3564 = vmatmul.bf16.gmra.mxu2 %v8589_v33 }
 0x3dc   : > { %v8708_v53 = vpop.f32.mrf.mxu1  ;;  %v3410_v19 = vpop.f32.mrf.mxu3 }
 0x3dd   : > { %v3411_v24 = vadd.f32 %v3410_v19, %v3362_v60  ;;  %v8723_v60 = vperm.slane %v8667_v51, 1 }
 0x3de   : > { %v3369_v40 = vpop.f32.mrf.mxu2 }
 0x3df   : > { %v3745_v62 = vmax.f32 %v3411_v24, 0.0  ;;  %v3370_v0 = vadd.f32 %v3369_v40, %v3321_v55  ;;  %3540 = vmatmul.bf16.gmra.mxu1 %v8580_v5  ;;  %v3458_v54 = vadd.f32 %v8650_v63, %v8723_v60  ;;  %v3460_v55 = vadd.f32 %v8662_v22, %v8723_v60  ;;  %v6202_v22 = vld [vmem:[#allocation6 + $0x18] sm:$0xf] }
 0x3e0   : > { %v3328_v24 = vadd.f32 %v8644_v57, %v8671_v32  ;;  %v3331_v57 = vadd.f32 %v8653_v47, %v8671_v32  ;;  %v3333_v47 = vadd.f32 %v8660_v8, %v8671_v32  ;;  %v3336_v8 = vadd.f32 %v8676_v44, %v8671_v32 }
 0x3e1   : > { %v8715_v56 = vpack.c.bf16 %v3745_v62, %v3742_v7  ;;  %3608 = vmatmul.bf16.gmra.mxu3 %v8408_v14  ;;  %v6214_v14 = vld [vmem:[#allocation6 + $0x30] sm:$0xf]  ;;  %v3470_v44 = vadd.f32 %v8712_v50, %v8723_v60 }
 0x3e2   : > { %v6215_v4 = vor.u32 %v6803_v28, %v6214_v14  ;;  %v8736_v63 = vpop.f32.mrf.mxu0 }
 0x3e4   : > { %v8718_v45 = vpop.f32.mrf.mxu1  ;;  %v3413_v58 = vpop.f32.mrf.mxu3  ;;  %4307 = vmatpush.bf16.msra.mxu2 %v6215_v4  ;;  %v3465_v4 = vadd.f32 %v8690_v52, %v8723_v60  ;;  %v6797_v52 = vld [vmem:[#allocation6 + $0x8] sm:$0xf0] }
 0x3e5   : > { %v3414_v34 = vadd.f32 %v3413_v58, %v3365_v39  ;;  %v3326_v39 = vadd.f32 %v8637_v27, %v8671_v32 }
 0x3e6   : > { %v3371_v29 = vpop.f32.mrf.mxu2 }
 0x3e7   : > { %v3372_v3 = vadd.f32 %v3371_v29, %v3323_v30  ;;  %v3748_v21 = vmax.f32 %v3414_v34, 0.0  ;;  %v6800_v30 = vld [vmem:[#allocation6 + $0x20] sm:$0xf0] }
 0x3ea   : > { %3672 = vmatmul.bf16.gmra.mxu0 %v8518_v17 }
 0x3eb   : > { %3569 = vmatmul.bf16.gmra.mxu2 %v8606_v35 }
 0x3ec   : > { %v3415_v18 = vpop.f32.mrf.mxu3  ;;  %v3506_v2 = vpop.f32.mrf.mxu1 }
 0x3ed   : > { %v3416_v15 = vadd.f32 %v3415_v18, %v3367_v23  ;;  %v8733_v41 = vadd.f32 %v3506_v2, %v3458_v54  ;;  %v6203_v54 = vor.u32 %v6800_v30, %v6202_v22  ;;  %v6370_v30 = vld [vmem:[#allocation6 + $0x168] sm:$0xf] }
 0x3ee   : > { %v3374_v10 = vpop.f32.mrf.mxu2 }
 0x3ef   : > { %v3751_v17 = vmax.f32 %v3416_v15, 0.0  ;;  %v3375_v19 = vadd.f32 %v3374_v10, %v3326_v39  ;;  %3701 = vmatmul.bf16.vlgmr.msrb.gmra.mxu1 %v8551_v26  ;;  %v8750_v26 = vpop.f32.mrf.mxu0  ;;  %4308 = vmatpush.bf16.msra.mxu2 %v6203_v54 }
 0x3f1   : > { %3613 = vmatmul.bf16.gmra.mxu3 %v8428_v48  ;;  %v8739_v1 = vpack.c.bf16 %v3751_v17, %v3748_v21  ;;  %v3463_v48 = vadd.f32 %v8680_v16, %v8723_v60 }
 0x3f4   : > { %v3418_v27 = vpop.f32.mrf.mxu3  ;;  %v3508_v23 = vpop.f32.mrf.mxu1 }
 0x3f5   : > { %v3419_v40 = vadd.f32 %v3418_v27, %v3370_v0  ;;  %v8745_v7 = vadd.f32 %v3508_v23, %v3460_v55 }
 0x3f6   : > { %v3376_v62 = vpop.f32.mrf.mxu2 }
 0x3f7   : > { %v3377_v58 = vadd.f32 %v3376_v62, %v3328_v24 }
 0x3fa   : > { %3677 = vmatmul.bf16.gmra.mxu0 %v8543_v20  ;;  %v3754_v20 = vmax.f32 %v3419_v40, 0.0 }
 0x3fb   : > { %3574 = vmatmul.bf16.gmra.mxu2 %v8624_v11 }
 0x3fc   : > { %v3420_v34 = vpop.f32.mrf.mxu3  ;;  %v3511_v29 = vpop.f32.mrf.mxu1 }
 0x3fd   : > { %v3421_v0 = vadd.f32 %v3420_v34, %v3372_v3  ;;  %v8755_v14 = vadd.f32 %v3511_v29, %v3463_v48  ;;  %v8765_v3 = vpop.f32.mrf.mxu0  ;;  %v6842_v34 = vld [vmem:[#allocation6 + $0x170] sm:$0xf0] }
 0x3fe   : > { %v3379_v28 = vpop.f32.mrf.mxu2  ;;  %v6371_v29 = vor.u32 %v6842_v34, %v6370_v30  ;;  %v6466_v30 = vld [vmem:[#allocation6 + $0x228] sm:$0xf]  ;;  %v6866_v34 = vld [vmem:[#allocation6 + $0x230] sm:$0xf0] }
 0x3ff   : > { %v3757_v18 = vmax.f32 %v3421_v0, 0.0  ;;  %v3380_v16 = vadd.f32 %v3379_v28, %v3331_v57  ;;  %3706 = vmatmul.bf16.gmra.mxu1 %v8571_v43  ;;  %v6190_v43 = vld [vmem:[#allocation6] sm:$0xf]  ;;  %v6358_v0 = vld [vmem:[#allocation6 + $0x150] sm:$0xf] }
 0x400   : > { %v6191_v24 = vor.u32 %v6797_v52, %v6190_v43  ;;  %4351 = vmatpush.bf16.msra.mxu3 %v6371_v29  ;;  %v6839_v28 = vld [vmem:[#allocation6 + $0x158] sm:$0xf0]  ;;  %v6467_v29 = vor.u32 %v6866_v34, %v6466_v30 }
 0x401   : > { %3618 = vmatmul.bf16.gmra.mxu3 %v8447_v42  ;;  %v8759_v2 = vpack.c.bf16 %v3757_v18, %v3754_v20  ;;  %v3468_v42 = vadd.f32 %v8700_v31, %v8723_v60  ;;  %v3338_v20 = vadd.f32 %v8686_v6, %v8671_v32  ;;  %v6841_v6 = vld [vmem:[#allocation6 + $0x16c] sm:$0xf] }
 0x402   : > { %4309 = vmatpush.bf16.msra.mxu2 %v6191_v24  ;;  %v3341_v24 = vadd.f32 %v8694_v61, %v8671_v32  ;;  %v6817_v61 = vld [vmem:[#allocation6 + $0xac] sm:$0xf]  ;;  %4400 = vmatpush.bf16.msra.mxu0 %v6467_v29 }
 0x404   : > { %v3423_v39 = vpop.f32.mrf.mxu3  ;;  %v3513_v15 = vpop.f32.mrf.mxu1 }
 0x405   : > { %v3424_v10 = vadd.f32 %v3423_v39, %v3375_v19  ;;  %v8767_v21 = vadd.f32 %v3513_v15, %v3465_v4  ;;  %v8777_v48 = vpop.f32.mrf.mxu0  ;;  %v6359_v4 = vor.u32 %v6839_v28, %v6358_v0  ;;  %v6346_v15 = vld [vmem:[#allocation6 + $0x138] sm:$0xf] }
 0x406   : > { %v3381_v17 = vpop.f32.mrf.mxu2 }
 0x407   : > { %v3382_v55 = vadd.f32 %v3381_v17, %v3333_v47  ;;  %4352 = vmatpush.bf16.msra.mxu3 %v6359_v4  ;;  %v6836_v47 = vld [vmem:[#allocation6 + $0x140] sm:$0xf0]  ;;  %v3473_v17 = vadd.f32 %v8725_v25, %v8723_v60 }
 0x40a   : > { %3682 = vmatmul.bf16.gmra.mxu0 %v8562_v9  ;;  %v3760_v9 = vmax.f32 %v3424_v10, 0.0  ;;  %v6347_v10 = vor.u32 %v6836_v47, %v6346_v15  ;;  %v6827_v15 = vld [vmem:[#allocation6 + $0xf8] sm:$0xf0] }
 0x40b   : > { %3579 = vmatmul.bf16.gmra.mxu2 %v8640_v36 }
 0x40c   : > { %v3425_v27 = vpop.f32.mrf.mxu3  ;;  %v3516_v23 = vpop.f32.mrf.mxu1  ;;  %4353 = vmatpush.bf16.msra.mxu3 %v6347_v10 }
 0x40d   : > { %v3426_v19 = vadd.f32 %v3425_v27, %v3377_v58  ;;  %v8775_v40 = vadd.f32 %v3516_v23, %v3468_v42  ;;  %v8793_v50 = vpop.f32.mrf.mxu0  ;;  %v6334_v27 = vld [vmem:[#allocation6 + $0x120] sm:$0xf]  ;;  %v6833_v23 = vld [vmem:[#allocation6 + $0x128] sm:$0xf0] }
 0x40e   : > { %v3384_v62 = vpop.f32.mrf.mxu2 }
 0x40f   : > { %v3763_v22 = vmax.f32 %v3426_v19, 0.0  ;;  %v8779_v31 = vadd.f32 %v3384_v62, %v3336_v8  ;;  %3711 = vmatmul.bf16.gmra.mxu1 %v8589_v33 }
 0x411   : > { %3623 = vmatmul.bf16.gmra.mxu3 %v8466_v13  ;;  %v8783_v54 = vpack.c.bf16 %v3763_v22, %v3760_v9 }
 0x414   : > { %v3428_v58 = vpop.f32.mrf.mxu3  ;;  %v3518_v57 = vpop.f32.mrf.mxu1 }
 0x415   : > { %v3429_v18 = vadd.f32 %v3428_v58, %v3380_v16  ;;  %v8789_v33 = vadd.f32 %v3518_v57, %v3470_v44  ;;  %v6372_v16 = vld [vmem:[#allocation6 + $0x174] sm:$0xf0]  ;;  %v6322_v44 = vld [vmem:[#allocation6 + $0x108] sm:$0xf]  ;;  %v6830_v58 = vld [vmem:[#allocation6 + $0x110] sm:$0xf0] }
 0x416   : > { %v3386_v39 = vpop.f32.mrf.mxu2  ;;  %v6375_v52 = vor.u32 %v6841_v6, %v6372_v16  ;;  %v6323_v57 = vor.u32 %v6830_v58, %v6322_v44 }
 0x417   : > { %v8791_v13 = vadd.f32 %v3386_v39, %v3338_v20  ;;  %v3766_v25 = vmax.f32 %v3429_v18, 0.0  ;;  %v3475_v20 = vadd.f32 %v8736_v63, %v8723_v60  ;;  %v8811_v18 = vpop.f32.mrf.mxu0  ;;  %v6310_v39 = vld [vmem:[#allocation6 + $0xf0] sm:$0xf]  ;;  %v6298_v63 = vld [vmem:[#allocation6 + $0xd8] sm:$0xf] }
 0x418   : > { %4498 = vmatpush.bf16.msrb.mxu2 %v6375_v52  ;;  %v3478_v52 = vadd.f32 %v8750_v26, %v8723_v60 }
 0x41a   : > { %3687 = vmatmul.bf16.gmra.mxu0 %v8580_v5  ;;  %v6335_v5 = vor.u32 %v6833_v23, %v6334_v27  ;;  %v6838_v27 = vld [vmem:[#allocation6 + $0x154] sm:$0xf]  ;;  %v6360_v23 = vld [vmem:[#allocation6 + $0x15c] sm:$0xf0] }
 0x41b   : > { %3584 = vmatmul.bf16.gmra.mxu2 %v8656_v49 }
 0x41c   : > { %v3430_v42 = vpop.f32.mrf.mxu3  ;;  %v3521_v43 = vpop.f32.mrf.mxu1  ;;  %4354 = vmatpush.bf16.msra.mxu3 %v6335_v5  ;;  %v6821_v5 = vld [vmem:[#allocation6 + $0xc8] sm:$0xf0] }
 0x41d   : > { %v3431_v8 = vadd.f32 %v3430_v42, %v3382_v55  ;;  %v8801_v19 = vadd.f32 %v3521_v43, %v3473_v17  ;;  %v6276_v55 = vld [vmem:[#allocation6 + $0xb4] sm:$0xf0]  ;;  %v6311_v17 = vor.u32 %v6827_v15, %v6310_v39  ;;  %v6824_v42 = vld [vmem:[#allocation6 + $0xe0] sm:$0xf0]  ;;  %v3348_v39 = vadd.f32 %v8718_v45, %v8671_v32 }
 0x41e   : > { %v3389_v62 = vpop.f32.mrf.mxu2  ;;  %v6279_v28 = vor.u32 %v6817_v61, %v6276_v55  ;;  %v6299_v43 = vor.u32 %v6824_v42, %v6298_v63  ;;  %v6454_v61 = vld [vmem:[#allocation6 + $0x210] sm:$0xf]  ;;  %v6863_v55 = vld [vmem:[#allocation6 + $0x218] sm:$0xf0]  ;;  %v6808_v63 = vld [vmem:[#allocation6 + $0x64] sm:$0xf] }
 0x41f   : > { %v3769_v9 = vmax.f32 %v3431_v8, 0.0  ;;  %v8803_v22 = vadd.f32 %v3389_v62, %v3341_v24  ;;  %3716 = vmatmul.bf16.gmra.mxu1 %v8606_v35  ;;  %v6286_v8 = vld [vmem:[#allocation6 + $0xc0] sm:$0xf]  ;;  %v3346_v62 = vadd.f32 %v8708_v53, %v8671_v32  ;;  %v6814_v53 = vld [vmem:[#allocation6 + $0x94] sm:$0xf] }
 0x420   : > { %4355 = vmatpush.bf16.msra.mxu3 %v6323_v57  ;;  %4449 = vmatpush.bf16.msra.mxu1 %v6279_v28  ;;  %v6287_v26 = vor.u32 %v6821_v5, %v6286_v8  ;;  %v6455_v57 = vor.u32 %v6863_v55, %v6454_v61  ;;  %v6264_v28 = vld [vmem:[#allocation6 + $0x9c] sm:$0xf0]  ;;  %v6240_v42 = vld [vmem:[#allocation6 + $0x6c] sm:$0xf0]  ;;  %v6860_v8 = vld [vmem:[#allocation6 + $0x200] sm:$0xf0] }
 0x421   : > { %3628 = vmatmul.bf16.gmra.mxu3 %v8485_v46  ;;  %v8807_v0 = vpack.c.bf16 %v3769_v9, %v3766_v25  ;;  %v3343_v46 = vadd.f32 %v8702_v12, %v8671_v32  ;;  %v8823_v25 = vpop.f32.mrf.mxu0  ;;  %v6348_v32 = vld [vmem:[#allocation6 + $0x144] sm:$0xf0]  ;;  %v6243_v45 = vor.u32 %v6808_v63, %v6240_v42  ;;  %v6802_v61 = vld [vmem:[#allocation6 + $0x34] sm:$0xf]  ;;  %v6216_v55 = vld [vmem:[#allocation6 + $0x3c] sm:$0xf0] }
 0x422   : > { %4401 = vmatpush.bf16.msra.mxu0 %v6455_v57  ;;  %v6219_v57 = vor.u32 %v6802_v61, %v6216_v55 }
 0x424   : > { %v3433_v35 = vpop.f32.mrf.mxu3  ;;  %v3523_v4 = vpop.f32.mrf.mxu1  ;;  %4356 = vmatpush.bf16.msra.mxu3 %v6311_v17 }
 0x425   : > { %v3434_v47 = vadd.f32 %v3433_v35, %v8779_v31  ;;  %v8816_v10 = vadd.f32 %v3523_v4, %v3475_v20  ;;  %v6363_v31 = vor.u32 %v6838_v27, %v6360_v23 }
 0x426   : > { %v3391_v6 = vpop.f32.mrf.mxu2 }
 0x427   : > { %v3392_v16 = vadd.f32 %v3391_v6, %v3343_v46  ;;  %4499 = vmatpush.bf16.msrb.mxu2 %v6363_v31  ;;  %v3772_v29 = vmax.f32 %v3434_v47, 0.0  ;;  %v6811_v46 = vld [vmem:[#allocation6 + $0x7c] sm:$0xf]  ;;  %v6252_v47 = vld [vmem:[#allocation6 + $0x84] sm:$0xf0] }
 0x428   : > { %4357 = vmatpush.bf16.msra.mxu3 %v6299_v43  ;;  %v6255_v6 = vor.u32 %v6811_v46, %v6252_v47  ;;  %v3483_v43 = vadd.f32 %v8777_v48, %v8723_v60  ;;  %v6442_v31 = vld [vmem:[#allocation6 + $0x1f8] sm:$0xf]  ;;  %v6204_v47 = vld [vmem:[#allocation6 + $0x24] sm:$0xf0] }
 0x429   : > { %v8837_v17 = vpop.f32.mrf.mxu0 }
 0x42b   : > { %3589 = vmatmul.bf16.gmra.mxu2 %v8683_v59 }
 0x42c   : > { %v3435_v12 = vpop.f32.mrf.mxu3  ;;  %v3526_v24 = vpop.f32.mrf.mxu1  ;;  %4358 = vmatpush.bf16.msra.mxu3 %v6287_v26  ;;  %v6228_v26 = vld [vmem:[#allocation6 + $0x54] sm:$0xf0] }
 0x42d   : > { %v3436_v9 = vadd.f32 %v3435_v12, %v8791_v13  ;;  %v8826_v30 = vadd.f32 %v3526_v24, %v3478_v52  ;;  %v6267_v13 = vor.u32 %v6814_v53, %v6264_v28  ;;  %v6835_v52 = vld [vmem:[#allocation6 + $0x13c] sm:$0xf] }
 0x42e   : > { %v3394_v34 = vpop.f32.mrf.mxu2  ;;  %v6351_v23 = vor.u32 %v6835_v52, %v6348_v32  ;;  %v6854_v52 = vld [vmem:[#allocation6 + $0x1d0] sm:$0xf0]  ;;  %v6796_v32 = vld [vmem:[#allocation6 + $0x4] sm:$0xf] }
 0x42f   : > { %v3775_v44 = vmax.f32 %v3436_v9, 0.0  ;;  %v3395_v58 = vadd.f32 %v3394_v34, %v3346_v62  ;;  %3721 = vmatmul.bf16.gmra.mxu1 %v8624_v11  ;;  %v6443_v62 = vor.u32 %v6860_v8, %v6442_v31  ;;  %v6805_v9 = vld [vmem:[#allocation6 + $0x4c] sm:$0xf] }
 0x430   : > { %4450 = vmatpush.bf16.msra.mxu1 %v6267_v13  ;;  %4500 = vmatpush.bf16.msrb.mxu2 %v6351_v23  ;;  %v6192_v23 = vld [vmem:[#allocation6 + $0xc] sm:$0xf0] }
 0x431   : > { %3633 = vmatmul.bf16.gmra.mxu3 %v8505_v37  ;;  %v8830_v20 = vpack.c.bf16 %v3775_v44, %v3772_v29  ;;  %v6231_v29 = vor.u32 %v6805_v9, %v6228_v26  ;;  %4402 = vmatpush.bf16.msra.mxu0 %v6443_v62  ;;  %v8847_v44 = vpop.f32.mrf.mxu0  ;;  %v6406_v26 = vld [vmem:[#allocation6 + $0x1b0] sm:$0xf] }
 0x434   : > { %v3438_v35 = vpop.f32.mrf.mxu3  ;;  %v8832_v4 = vpop.f32.mrf.mxu1  ;;  %4451 = vmatpush.bf16.msra.mxu1 %v6255_v6 }
 0x435   : > { %v3439_v11 = vadd.f32 %v3438_v35, %v8803_v22 }
 0x436   : > { %v3396_v15 = vpop.f32.mrf.mxu2 }
 0x437   : > { %v8839_v37 = vadd.f32 %v3396_v15, %v3348_v39  ;;  %v3778_v48 = vmax.f32 %v3439_v11, 0.0  ;;  %v6430_v39 = vld [vmem:[#allocation6 + $0x1e0] sm:$0xf]  ;;  %v6857_v11 = vld [vmem:[#allocation6 + $0x1e8] sm:$0xf0] }
 0x438   : > { %4452 = vmatpush.bf16.msra.mxu1 %v6243_v45  ;;  %v6799_v15 = vld [vmem:[#allocation6 + $0x1c] sm:$0xf] }
 0x439   : > { %v6207_v6 = vor.u32 %v6799_v15, %v6204_v47  ;;  %v6382_v15 = vld [vmem:[#allocation6 + $0x180] sm:$0xf] }
 0x43b   : > { %4310 = vmatmul.bf16.vlgmr.msra.gmra.mxu2 %v8715_v56 }
 0x43c   : > { %v3440_v22 = vpop.f32.mrf.mxu3  ;;  %v3531_v27 = vpop.f32.mrf.mxu1  ;;  %4453 = vmatpush.bf16.msra.mxu1 %v6231_v29 }
 0x43d   : > { %v3441_v12 = vadd.f32 %v3440_v22, %v3392_v16  ;;  %v8844_v24 = vadd.f32 %v3531_v27, %v3483_v43  ;;  %v6418_v43 = vld [vmem:[#allocation6 + $0x1c8] sm:$0xf]  ;;  %v6336_v22 = vld [vmem:[#allocation6 + $0x12c] sm:$0xf0] }
 0x43e   : > { %v3555_v5 = vpop.f32.mrf.mxu2  ;;  %v6419_v27 = vor.u32 %v6854_v52, %v6418_v43  ;;  %v6829_v43 = vld [vmem:[#allocation6 + $0x10c] sm:$0xf]  ;;  %v6324_v52 = vld [vmem:[#allocation6 + $0x114] sm:$0xf0] }
 0x43f   : > { %v3781_v34 = vmax.f32 %v3441_v12, 0.0  ;;  %3726 = vmatmul.bf16.gmra.mxu1 %v8640_v36  ;;  %v3556_v13 = vadd.f32 %v3555_v5, %v8733_v41  ;;  %v3488_v41 = vadd.f32 %v8811_v18, %v8723_v60  ;;  %v6195_v5 = vor.u32 %v6796_v32, %v6192_v23 }
 0x440   : > { %4454 = vmatpush.bf16.msra.mxu1 %v6219_v57  ;;  %v6394_v57 = vld [vmem:[#allocation6 + $0x198] sm:$0xf] }
 0x441   : > { %3638 = vmatmul.bf16.gmra.mxu3 %v8522_v38  ;;  %v8850_v16 = vpack.c.bf16 %v3781_v34, %v3778_v48  ;;  %v6431_v38 = vor.u32 %v6857_v11, %v6430_v39  ;;  %v3743_v63 = vmax.f32 %v3556_v13, 0.0  ;;  %v6851_v48 = vld [vmem:[#allocation6 + $0x1b8] sm:$0xf0] }
 0x442   : > { %v6407_v61 = vor.u32 %v6851_v48, %v6406_v26  ;;  %v6312_v48 = vld [vmem:[#allocation6 + $0xfc] sm:$0xf0] }
 0x443   : > { %4403 = vmatpush.bf16.msra.mxu0 %v6431_v38 }
 0x444   : > { %v3443_v53 = vpop.f32.mrf.mxu3  ;;  %v8852_v28 = vpop.f32.mrf.mxu1  ;;  %4455 = vmatpush.bf16.msra.mxu1 %v6207_v6 }
 0x445   : > { %v3444_v35 = vadd.f32 %v3443_v53, %v3395_v58  ;;  %v8858_v58 = vpop.f32.mrf.mxu0 }
 0x446   : > { %v3557_v36 = vpop.f32.mrf.mxu2 }
 0x447   : > { %v3558_v46 = vadd.f32 %v3557_v36, %v8745_v7  ;;  %v6832_v7 = vld [vmem:[#allocation6 + $0x124] sm:$0xf]  ;;  %4404 = vmatpush.bf16.msra.mxu0 %v6419_v27  ;;  %v3784_v34 = vmax.f32 %v3444_v35, 0.0 }
 0x448   : > { %v6339_v8 = vor.u32 %v6832_v7, %v6336_v22  ;;  %4456 = vmatpush.bf16.msra.mxu1 %v6195_v5  ;;  %v8888_v5 = vperm.slane %v8667_v51, 2 }
 0x449   : > { %v3746_v42 = vmax.f32 %v3558_v46, 0.0  ;;  %v6845_v46 = vld [vmem:[#allocation6 + $0x188] sm:$0xf0] }
 0x44a   : > { %4501 = vmatpush.bf16.msrb.mxu2 %v6339_v8  ;;  %v6383_v38 = vor.u32 %v6845_v46, %v6382_v15 }
 0x44b   : > { %v8860_v45 = vpack.c.bf16 %v3746_v42, %v3743_v63  ;;  %4315 = vmatmul.bf16.gmra.mxu2 %v8739_v1  ;;  %4405 = vmatpush.bf16.msra.mxu0 %v6407_v61  ;;  %v3493_v63 = vadd.f32 %v8837_v17, %v8723_v60 }
 0x44c   : > { %v3445_v12 = vpop.f32.mrf.mxu3  ;;  %v3536_v31 = vpop.f32.mrf.mxu1 }
 0x44d   : > { %v3446_v62 = vadd.f32 %v3445_v12, %v8839_v37  ;;  %v8864_v9 = vadd.f32 %v3536_v31, %v3488_v41  ;;  %v6848_v37 = vld [vmem:[#allocation6 + $0x1a0] sm:$0xf0]  ;;  %v3655_v39 = vpop.f32.mrf.mxu0  ;;  %v6327_v41 = vor.u32 %v6829_v43, %v6324_v52 }
 0x44e   : > { %v3560_v18 = vpop.f32.mrf.mxu2  ;;  %v6395_v53 = vor.u32 %v6848_v37, %v6394_v57 }
 0x44f   : > { %v3787_v29 = vmax.f32 %v3446_v62, 0.0  ;;  %3731 = vmatmul.bf16.gmra.mxu1 %v8656_v49  ;;  %v3561_v11 = vadd.f32 %v3560_v18, %v8755_v14  ;;  %4502 = vmatpush.bf16.msrb.mxu2 %v6327_v41 }
 0x450   : > { %4406 = vmatpush.bf16.msra.mxu0 %v6395_v53 }
 0x451   : > { %4359 = vmatmul.bf16.vlgmr.msra.gmra.mxu3 %v8860_v45  ;;  %v8868_v55 = vpack.c.bf16 %v3787_v29, %v3784_v34  ;;  %v3749_v47 = vmax.f32 %v3561_v11, 0.0 }
 0x454   : > { %v8870_v13 = vpop.f32.mrf.mxu1  ;;  %v3604_v36 = vpop.f32.mrf.mxu3  ;;  %4407 = vmatpush.bf16.msra.mxu0 %v6383_v38 }
 0x456   : > { %v3562_v35 = vpop.f32.mrf.mxu2 }
 0x457   : > { %v3563_v49 = vadd.f32 %v3562_v35, %v8767_v21  ;;  %v3658_v21 = vpop.f32.mrf.mxu0 }
 0x459   : > { %v3752_v6 = vmax.f32 %v3563_v49, 0.0 }
 0x45b   : > { %4320 = vmatmul.bf16.gmra.mxu2 %v8759_v2  ;;  %v8877_v42 = vpack.c.bf16 %v3752_v6, %v3749_v47 }
 0x45c   : > { %v3541_v14 = vpop.f32.mrf.mxu1  ;;  %v3606_v32 = vpop.f32.mrf.mxu3 }
 0x45d   : > { %v8879_v7 = vadd.f32 %v3541_v14, %v3493_v63  ;;  %v6300_v14 = vld [vmem:[#allocation6 + $0xe4] sm:$0xf0] }
 0x45e   : > { %v3565_v22 = vpop.f32.mrf.mxu2 }
 0x45f   : > { %3736 = vmatmul.bf16.gmra.mxu1 %v8683_v59  ;;  %v3566_v23 = vadd.f32 %v3565_v22, %v8775_v40  ;;  %v3660_v8 = vpop.f32.mrf.mxu0  ;;  %v6826_v59 = vld [vmem:[#allocation6 + $0xf4] sm:$0xf]  ;;  %v3605_v40 = vadd.f32 %v3604_v36, %v8888_v5 }
 0x460   : > { %v6315_v61 = vor.u32 %v6826_v59, %v6312_v48 }
 0x461   : > { %4364 = vmatmul.bf16.gmra.mxu3 %v8877_v42  ;;  %v3755_v62 = vmax.f32 %v3566_v23, 0.0  ;;  %v3654_v51 = vadd.f32 %v8858_v58, %v3605_v40 }
 0x462   : > { %4503 = vmatpush.bf16.msrb.mxu2 %v6315_v61 }
 0x464   : > { %v8883_v27 = vpop.f32.mrf.mxu1  ;;  %v3609_v17 = vpop.f32.mrf.mxu3 }
 0x465   : > { %v3610_v23 = vadd.f32 %v3609_v17, %v8888_v5 }
 0x466   : > { %v3567_v12 = vpop.f32.mrf.mxu2 }
 0x467   : > { %v3568_v31 = vadd.f32 %v3567_v12, %v8789_v33  ;;  %v3607_v33 = vadd.f32 %v3606_v32, %v8888_v5  ;;  %v3663_v37 = vpop.f32.mrf.mxu0 }
 0x469   : > { %v3758_v18 = vmax.f32 %v3568_v31, 0.0  ;;  %v3656_v11 = vadd.f32 %v3655_v39, %v3607_v33  ;;  %v6823_v39 = vld [vmem:[#allocation6 + $0xdc] sm:$0xf]  ;;  %v3659_v31 = vadd.f32 %v3658_v21, %v3610_v23 }
 0x46a   : > { %v6303_v41 = vor.u32 %v6823_v39, %v6300_v14 }
 0x46b   : > { %4325 = vmatmul.bf16.gmra.mxu2 %v8783_v54  ;;  %v8891_v26 = vpack.c.bf16 %v3758_v18, %v3755_v62  ;;  %v3480_v62 = vadd.f32 %v8765_v3, %v8723_v60 }
 0x46c   : > { %v3611_v34 = vpop.f32.mrf.mxu3  ;;  %v3702_v29 = vpop.f32.mrf.mxu1  ;;  %4504 = vmatpush.bf16.msrb.mxu2 %v6303_v41 }
 0x46d   : > { %v3703_v53 = vadd.f32 %v3702_v29, %v3654_v51  ;;  %v3529_v61 = vadd.f32 %v8832_v4, %v3480_v62  ;;  %v6820_v4 = vld [vmem:[#allocation6 + $0xc4] sm:$0xf] }
 0x46e   : > { %v3570_v57 = vpop.f32.mrf.mxu2 }
 0x46f   : > { %4457 = vmatmul.bf16.vlgmr.msra.gmra.mxu1 %v8715_v56  ;;  %v3571_v46 = vadd.f32 %v3570_v57, %v8801_v19  ;;  %v3744_v36 = vmax.f32 %v3703_v53, 0.0  ;;  %v3665_v22 = vpop.f32.mrf.mxu0 }
 0x471   : > { %4369 = vmatmul.bf16.gmra.mxu3 %v8891_v26  ;;  %v3761_v63 = vmax.f32 %v3571_v46, 0.0 }
 0x474   : > { %v3614_v35 = vpop.f32.mrf.mxu3  ;;  %v3704_v15 = vpop.f32.mrf.mxu1 }
 0x475   : > { %v3705_v49 = vadd.f32 %v3704_v15, %v3656_v11 }
 0x476   : > { %v3572_v38 = vpop.f32.mrf.mxu2 }
 0x477   : > { %v3747_v47 = vmax.f32 %v3705_v49, 0.0  ;;  %v3573_v6 = vadd.f32 %v3572_v38, %v8816_v10  ;;  %v3612_v10 = vadd.f32 %v3611_v34, %v8888_v5  ;;  %v8916_v34 = vpop.f32.mrf.mxu0  ;;  %v3615_v38 = vadd.f32 %v3614_v35, %v8888_v5 }
 0x479   : > { %v8900_v43 = vpack.c.bf16 %v3747_v47, %v3744_v36  ;;  %v3764_v52 = vmax.f32 %v3573_v6, 0.0  ;;  %v3661_v59 = vadd.f32 %v3660_v8, %v3612_v10  ;;  %v6288_v8 = vld [vmem:[#allocation6 + $0xcc] sm:$0xf0]  ;;  %v6865_v6 = vld [vmem:[#allocation6 + $0x22c] sm:$0xf]  ;;  %v3664_v39 = vadd.f32 %v3663_v37, %v3615_v38 }
 0x47a   : > { %v6291_v49 = vor.u32 %v6820_v4, %v6288_v8  ;;  %v6862_v10 = vld [vmem:[#allocation6 + $0x214] sm:$0xf] }
 0x47b   : > { %4330 = vmatmul.bf16.gmra.mxu2 %v8807_v0  ;;  %4408 = vmatmul.bf16.vlgmr.msra.gmra.mxu0 %v8900_v43  ;;  %v8904_v58 = vpack.c.bf16 %v3764_v52, %v3761_v63  ;;  %v6468_v63 = vld [vmem:[#allocation6 + $0x234] sm:$0xf0] }
 0x47c   : > { %v3616_v32 = vpop.f32.mrf.mxu3  ;;  %v3707_v19 = vpop.f32.mrf.mxu1  ;;  %4505 = vmatpush.bf16.msrb.mxu2 %v6291_v49  ;;  %v6471_v14 = vor.u32 %v6865_v6, %v6468_v63  ;;  %v6432_v49 = vld [vmem:[#allocation6 + $0x1ec] sm:$0xf0] }
 0x47d   : > { %v3708_v18 = vadd.f32 %v3707_v19, %v3659_v31  ;;  %v3617_v47 = vadd.f32 %v3616_v32, %v8888_v5  ;;  %v3485_v19 = vadd.f32 %v8793_v50, %v8723_v60  ;;  %v6456_v32 = vld [vmem:[#allocation6 + $0x21c] sm:$0xf0]  ;;  %v6859_v50 = vld [vmem:[#allocation6 + $0x1fc] sm:$0xf]  ;;  %v6282_v63 = vld [vmem:[#allocation6 + $0xb0] sm:$0xf] }
 0x47e   : > { %v3575_v12 = vpop.f32.mrf.mxu2  ;;  %4547 = vmatpush.bf16.msrb.mxu3 %v6471_v14  ;;  %v6459_v37 = vor.u32 %v6862_v10, %v6456_v32 }
 0x47f   : > { %4462 = vmatmul.bf16.gmra.mxu1 %v8739_v1  ;;  %v3576_v17 = vadd.f32 %v3575_v12, %v8826_v30  ;;  %v3750_v33 = vmax.f32 %v3708_v18, 0.0  ;;  %v3670_v52 = vpop.f32.mrf.mxu0  ;;  %v3666_v23 = vadd.f32 %v3665_v22, %v3617_v47  ;;  %v3534_v31 = vadd.f32 %v8852_v28, %v3485_v19  ;;  %v6474_v28 = vld [vmem:[#allocation6 + $0x230] sm:$0xf] }
 0x480   : > { %v6378_v19 = vld [vmem:[#allocation6 + $0x170] sm:$0xf] }
 0x481   : > { %4374 = vmatmul.bf16.gmra.mxu3 %v8904_v58  ;;  %v3767_v53 = vmax.f32 %v3576_v17, 0.0 }
 0x482   : > { %4548 = vmatpush.bf16.msrb.mxu3 %v6459_v37 }
 0x484   : > { %v8912_v48 = vpop.f32.mrf.mxu3  ;;  %v3709_v29 = vpop.f32.mrf.mxu1 }
 0x485   : > { %v3710_v40 = vadd.f32 %v3709_v29, %v3661_v59  ;;  %v3620_v38 = vadd.f32 %v8912_v48, %v8888_v5  ;;  %v6420_v48 = vld [vmem:[#allocation6 + $0x1d4] sm:$0xf0] }
 0x486   : > { %v3577_v57 = vpop.f32.mrf.mxu2 }
 0x487   : > { %v3753_v21 = vmax.f32 %v3710_v40, 0.0  ;;  %v3578_v51 = vadd.f32 %v3577_v57, %v3529_v61  ;;  %v6444_v40 = vld [vmem:[#allocation6 + $0x204] sm:$0xf0] }
 0x489   : > { %v3770_v11 = vmax.f32 %v3578_v51, 0.0  ;;  %v8918_v15 = vpack.c.bf16 %v3753_v21, %v3750_v33  ;;  %v6447_v21 = vor.u32 %v6859_v50, %v6444_v40  ;;  %v8936_v51 = vpop.f32.mrf.mxu0 }
 0x48b   : > { %4335 = vmatmul.bf16.gmra.mxu2 %v8830_v20  ;;  %4413 = vmatmul.bf16.gmra.mxu0 %v8918_v15  ;;  %v8922_v3 = vpack.c.bf16 %v3770_v11, %v3767_v53  ;;  %v6867_v53 = vld [vmem:[#allocation6 + $0x238] sm:$0xf0] }
 0x48c   : > { %v3621_v30 = vpop.f32.mrf.mxu3  ;;  %v3712_v46 = vpop.f32.mrf.mxu1  ;;  %4549 = vmatpush.bf16.msrb.mxu3 %v6447_v21  ;;  %v6475_v8 = vor.u32 %v6867_v53, %v6474_v28  ;;  %v6847_v28 = vld [vmem:[#allocation6 + $0x19c] sm:$0xf] }
 0x48d   : > { %v3713_v41 = vadd.f32 %v3712_v46, %v3664_v39  ;;  %v6856_v46 = vld [vmem:[#allocation6 + $0x1e4] sm:$0xf]  ;;  %v3622_v6 = vadd.f32 %v3621_v30, %v8888_v5  ;;  %v6819_v39 = vld [vmem:[#allocation6 + $0xb8] sm:$0xf0]  ;;  %v3490_v30 = vadd.f32 %v8823_v25, %v8723_v60 }
 0x48e   : > { %v3580_v36 = vpop.f32.mrf.mxu2  ;;  %4694 = vmatpush.bf16.msra.mxu2 %v6475_v8  ;;  %v6283_v14 = vor.u32 %v6819_v39, %v6282_v63  ;;  %v6384_v63 = vld [vmem:[#allocation6 + $0x18c] sm:$0xf0] }
 0x48f   : > { %4467 = vmatmul.bf16.gmra.mxu1 %v8759_v2  ;;  %v3581_v62 = vadd.f32 %v3580_v36, %v8844_v24  ;;  %v3756_v29 = vmax.f32 %v3713_v41, 0.0  ;;  %v6435_v36 = vor.u32 %v6856_v46, %v6432_v49  ;;  %v6843_v41 = vld [vmem:[#allocation6 + $0x178] sm:$0xf0]  ;;  %v6864_v49 = vld [vmem:[#allocation6 + $0x220] sm:$0xf0] }
 0x490   : > { %v6379_v10 = vor.u32 %v6843_v41, %v6378_v19  ;;  %4596 = vmatpush.bf16.msrb.mxu0 %v6283_v14 }
 0x491   : > { %4379 = vmatmul.bf16.gmra.mxu3 %v8922_v3  ;;  %v3773_v22 = vmax.f32 %v3581_v62, 0.0  ;;  %v3671_v62 = vadd.f32 %v3670_v52, %v3622_v6  ;;  %v6396_v52 = vld [vmem:[#allocation6 + $0x1a4] sm:$0xf0]  ;;  %v6844_v6 = vld [vmem:[#allocation6 + $0x184] sm:$0xf] }
 0x492   : > { %4550 = vmatpush.bf16.msrb.mxu3 %v6435_v36  ;;  %4645 = vmatpush.bf16.msrb.mxu1 %v6379_v10  ;;  %v6399_v53 = vor.u32 %v6847_v28, %v6396_v52  ;;  %v6387_v14 = vor.u32 %v6844_v6, %v6384_v63  ;;  %v6816_v10 = vld [vmem:[#allocation6 + $0xa0] sm:$0xf0] }
 0x494   : > { %v8930_v35 = vpop.f32.mrf.mxu3  ;;  %v3714_v12 = vpop.f32.mrf.mxu1 }
 0x495   : > { %v3715_v18 = vadd.f32 %v3714_v12, %v3666_v23  ;;  %v6853_v23 = vld [vmem:[#allocation6 + $0x1cc] sm:$0xf]  ;;  %v3669_v12 = vadd.f32 %v8916_v34, %v3620_v38  ;;  %v3539_v34 = vadd.f32 %v8870_v13, %v3490_v30  ;;  %v3625_v39 = vadd.f32 %v8930_v35, %v8888_v5  ;;  %v6840_v30 = vld [vmem:[#allocation6 + $0x160] sm:$0xf0] }
 0x496   : > { %v3582_v59 = vpop.f32.mrf.mxu2  ;;  %v6423_v32 = vor.u32 %v6853_v23, %v6420_v48 }
 0x497   : > { %v3759_v61 = vmax.f32 %v3715_v18, 0.0  ;;  %v3583_v17 = vadd.f32 %v3582_v59, %v3534_v31  ;;  %v6850_v59 = vld [vmem:[#allocation6 + $0x1b4] sm:$0xf] }
 0x498   : > { %4551 = vmatpush.bf16.msrb.mxu3 %v6423_v32  ;;  %v6366_v32 = vld [vmem:[#allocation6 + $0x158] sm:$0xf] }
 0x499   : > { %v3776_v57 = vmax.f32 %v3583_v17, 0.0  ;;  %v8934_v33 = vpack.c.bf16 %v3759_v61, %v3756_v29  ;;  %v6408_v29 = vld [vmem:[#allocation6 + $0x1bc] sm:$0xf0]  ;;  %v3675_v61 = vpop.f32.mrf.mxu0  ;;  %v6367_v35 = vor.u32 %v6840_v30, %v6366_v32  ;;  %v6828_v30 = vld [vmem:[#allocation6 + $0x100] sm:$0xf0] }
 0x49a   : > { %v6411_v40 = vor.u32 %v6850_v59, %v6408_v29 }
 0x49b   : > { %4340 = vmatmul.bf16.gmra.mxu2 %v8850_v16  ;;  %4418 = vmatmul.bf16.gmra.mxu0 %v8934_v33  ;;  %v8940_v24 = vpack.c.bf16 %v3776_v57, %v3773_v22 }
 0x49c   : > { %v8942_v11 = vpop.f32.mrf.mxu3  ;;  %v3717_v4 = vpop.f32.mrf.mxu1  ;;  %4552 = vmatpush.bf16.msrb.mxu3 %v6411_v40  ;;  %4646 = vmatpush.bf16.msrb.mxu1 %v6367_v35 }
 0x49d   : > { %v3718_v31 = vadd.f32 %v3717_v4, %v3669_v12  ;;  %v3627_v23 = vadd.f32 %v8942_v11, %v8888_v5  ;;  %v6270_v12 = vld [vmem:[#allocation6 + $0x98] sm:$0xf] }
 0x49e   : > { %v3585_v47 = vpop.f32.mrf.mxu2  ;;  %v6271_v48 = vor.u32 %v6816_v10, %v6270_v12  ;;  %v6813_v12 = vld [vmem:[#allocation6 + $0x88] sm:$0xf0] }
 0x49f   : > { %4472 = vmatmul.bf16.gmra.mxu1 %v8783_v54  ;;  %v3586_v17 = vadd.f32 %v3585_v47, %v8864_v9  ;;  %v3762_v57 = vmax.f32 %v3718_v31, 0.0  ;;  %v6462_v9 = vld [vmem:[#allocation6 + $0x218] sm:$0xf]  ;;  %v3674_v31 = vadd.f32 %v8936_v51, %v3625_v39  ;;  %v3676_v59 = vadd.f32 %v3675_v61, %v3627_v23  ;;  %v6354_v51 = vld [vmem:[#allocation6 + $0x140] sm:$0xf] }
 0x4a0   : > { %4553 = vmatpush.bf16.msrb.mxu3 %v6399_v53  ;;  %v6463_v47 = vor.u32 %v6864_v49, %v6462_v9  ;;  %4597 = vmatpush.bf16.msrb.mxu0 %v6271_v48  ;;  %v6342_v53 = vld [vmem:[#allocation6 + $0x128] sm:$0xf]  ;;  %v6330_v39 = vld [vmem:[#allocation6 + $0x110] sm:$0xf]  ;;  %v6258_v23 = vld [vmem:[#allocation6 + $0x80] sm:$0xf] }
 0x4a1   : > { %4384 = vmatmul.bf16.gmra.mxu3 %v8940_v24  ;;  %v3779_v4 = vmax.f32 %v3586_v17, 0.0  ;;  %v3678_v41 = vpop.f32.mrf.mxu0  ;;  %v6259_v48 = vor.u32 %v6813_v12, %v6258_v23  ;;  %v6222_v23 = vld [vmem:[#allocation6 + $0x38] sm:$0xf]  ;;  %v6804_v12 = vld [vmem:[#allocation6 + $0x40] sm:$0xf0] }
 0x4a2   : > { %4695 = vmatpush.bf16.msra.mxu2 %v6463_v47 }
 0x4a4   : > { %v8952_v18 = vpop.f32.mrf.mxu3  ;;  %v3719_v37 = vpop.f32.mrf.mxu1  ;;  %4554 = vmatpush.bf16.msrb.mxu3 %v6387_v14  ;;  %v6831_v14 = vld [vmem:[#allocation6 + $0x118] sm:$0xf0]  ;;  %4598 = vmatpush.bf16.msrb.mxu0 %v6259_v48 }
 0x4a5   : > { %v3720_v50 = vadd.f32 %v3719_v37, %v3671_v62  ;;  %v3495_v62 = vadd.f32 %v8847_v44, %v8723_v60  ;;  %v3630_v6 = vadd.f32 %v8952_v18, %v8888_v5  ;;  %v6331_v10 = vor.u32 %v6831_v14, %v6330_v39  ;;  %v6318_v18 = vld [vmem:[#allocation6 + $0xf8] sm:$0xf] }
 0x4a6   : > { %v3587_v22 = vpop.f32.mrf.mxu2 }
 0x4a7   : > { %v3765_v21 = vmax.f32 %v3720_v50, 0.0  ;;  %v3588_v25 = vadd.f32 %v3587_v22, %v3539_v34  ;;  %v3544_v34 = vadd.f32 %v8883_v27, %v3495_v62  ;;  %v6837_v22 = vld [vmem:[#allocation6 + $0x148] sm:$0xf0]  ;;  %v6450_v27 = vld [vmem:[#allocation6 + $0x200] sm:$0xf]  ;;  %v3679_v32 = vadd.f32 %v3678_v41, %v3630_v6 }
 0x4a8   : > { %v6355_v28 = vor.u32 %v6837_v22, %v6354_v51 }
 0x4a9   : > { %v3782_v8 = vmax.f32 %v3588_v25, 0.0  ;;  %v8956_v46 = vpack.c.bf16 %v3765_v21, %v3762_v57  ;;  %v3680_v52 = vpop.f32.mrf.mxu0 }
 0x4aa   : > { %4647 = vmatpush.bf16.msrb.mxu1 %v6355_v28  ;;  %v6234_v28 = vld [vmem:[#allocation6 + $0x50] sm:$0xf] }
 0x4ab   : > { %4345 = vmatmul.bf16.gmra.mxu2 %v8868_v55  ;;  %4423 = vmatmul.bf16.gmra.mxu0 %v8956_v46  ;;  %v8960_v13 = vpack.c.bf16 %v3782_v8, %v3779_v4  ;;  %v6834_v4 = vld [vmem:[#allocation6 + $0x130] sm:$0xf0]  ;;  %v6861_v8 = vld [vmem:[#allocation6 + $0x208] sm:$0xf0] }
 0x4ac   : > { %v3631_v38 = vpop.f32.mrf.mxu3  ;;  %v3722_v36 = vpop.f32.mrf.mxu1  ;;  %v6343_v9 = vor.u32 %v6834_v4, %v6342_v53  ;;  %v6451_v47 = vor.u32 %v6861_v8, %v6450_v27  ;;  %v6858_v53 = vld [vmem:[#allocation6 + $0x1f0] sm:$0xf0]  ;;  %v8999_v8 = vld [vmem:[%s9367_s10] sm:$0x7] }
 0x4ad   : > { %v3723_v37 = vadd.f32 %v3722_v36, %v3674_v31  ;;  %v6822_v27 = vld [vmem:[#allocation6 + $0xd0] sm:$0xf0]  ;;  %v9006_v48 = vperm.slane %v8999_v8, 0 }
 0x4ae   : > { %v3590_v19 = vpop.f32.mrf.mxu2  ;;  %4648 = vmatpush.bf16.msrb.mxu1 %v6343_v9  ;;  %4696 = vmatpush.bf16.msra.mxu2 %v6451_v47 }
 0x4af   : > { %4477 = vmatmul.bf16.gmra.mxu1 %v8807_v0  ;;  %v3591_v17 = vadd.f32 %v3590_v19, %v8879_v7  ;;  %v3768_v57 = vmax.f32 %v3723_v37, 0.0  ;;  %v3632_v19 = vadd.f32 %v3631_v38, %v8888_v5  ;;  %v6319_v37 = vor.u32 %v6828_v30, %v6318_v18  ;;  %v6801_v30 = vld [vmem:[#allocation6 + $0x28] sm:$0xf0] }
 0x4b1   : > { %4389 = vmatmul.bf16.gmra.mxu3 %v8960_v13  ;;  %v3785_v60 = vmax.f32 %v3591_v17, 0.0  ;;  %v3683_v31 = vpop.f32.mrf.mxu0  ;;  %v3681_v62 = vadd.f32 %v3680_v52, %v3632_v19  ;;  %v6246_v17 = vld [vmem:[#allocation6 + $0x68] sm:$0xf]  ;;  %v6807_v52 = vld [vmem:[#allocation6 + $0x58] sm:$0xf0] }
 0x4b2   : > { %4649 = vmatpush.bf16.msrb.mxu1 %v6331_v10  ;;  %v6235_v4 = vor.u32 %v6807_v52, %v6234_v28  ;;  %v6426_v52 = vld [vmem:[#allocation6 + $0x1d0] sm:$0xf] }
 0x4b4   : > { %v8971_v11 = vpop.f32.mrf.mxu3  ;;  %v3724_v29 = vpop.f32.mrf.mxu1 }
 0x4b5   : > { %v3725_v50 = vadd.f32 %v3724_v29, %v3676_v59  ;;  %v3635_v39 = vadd.f32 %v8971_v11, %v8888_v5  ;;  %v6210_v11 = vld [vmem:[#allocation6 + $0x20] sm:$0xf] }
 0x4b6   : > { %v3592_v40 = vpop.f32.mrf.mxu2  ;;  %4650 = vmatpush.bf16.msrb.mxu1 %v6319_v37 }
 0x4b7   : > { %v3771_v21 = vmax.f32 %v3725_v50, 0.0  ;;  %v3593_v25 = vadd.f32 %v3592_v40, %v3544_v34  ;;  %v6810_v50 = vld [vmem:[#allocation6 + $0x70] sm:$0xf0]  ;;  %v6306_v40 = vld [vmem:[#allocation6 + $0xe0] sm:$0xf]  ;;  %v3684_v18 = vadd.f32 %v3683_v31, %v3635_v39 }
 0x4b8   : > { %v6247_v22 = vor.u32 %v6810_v50, %v6246_v17  ;;  %v6798_v31 = vld [vmem:[#allocation6 + $0x10] sm:$0xf0] }
 0x4b9   : > { %v3788_v44 = vmax.f32 %v3593_v25, 0.0  ;;  %v8975_v61 = vpack.c.bf16 %v3771_v21, %v3768_v57  ;;  %v6825_v57 = vld [vmem:[#allocation6 + $0xe8] sm:$0xf0]  ;;  %v3685_v14 = vpop.f32.mrf.mxu0 }
 0x4ba   : > { %v6307_v21 = vor.u32 %v6825_v57, %v6306_v40  ;;  %4599 = vmatpush.bf16.msrb.mxu0 %v6247_v22 }
 0x4bb   : > { %4428 = vmatmul.bf16.gmra.mxu0 %v8975_v61  ;;  %4506 = vmatmul.bf16.vlgmr.msrb.gmra.mxu2 %v8860_v45  ;;  %v8979_v7 = vpack.c.bf16 %v3788_v44, %v3785_v60  ;;  %v6294_v60 = vld [vmem:[#allocation6 + $0xc8] sm:$0xf] }
 0x4bc   : > { %v8981_v49 = vpop.f32.mrf.mxu3  ;;  %v3727_v36 = vpop.f32.mrf.mxu1  ;;  %4651 = vmatpush.bf16.msrb.mxu1 %v6307_v21  ;;  %v6438_v44 = vld [vmem:[#allocation6 + $0x1e8] sm:$0xf]  ;;  %v6295_v6 = vor.u32 %v6822_v27, %v6294_v60  ;;  %v6855_v60 = vld [vmem:[#allocation6 + $0x1d8] sm:$0xf0] }
 0x4bd   : > { %v3728_v35 = vadd.f32 %v3727_v36, %v3679_v32  ;;  %v6439_v47 = vor.u32 %v6858_v53, %v6438_v44  ;;  %v3637_v10 = vadd.f32 %v8981_v49, %v8888_v5  ;;  %v6223_v32 = vor.u32 %v6804_v12, %v6222_v23 }
 0x4be   : > { %v8985_v63 = vpop.f32.mrf.mxu2  ;;  %4600 = vmatpush.bf16.msrb.mxu0 %v6235_v4  ;;  %v6427_v4 = vor.u32 %v6855_v60, %v6426_v52 }
 0x4bf   : > { %4482 = vmatmul.bf16.gmra.mxu1 %v8830_v20  ;;  %v3774_v41 = vmax.f32 %v3728_v35, 0.0  ;;  %4697 = vmatpush.bf16.msra.mxu2 %v6439_v47  ;;  %v4312_v35 = vadd.f32 %v8985_v63, %v9006_v48  ;;  %v3686_v37 = vadd.f32 %v3685_v14, %v3637_v10 }
 0x4c0   : > { %4652 = vmatpush.bf16.msrb.mxu1 %v6295_v6 }
 0x4c1   : > { %4394 = vmatmul.bf16.gmra.mxu3 %v8979_v7  ;;  %v3688_v21 = vpop.f32.mrf.mxu0 }
 0x4c2   : > { %4601 = vmatpush.bf16.msrb.mxu0 %v6223_v32 }
 0x4c3   : > { %4698 = vmatpush.bf16.msra.mxu2 %v6427_v4 }
 0x4c4   : > { %v8990_v59 = vpop.f32.mrf.mxu3  ;;  %v3729_v38 = vpop.f32.mrf.mxu1 }
 0x4c5   : > { %v3730_v29 = vadd.f32 %v3729_v38, %v3681_v62  ;;  %v6211_v38 = vor.u32 %v6801_v30, %v6210_v11  ;;  %v3640_v27 = vadd.f32 %v8990_v59, %v8888_v5 }
 0x4c6   : > { %v4313_v34 = vpop.f32.mrf.mxu2 }
 0x4c7   : > { %v3777_v51 = vmax.f32 %v3730_v29, 0.0  ;;  %4602 = vmatpush.bf16.msrb.mxu0 %v6211_v38  ;;  %v4314_v63 = vadd.f32 %v4313_v34, %v9006_v48  ;;  %v3689_v34 = vadd.f32 %v3688_v21, %v3640_v27  ;;  %v6849_v21 = vld [vmem:[#allocation6 + $0x1a8] sm:$0xf0] }
 0x4c9   : > { %v8992_v25 = vpack.c.bf16 %v3777_v51, %v3774_v41  ;;  %v6198_v41 = vld [vmem:[#allocation6 + $0x8] sm:$0xf]  ;;  %v3690_v39 = vpop.f32.mrf.mxu0 }
 0x4ca   : > { %v6199_v57 = vor.u32 %v6798_v31, %v6198_v41 }
 0x4cb   : > { %4433 = vmatmul.bf16.gmra.mxu0 %v8992_v25  ;;  %4511 = vmatmul.bf16.gmra.mxu2 %v8877_v42 }
 0x4cc   : > { %v3641_v9 = vpop.f32.mrf.mxu3  ;;  %v3732_v36 = vpop.f32.mrf.mxu1  ;;  %4603 = vmatpush.bf16.msrb.mxu0 %v6199_v57  ;;  %v6402_v57 = vld [vmem:[#allocation6 + $0x1a0] sm:$0xf] }
 0x4cd   : > { %v3733_v62 = vadd.f32 %v3732_v36, %v3684_v18  ;;  %v3642_v6 = vadd.f32 %v3641_v9, %v8888_v5  ;;  %v6414_v9 = vld [vmem:[#allocation6 + $0x1b8] sm:$0xf]  ;;  %v6403_v52 = vor.u32 %v6849_v21, %v6402_v57 }
 0x4ce   : > { %v4316_v19 = vpop.f32.mrf.mxu2 }
 0x4cf   : > { %4487 = vmatmul.bf16.gmra.mxu1 %v8850_v16  ;;  %v3780_v51 = vmax.f32 %v3733_v62, 0.0  ;;  %v4317_v14 = vadd.f32 %v4316_v19, %v9006_v48  ;;  %v3691_v12 = vadd.f32 %v3690_v39, %v3642_v6 }
 0x4d1   : > { %4555 = vmatmul.bf16.vlgmr.msrb.gmra.mxu3 %v8900_v43 }
 0x4d4   : > { %v3734_v29 = vpop.f32.mrf.mxu1  ;;  %v4360_v49 = vpop.f32.mrf.mxu3 }
 0x4d5   : > { %v3735_v17 = vadd.f32 %v3734_v29, %v3686_v37  ;;  %v9012_v50 = vadd.f32 %v4360_v49, %v4312_v35  ;;  %v6852_v37 = vld [vmem:[#allocation6 + $0x1c0] sm:$0xf0] }
 0x4d6   : > { %v4318_v40 = vpop.f32.mrf.mxu2  ;;  %v6415_v38 = vor.u32 %v6852_v37, %v6414_v9  ;;  %v6875_v37 = vld [vmem:[%s9368_s11 + $0x38] sm:$0xff] }
 0x4d7   : > { %v3783_v22 = vmax.f32 %v3735_v17, 0.0  ;;  %v4319_v5 = vadd.f32 %v4318_v40, %v9006_v48  ;;  %5011 = vmatpush.bf16.msra.mxu3 %v6875_v37 }
 0x4d8   : > { %4699 = vmatpush.bf16.msra.mxu2 %v6415_v38 }
 0x4d9   : > { %v9014_v28 = vpack.c.bf16 %v3783_v22, %v3780_v51 }
 0x4db   : > { %4438 = vmatmul.bf16.gmra.mxu0 %v9014_v28  ;;  %4516 = vmatmul.bf16.gmra.mxu2 %v8891_v26 }
 0x4dc   : > { %v3737_v44 = vpop.f32.mrf.mxu1  ;;  %v4362_v53 = vpop.f32.mrf.mxu3  ;;  %4700 = vmatpush.bf16.msra.mxu2 %v6403_v52  ;;  %v6872_v52 = vld [vmem:[%s9368_s11 + $0x20] sm:$0xff] }
 0x4dd   : > { %v4363_v36 = vadd.f32 %v4362_v53, %v4314_v63  ;;  %v3738_v23 = vadd.f32 %v3737_v44, %v3689_v34 }
 0x4de   : > { %v4321_v47 = vpop.f32.mrf.mxu2 }
 0x4df   : > { %4492 = vmatmul.bf16.gmra.mxu1 %v8868_v55  ;;  %v3786_v30 = vmax.f32 %v3738_v23, 0.0  ;;  %v4322_v17 = vadd.f32 %v4321_v47, %v9006_v48 }
 0x4e1   : > { %4560 = vmatmul.bf16.gmra.mxu3 %v8918_v15 }
 0x4e4   : > { %v3739_v10 = vpop.f32.mrf.mxu1  ;;  %v4365_v32 = vpop.f32.mrf.mxu3 }
 0x4e5   : > { %v3740_v18 = vadd.f32 %v3739_v10, %v3691_v12  ;;  %v4366_v11 = vadd.f32 %v4365_v32, %v4317_v14 }
 0x4e6   : > { %v4323_v59 = vpop.f32.mrf.mxu2 }
 0x4e7   : > { %v3789_v35 = vmax.f32 %v3740_v18, 0.0  ;;  %v4324_v22 = vadd.f32 %v4323_v59, %v9006_v48 }
 0x4e9   : > { %v9025_v62 = vpack.c.bf16 %v3789_v35, %v3786_v30 }
 0x4eb   : > { %4443 = vmatmul.bf16.gmra.mxu0 %v9025_v62  ;;  %4521 = vmatmul.bf16.gmra.mxu2 %v8904_v58 }
 0x4ec   : > { %v4367_v19 = vpop.f32.mrf.mxu3  ;;  %v9038_v60 = vpop.f32.mrf.mxu1 }
 0x4ed   : > { %v4368_v29 = vadd.f32 %v4367_v19, %v4319_v5 }
 0x4ee   : > { %v4326_v49 = vpop.f32.mrf.mxu2 }
 0x4ef   : > { %4653 = vmatmul.bf16.vlgmr.msrb.gmra.mxu1 %v8860_v45  ;;  %v4327_v47 = vadd.f32 %v4326_v49, %v9006_v48 }
 0x4f1   : > { %4565 = vmatmul.bf16.gmra.mxu3 %v8934_v33 }
 0x4f4   : > { %v4370_v41 = vpop.f32.mrf.mxu3  ;;  %v9048_v12 = vpop.f32.mrf.mxu1 }
 0x4f5   : > { %v9033_v31 = vadd.f32 %v4370_v41, %v4322_v17 }
 0x4f6   : > { %v4328_v40 = vpop.f32.mrf.mxu2 }
 0x4f8   : > { %v4409_v51 = vpop.f32.mrf.mxu0 }
 0x4f9   : > { %v4410_v53 = vadd.f32 %v4409_v51, %v9012_v50  ;;  %v4329_v50 = vadd.f32 %v4328_v40, %v9006_v48  ;;  %v6873_v51 = vld [vmem:[%s9368_s11 + $0x28] sm:$0xff] }
 0x4fb   : > { %4526 = vmatmul.bf16.gmra.mxu2 %v8922_v3  ;;  %4604 = vmatmul.bf16.vlgmr.msrb.gmra.mxu0 %v8715_v56  ;;  %v4743_v56 = vmax.f32 %v4410_v53, 0.0 }
 0x4fc   : > { %v4372_v63 = vpop.f32.mrf.mxu3 }
 0x4fd   : > { %v4373_v45 = vadd.f32 %v4372_v63, %v4324_v22 }
 0x4fe   : > { %v4331_v44 = vpop.f32.mrf.mxu2 }
 0x4ff   : > { %4658 = vmatmul.bf16.gmra.mxu1 %v8877_v42  ;;  %v6390_v42 = vld [vmem:[#allocation6 + $0x188] sm:$0xf]  ;;  %v4332_v19 = vadd.f32 %v4331_v44, %v9006_v48 }
 0x500   : > { %v4411_v4 = vpop.f32.mrf.mxu0 }
 0x501   : > { %v4412_v27 = vadd.f32 %v4411_v4, %v4363_v36  ;;  %4570 = vmatmul.bf16.gmra.mxu3 %v8956_v46  ;;  %v6846_v36 = vld [vmem:[#allocation6 + $0x190] sm:$0xf0] }
 0x502   : > { %v6391_v18 = vor.u32 %v6846_v36, %v6390_v42  ;;  %v6869_v42 = vld [vmem:[%s9368_s11 + $0x8] sm:$0xff] }
 0x503   : > { %v4746_v6 = vmax.f32 %v4412_v27, 0.0 }
 0x504   : > { %v4375_v34 = vpop.f32.mrf.mxu3  ;;  %4701 = vmatpush.bf16.msra.mxu2 %v6391_v18 }
 0x505   : > { %v9044_v39 = vpack.c.bf16 %v4746_v6, %v4743_v56  ;;  %v9046_v14 = vadd.f32 %v4375_v34, %v4327_v47 }
 0x506   : > { %v4333_v23 = vpop.f32.mrf.mxu2 }
 0x507   : > { %v4334_v22 = vadd.f32 %v4333_v23, %v9006_v48 }
 0x508   : > { %v4414_v10 = vpop.f32.mrf.mxu0 }
 0x509   : > { %v4415_v35 = vadd.f32 %v4414_v10, %v4366_v11 }
 0x50b   : > { %4531 = vmatmul.bf16.gmra.mxu2 %v8940_v24  ;;  %4609 = vmatmul.bf16.gmra.mxu0 %v8739_v1  ;;  %v9060_v1 = vpop.f32.mrf.mxu1  ;;  %v4749_v38 = vmax.f32 %v4415_v35, 0.0  ;;  %v6891_v35 = vld [vmem:[%s9368_s11 + $0xb8] sm:$0xff] }
 0x50c   : > { %v4377_v32 = vpop.f32.mrf.mxu3  ;;  %5109 = vmatpush.bf16.msra.mxu1 %v6891_v35 }
 0x50d   : > { %v9053_v59 = vadd.f32 %v4377_v32, %v4329_v50  ;;  %v6883_v32 = vld [vmem:[%s9368_s11 + $0x78] sm:$0xff] }
 0x50e   : > { %v4336_v30 = vpop.f32.mrf.mxu2  ;;  %5060 = vmatpush.bf16.msra.mxu0 %v6883_v32 }
 0x50f   : > { %4663 = vmatmul.bf16.gmra.mxu1 %v8891_v26  ;;  %v6874_v26 = vld [vmem:[%s9368_s11 + $0x30] sm:$0xff]  ;;  %v4337_v47 = vadd.f32 %v4336_v30, %v9006_v48 }
 0x510   : > { %v4416_v5 = vpop.f32.mrf.mxu0  ;;  %5012 = vmatpush.bf16.msra.mxu3 %v6874_v26 }
 0x511   : > { %v4417_v9 = vadd.f32 %v4416_v5, %v4368_v29  ;;  %4575 = vmatmul.bf16.gmra.mxu3 %v8975_v61  ;;  %v6868_v5 = vld [vmem:[%s9368_s11] sm:$0xff] }
 0x513   : > { %v4752_v49 = vmax.f32 %v4417_v9, 0.0  ;;  %v9076_v57 = vpop.f32.mrf.mxu1 }
 0x514   : > { %v4380_v17 = vpop.f32.mrf.mxu3  ;;  %5013 = vmatpush.bf16.msra.mxu3 %v6873_v51 }
 0x515   : > { %v9063_v41 = vadd.f32 %v4380_v17, %v4332_v19  ;;  %v9068_v11 = vpack.c.bf16 %v4752_v49, %v4749_v38 }
 0x516   : > { %v4338_v29 = vpop.f32.mrf.mxu2 }
 0x517   : > { %v4339_v36 = vadd.f32 %v4338_v29, %v9006_v48 }
 0x518   : > { %v4419_v40 = vpop.f32.mrf.mxu0  ;;  %5014 = vmatpush.bf16.msra.mxu3 %v6872_v52 }
 0x519   : > { %v4420_v53 = vadd.f32 %v4419_v40, %v9033_v31 }
 0x51b   : > { %4536 = vmatmul.bf16.gmra.mxu2 %v8960_v13  ;;  %4614 = vmatmul.bf16.gmra.mxu0 %v8759_v2  ;;  %v6871_v2 = vld [vmem:[%s9368_s11 + $0x18] sm:$0xff]  ;;  %v4755_v56 = vmax.f32 %v4420_v53, 0.0 }
 0x51c   : > { %v4382_v21 = vpop.f32.mrf.mxu3  ;;  %5015 = vmatpush.bf16.msra.mxu3 %v6871_v2 }
 0x51d   : > { %v4383_v63 = vadd.f32 %v4382_v21, %v4334_v22 }
 0x51e   : > { %v4341_v44 = vpop.f32.mrf.mxu2 }
 0x51f   : > { %4668 = vmatmul.bf16.gmra.mxu1 %v8904_v58  ;;  %v6870_v58 = vld [vmem:[%s9368_s11 + $0x10] sm:$0xff]  ;;  %v4342_v49 = vadd.f32 %v4341_v44, %v9006_v48 }
 0x520   : > { %v4421_v4 = vpop.f32.mrf.mxu0  ;;  %5016 = vmatpush.bf16.msra.mxu3 %v6870_v58 }
 0x521   : > { %v4422_v27 = vadd.f32 %v4421_v4, %v4373_v45  ;;  %4580 = vmatmul.bf16.gmra.mxu3 %v8992_v25  ;;  %v9095_v45 = vpop.f32.mrf.mxu1 }
 0x523   : > { %v4758_v6 = vmax.f32 %v4422_v27, 0.0 }
 0x524   : > { %v4385_v34 = vpop.f32.mrf.mxu3  ;;  %5017 = vmatpush.bf16.msra.mxu3 %v6869_v42 }
 0x525   : > { %v9088_v23 = vadd.f32 %v4385_v34, %v4337_v47  ;;  %v9093_v31 = vpack.c.bf16 %v4758_v6, %v4755_v56  ;;  %v6881_v6 = vld [vmem:[%s9368_s11 + $0x68] sm:$0xff] }
 0x526   : > { %v4343_v10 = vpop.f32.mrf.mxu2 }
 0x527   : > { %v4344_v21 = vadd.f32 %v4343_v10, %v9006_v48  ;;  %v6880_v10 = vld [vmem:[%s9368_s11 + $0x60] sm:$0xff] }
 0x528   : > { %v4424_v50 = vpop.f32.mrf.mxu0  ;;  %5018 = vmatpush.bf16.msra.mxu3 %v6868_v5 }
 0x529   : > { %v9116_v37 = vpop.f32.mrf.mxu1 }
 0x52b   : > { %4541 = vmatmul.bf16.gmra.mxu2 %v8979_v7  ;;  %4619 = vmatmul.bf16.gmra.mxu0 %v8783_v54  ;;  %v4425_v54 = vadd.f32 %v4424_v50, %v9046_v14 }
 0x52c   : > { %v4387_v18 = vpop.f32.mrf.mxu3 }
 0x52d   : > { %v9106_v30 = vadd.f32 %v4387_v18, %v4339_v36  ;;  %v4761_v17 = vmax.f32 %v4425_v54, 0.0  ;;  %v6879_v36 = vld [vmem:[%s9368_s11 + $0x58] sm:$0xff] }
 0x52e   : > { %v4346_v9 = vpop.f32.mrf.mxu2 }
 0x52f   : > { %4673 = vmatmul.bf16.gmra.mxu1 %v8922_v3 }
 0x530   : > { %v4426_v19 = vpop.f32.mrf.mxu0 }
 0x531   : > { %v4427_v38 = vadd.f32 %v4426_v19, %v9053_v59  ;;  %4585 = vmatmul.bf16.gmra.mxu3 %v9014_v28  ;;  %v9125_v22 = vpop.f32.mrf.mxu1  ;;  %v6882_v59 = vld [vmem:[%s9368_s11 + $0x70] sm:$0xff]  ;;  %v9175_v19 = vperm.slane %v8999_v8, 1 }
 0x532   : > { %5061 = vmatpush.bf16.msra.mxu0 %v6882_v59 }
 0x533   : > { %v4764_v26 = vmax.f32 %v4427_v38, 0.0  ;;  %v6877_v38 = vld [vmem:[%s9368_s11 + $0x48] sm:$0xff] }
 0x534   : > { %v4390_v29 = vpop.f32.mrf.mxu3 }
 0x535   : > { %v9121_v40 = vadd.f32 %v4390_v29, %v4342_v49  ;;  %v9123_v51 = vpack.c.bf16 %v4764_v26, %v4761_v17 }
 0x536   : > { %v4348_v14 = vpop.f32.mrf.mxu2  ;;  %5062 = vmatpush.bf16.msra.mxu0 %v6881_v6 }
 0x537   : > { %v4349_v42 = vadd.f32 %v4348_v14, %v9006_v48 }
 0x538   : > { %v4429_v3 = vpop.f32.mrf.mxu0 }
 0x539   : > { %v4430_v4 = vadd.f32 %v4429_v3, %v9063_v41  ;;  %v9145_v41 = vpop.f32.mrf.mxu1  ;;  %v4461_v3 = vadd.f32 %v9048_v12, %v9175_v19  ;;  %v6888_v12 = vld [vmem:[%s9368_s11 + $0xa0] sm:$0xff] }
 0x53a   : > { %5063 = vmatpush.bf16.msra.mxu0 %v6880_v10 }
 0x53b   : > { %4624 = vmatmul.bf16.gmra.mxu0 %v8807_v0  ;;  %4702 = vmatmul.bf16.vlgmr.msra.gmra.mxu2 %v8900_v43  ;;  %v6890_v0 = vld [vmem:[%s9368_s11 + $0xb0] sm:$0xff]  ;;  %v4347_v43 = vadd.f32 %v4346_v9, %v9006_v48  ;;  %v4767_v47 = vmax.f32 %v4430_v4, 0.0 }
 0x53c   : > { %v4392_v52 = vpop.f32.mrf.mxu3  ;;  %5110 = vmatpush.bf16.msra.mxu1 %v6890_v0 }
 0x53d   : > { %v9133_v44 = vadd.f32 %v4392_v52, %v4344_v21 }
 0x53e   : > { %v4507_v53 = vpop.f32.mrf.mxu2  ;;  %5064 = vmatpush.bf16.msra.mxu0 %v6879_v36 }
 0x53f   : > { %4678 = vmatmul.bf16.gmra.mxu1 %v8940_v24 }
 0x540   : > { %v4431_v27 = vpop.f32.mrf.mxu0 }
 0x541   : > { %v4432_v2 = vadd.f32 %v4431_v27, %v4383_v63  ;;  %4590 = vmatmul.bf16.gmra.mxu3 %v9025_v62  ;;  %v9162_v35 = vpop.f32.mrf.mxu1 }
 0x543   : > { %v4770_v56 = vmax.f32 %v4432_v2, 0.0 }
 0x544   : > { %v4395_v24 = vpop.f32.mrf.mxu3 }
 0x545   : > { %v9147_v34 = vadd.f32 %v4395_v24, %v4347_v43  ;;  %v9149_v63 = vpack.c.bf16 %v4770_v56, %v4767_v47 }
 0x546   : > { %v4509_v58 = vpop.f32.mrf.mxu2 }
 0x547   : > { %v4510_v59 = vadd.f32 %v4509_v58, %v4461_v3 }
 0x548   : > { %v4434_v50 = vpop.f32.mrf.mxu0 }
 0x549   : > { %v4435_v9 = vadd.f32 %v4434_v50, %v9088_v23  ;;  %v9187_v29 = vpop.f32.mrf.mxu1  ;;  %v4466_v50 = vadd.f32 %v9076_v57, %v9175_v19  ;;  %v6887_v57 = vld [vmem:[%s9368_s11 + $0x98] sm:$0xff] }
 0x54b   : > { %4629 = vmatmul.bf16.gmra.mxu0 %v8830_v20  ;;  %4707 = vmatmul.bf16.gmra.mxu2 %v8918_v15  ;;  %v6889_v20 = vld [vmem:[%s9368_s11 + $0xa8] sm:$0xff]  ;;  %v6878_v15 = vld [vmem:[%s9368_s11 + $0x50] sm:$0xff]  ;;  %v4773_v23 = vmax.f32 %v4435_v9, 0.0 }
 0x54c   : > { %v4397_v32 = vpop.f32.mrf.mxu3  ;;  %5111 = vmatpush.bf16.msra.mxu1 %v6889_v20  ;;  %5065 = vmatpush.bf16.msra.mxu0 %v6878_v15 }
 0x54d   : > { %v9160_v18 = vadd.f32 %v4397_v32, %v4349_v42 }
 0x54e   : > { %v4512_v5 = vpop.f32.mrf.mxu2 }
 0x54f   : > { %4683 = vmatmul.bf16.gmra.mxu1 %v8960_v13 }
 0x550   : > { %v4436_v48 = vpop.f32.mrf.mxu0  ;;  %5066 = vmatpush.bf16.msra.mxu0 %v6877_v38  ;;  %5112 = vmatpush.bf16.msra.mxu1 %v6888_v12 }
 0x551   : > { %v4437_v54 = vadd.f32 %v4436_v48, %v9106_v30  ;;  %5019 = vmatmul.bf16.vlgmr.msra.gmra.mxu3 %v9044_v39  ;;  %v4459_v30 = vadd.f32 %v9038_v60, %v9175_v19  ;;  %v6876_v39 = vld [vmem:[%s9368_s11 + $0x40] sm:$0xff] }
 0x553   : > { %v4776_v13 = vmax.f32 %v4437_v54, 0.0  ;;  %v4508_v21 = vadd.f32 %v4507_v53, %v4459_v30  ;;  %v4471_v30 = vadd.f32 %v9116_v37, %v9175_v19 }
 0x554   : > { %v4556_v49 = vpop.f32.mrf.mxu3  ;;  %5067 = vmatpush.bf16.msra.mxu0 %v6876_v39  ;;  %5113 = vmatpush.bf16.msra.mxu1 %v6887_v57 }
 0x555   : > { %v9180_v17 = vpack.c.bf16 %v4776_v13, %v4773_v23  ;;  %v4557_v52 = vadd.f32 %v4556_v49, %v4508_v21 }
 0x556   : > { %v4514_v26 = vpop.f32.mrf.mxu2 }
 0x557   : > { %v4744_v2 = vmax.f32 %v4557_v52, 0.0 }
 0x558   : > { %v4439_v14 = vpop.f32.mrf.mxu0 }
 0x559   : > { %v4440_v0 = vadd.f32 %v4439_v14, %v9121_v40 }
 0x55b   : > { %4634 = vmatmul.bf16.gmra.mxu0 %v8850_v16  ;;  %4712 = vmatmul.bf16.gmra.mxu2 %v8934_v33  ;;  %v9200_v16 = vpop.f32.mrf.mxu1  ;;  %v4779_v33 = vmax.f32 %v4440_v0, 0.0  ;;  %v4476_v0 = vadd.f32 %v9145_v41, %v9175_v19  ;;  %v6885_v41 = vld [vmem:[%s9368_s11 + $0x88] sm:$0xff] }
 0x55c   : > { %v4558_v4 = vpop.f32.mrf.mxu3 }
 0x55d   : > { %v4559_v60 = vadd.f32 %v4558_v4, %v4510_v59 }
 0x55e   : > { %v4517_v27 = vpop.f32.mrf.mxu2 }
 0x55f   : > { %v4747_v43 = vmax.f32 %v4559_v60, 0.0  ;;  %4688 = vmatmul.bf16.gmra.mxu1 %v8979_v7  ;;  %v4464_v7 = vadd.f32 %v9060_v1, %v9175_v19 }
 0x560   : > { %v4441_v53 = vpop.f32.mrf.mxu0 }
 0x561   : > { %v4792_v47 = vpack.c.bf16 %v4747_v43, %v4744_v2  ;;  %v4442_v56 = vadd.f32 %v4441_v53, %v9133_v44  ;;  %5024 = vmatmul.bf16.gmra.mxu3 %v9068_v11  ;;  %v4513_v42 = vadd.f32 %v4512_v5, %v4464_v7  ;;  %v4515_v44 = vadd.f32 %v4514_v26, %v4466_v50 }
 0x562   : > { %v4469_v26 = vadd.f32 %v9095_v45, %v9175_v19  ;;  %v6886_v45 = vld [vmem:[%s9368_s11 + $0x90] sm:$0xff] }
 0x563   : > { %v4782_v6 = vmax.f32 %v4442_v56, 0.0  ;;  %v9210_v11 = vpop.f32.mrf.mxu1  ;;  %5114 = vmatpush.bf16.msra.mxu1 %v6886_v45 }
 0x564   : > { %v4561_v24 = vpop.f32.mrf.mxu3  ;;  %v4518_v39 = vadd.f32 %v4517_v27, %v4469_v26 }
 0x565   : > { %v9202_v40 = vpack.c.bf16 %v4782_v6, %v4779_v33  ;;  %v4562_v36 = vadd.f32 %v4561_v24, %v4513_v42 }
 0x566   : > { %v4519_v58 = vpop.f32.mrf.mxu2 }
 0x567   : > { %v4750_v15 = vmax.f32 %v4562_v36, 0.0  ;;  %5115 = vmatpush.bf16.msra.mxu1 %v6885_v41 }
 0x568   : > { %v4444_v10 = vpop.f32.mrf.mxu0 }
 0x569   : > { %v4445_v48 = vadd.f32 %v4444_v10, %v9147_v34 }
 0x56b   : > { %4639 = vmatmul.bf16.gmra.mxu0 %v8868_v55  ;;  %4717 = vmatmul.bf16.gmra.mxu2 %v8956_v46  ;;  %v4785_v46 = vmax.f32 %v4445_v48, 0.0  ;;  %v9220_v49 = vpop.f32.mrf.mxu1 }
 0x56c   : > { %v4563_v32 = vpop.f32.mrf.mxu3 }
 0x56d   : > { %v4564_v9 = vadd.f32 %v4563_v32, %v4515_v44 }
 0x56e   : > { %v4522_v20 = vpop.f32.mrf.mxu2 }
 0x56f   : > { %v4753_v1 = vmax.f32 %v4564_v9, 0.0 }
 0x570   : > { %v4446_v5 = vpop.f32.mrf.mxu0 }
 0x571   : > { %v4447_v54 = vadd.f32 %v4446_v5, %v9160_v18  ;;  %5029 = vmatmul.bf16.gmra.mxu3 %v9093_v31  ;;  %v4795_v55 = vpack.c.bf16 %v4753_v1, %v4750_v15  ;;  %v4520_v18 = vadd.f32 %v4519_v58, %v4471_v30  ;;  %v4481_v15 = vadd.f32 %v9187_v29, %v9175_v19 }
 0x572   : > { %v9270_v30 = vperm.slane %v8999_v8, 2 }
 0x573   : > { %v4788_v23 = vmax.f32 %v4447_v54, 0.0  ;;  %v9227_v4 = vpop.f32.mrf.mxu1 }
 0x574   : > { %v4566_v13 = vpop.f32.mrf.mxu3 }
 0x575   : > { %v9218_v38 = vpack.c.bf16 %v4788_v23, %v4785_v46  ;;  %v4567_v14 = vadd.f32 %v4566_v13, %v4518_v39  ;;  %v4486_v39 = vadd.f32 %v9210_v11, %v9175_v19 }
 0x576   : > { %v4524_v34 = vpop.f32.mrf.mxu2 }
 0x577   : > { %v4756_v59 = vmax.f32 %v4567_v14, 0.0  ;;  %v4525_v53 = vadd.f32 %v4524_v34, %v4476_v0 }
 0x578   : > { %v4605_v2 = vpop.f32.mrf.mxu0 }
 0x579   : > { %v4606_v14 = vadd.f32 %v4605_v2, %v9270_v30 }
 0x57b   : > { %4722 = vmatmul.bf16.gmra.mxu2 %v8975_v61  ;;  %5068 = vmatmul.bf16.vlgmr.msra.gmra.mxu0 %v4792_v47  ;;  %v4474_v61 = vadd.f32 %v9125_v22, %v9175_v19  ;;  %v9237_v12 = vpop.f32.mrf.mxu1 }
 0x57c   : > { %v4568_v31 = vpop.f32.mrf.mxu3 }
 0x57d   : > { %v4569_v3 = vadd.f32 %v4568_v31, %v4520_v18  ;;  %v4523_v43 = vadd.f32 %v4522_v20, %v4474_v61 }
 0x57e   : > { %v4527_v21 = vpop.f32.mrf.mxu2 }
 0x57f   : > { %v4759_v52 = vmax.f32 %v4569_v3, 0.0 }
 0x580   : > { %v4607_v58 = vpop.f32.mrf.mxu0 }
 0x581   : > { %5034 = vmatmul.bf16.gmra.mxu3 %v9123_v51  ;;  %v4798_v60 = vpack.c.bf16 %v4759_v52, %v4756_v59 }
 0x583   : > { %v9244_v7 = vpop.f32.mrf.mxu1 }
 0x584   : > { %v4571_v37 = vpop.f32.mrf.mxu3 }
 0x585   : > { %v4572_v51 = vadd.f32 %v4571_v37, %v4523_v43 }
 0x586   : > { %v4529_v27 = vpop.f32.mrf.mxu2 }
 0x587   : > { %v4762_v6 = vmax.f32 %v4572_v51, 0.0  ;;  %v4530_v1 = vadd.f32 %v4529_v27, %v4481_v15 }
 0x58b   : > { %4727 = vmatmul.bf16.gmra.mxu2 %v8992_v25  ;;  %5073 = vmatmul.bf16.gmra.mxu0 %v4795_v55  ;;  %v9247_v25 = vpop.f32.mrf.mxu0  ;;  %v4654_v42 = vpop.f32.mrf.mxu1 }
 0x58c   : > { %v4573_v47 = vpop.f32.mrf.mxu3 }
 0x58d   : > { %v4574_v56 = vadd.f32 %v4573_v47, %v4525_v53 }
 0x58e   : > { %v4532_v33 = vpop.f32.mrf.mxu2 }
 0x58f   : > { %v4765_v24 = vmax.f32 %v4574_v56, 0.0 }
 0x591   : > { %5039 = vmatmul.bf16.gmra.mxu3 %v9149_v63  ;;  %v4801_v22 = vpack.c.bf16 %v4765_v24, %v4762_v6  ;;  %v6884_v63 = vld [vmem:[%s9368_s11 + $0x80] sm:$0xff]  ;;  %v4489_v24 = vadd.f32 %v9220_v49, %v9175_v19 }
 0x592   : > { %5116 = vmatpush.bf16.msra.mxu1 %v6884_v63 }
 0x593   : > { %v4612_v32 = vpop.f32.mrf.mxu0  ;;  %v4656_v20 = vpop.f32.mrf.mxu1 }
 0x594   : > { %v4576_v50 = vpop.f32.mrf.mxu3 }
 0x596   : > { %v4534_v10 = vpop.f32.mrf.mxu2 }
 0x597   : > { %v4535_v31 = vadd.f32 %v4534_v10, %v4486_v39  ;;  %v4613_v10 = vadd.f32 %v4612_v32, %v9270_v30 }
 0x59b   : > { %4732 = vmatmul.bf16.gmra.mxu2 %v9014_v28  ;;  %5078 = vmatmul.bf16.gmra.mxu0 %v4798_v60  ;;  %v9262_v57 = vpop.f32.mrf.mxu0  ;;  %v4659_v55 = vpop.f32.mrf.mxu1  ;;  %v4655_v60 = vadd.f32 %v4654_v42, %v4606_v14 }
 0x59c   : > { %v4578_v36 = vpop.f32.mrf.mxu3 }
 0x59d   : > { %v4579_v54 = vadd.f32 %v4578_v36, %v4530_v1 }
 0x59e   : > { %v9249_v44 = vpop.f32.mrf.mxu2 }
 0x5a1   : > { %5044 = vmatmul.bf16.gmra.mxu3 %v9180_v17  ;;  %v4479_v17 = vadd.f32 %v9162_v35, %v9175_v19 }
 0x5a3   : > { %v4528_v5 = vadd.f32 %v4527_v21, %v4479_v17  ;;  %v9267_v26 = vpop.f32.mrf.mxu0  ;;  %v4661_v35 = vpop.f32.mrf.mxu1  ;;  %v4608_v21 = vadd.f32 %v4607_v58, %v9270_v30 }
 0x5a4   : > { %v4581_v28 = vpop.f32.mrf.mxu3  ;;  %v4662_v15 = vadd.f32 %v4661_v35, %v4613_v10  ;;  %v4618_v35 = vadd.f32 %v9267_v26, %v9270_v30 }
 0x5a5   : > { %v4577_v46 = vadd.f32 %v4576_v50, %v4528_v5  ;;  %v4657_v27 = vadd.f32 %v4656_v20, %v4608_v21  ;;  %v4538_v50 = vadd.f32 %v9249_v44, %v4489_v24  ;;  %v4496_v44 = vadd.f32 %v9244_v7, %v9175_v19 }
 0x5a6   : > { %v4539_v9 = vpop.f32.mrf.mxu2 }
 0x5a7   : > { %v4768_v34 = vmax.f32 %v4577_v46, 0.0 }
 0x5ab   : > { %4737 = vmatmul.bf16.gmra.mxu2 %v9025_v62  ;;  %5083 = vmatmul.bf16.gmra.mxu0 %v4801_v22  ;;  %v4771_v62 = vmax.f32 %v4579_v54, 0.0  ;;  %v9279_v45 = vpop.f32.mrf.mxu0  ;;  %v4664_v61 = vpop.f32.mrf.mxu1  ;;  %v4611_v22 = vadd.f32 %v9247_v25, %v9270_v30 }
 0x5ac   : > { %v4583_v23 = vpop.f32.mrf.mxu3 }
 0x5ad   : > { %v4804_v29 = vpack.c.bf16 %v4771_v62, %v4768_v34  ;;  %v4584_v52 = vadd.f32 %v4583_v23, %v4535_v31  ;;  %v4660_v36 = vadd.f32 %v4659_v55, %v4611_v22  ;;  %v4494_v23 = vadd.f32 %v9237_v12, %v9175_v19 }
 0x5ae   : > { %v9258_v48 = vpop.f32.mrf.mxu2  ;;  %v4616_v34 = vadd.f32 %v9262_v57, %v9270_v30 }
 0x5af   : > { %v4777_v37 = vmax.f32 %v4584_v52, 0.0  ;;  %v4543_v39 = vadd.f32 %v9258_v48, %v4494_v23 }
 0x5b0   : > { %v4665_v7 = vadd.f32 %v4664_v61, %v4616_v34 }
 0x5b1   : > { %5049 = vmatmul.bf16.gmra.mxu3 %v9202_v40  ;;  %v4484_v40 = vadd.f32 %v9200_v16, %v9175_v19 }
 0x5b3   : > { %v4533_v59 = vadd.f32 %v4532_v33, %v4484_v40  ;;  %v4622_v33 = vpop.f32.mrf.mxu0  ;;  %v4666_v58 = vpop.f32.mrf.mxu1 }
 0x5b4   : > { %v4586_v3 = vpop.f32.mrf.mxu3 }
 0x5b5   : > { %v4582_v8 = vadd.f32 %v4581_v28, %v4533_v59  ;;  %v4587_v63 = vadd.f32 %v4586_v3, %v4538_v50  ;;  %v4667_v59 = vadd.f32 %v4666_v58, %v4618_v35 }
 0x5b6   : > { %v9265_v13 = vpop.f32.mrf.mxu2 }
 0x5b7   : > { %v4774_v16 = vmax.f32 %v4582_v8, 0.0  ;;  %v4780_v1 = vmax.f32 %v4587_v63, 0.0 }
 0x5b9   : > { %v4807_v2 = vpack.c.bf16 %v4777_v37, %v4774_v16 }
 0x5bb   : > { %5088 = vmatmul.bf16.gmra.mxu0 %v4804_v29  ;;  %v4625_v49 = vpop.f32.mrf.mxu0  ;;  %v4545_v29 = vadd.f32 %v9265_v13, %v4496_v44 }
 0x5bc   : > { %v4588_v47 = vpop.f32.mrf.mxu3  ;;  %v4626_v24 = vadd.f32 %v4625_v49, %v9270_v30 }
 0x5be   : > { %v4703_v18 = vpop.f32.mrf.mxu2 }
 0x5bf   : > { %v4704_v11 = vadd.f32 %v4703_v18, %v4655_v60 }
 0x5c1   : > { %5054 = vmatmul.bf16.gmra.mxu3 %v9218_v38  ;;  %v4745_v53 = vmax.f32 %v4704_v11, 0.0  ;;  %v4491_v38 = vadd.f32 %v9227_v4, %v9175_v19  ;;  %v4621_v11 = vadd.f32 %v9279_v45, %v9270_v30 }
 0x5c3   : > { %v4540_v41 = vadd.f32 %v4539_v9, %v4491_v38  ;;  %v4669_v9 = vpop.f32.mrf.mxu1  ;;  %v4627_v40 = vpop.f32.mrf.mxu0 }
 0x5c4   : > { %v4591_v20 = vpop.f32.mrf.mxu3  ;;  %v4670_v61 = vadd.f32 %v4669_v9, %v4621_v11 }
 0x5c5   : > { %v4589_v42 = vadd.f32 %v4588_v47, %v4540_v41  ;;  %v4592_v14 = vadd.f32 %v4591_v20, %v4543_v39  ;;  %v4628_v41 = vadd.f32 %v4627_v40, %v9270_v30 }
 0x5c6   : > { %v4705_v0 = vpop.f32.mrf.mxu2 }
 0x5c7   : > { %v4706_v43 = vadd.f32 %v4705_v0, %v4657_v27  ;;  %v4783_v4 = vmax.f32 %v4589_v42, 0.0  ;;  %v4786_v19 = vmax.f32 %v4592_v14, 0.0  ;;  %v4623_v27 = vadd.f32 %v4622_v33, %v9270_v30 }
 0x5c9   : > { %v4748_v51 = vmax.f32 %v4706_v43, 0.0  ;;  %v4810_v54 = vpack.c.bf16 %v4783_v4, %v4780_v1 }
 0x5cb   : > { %v4793_v56 = vpack.c.bf16 %v4748_v51, %v4745_v53  ;;  %5093 = vmatmul.bf16.gmra.mxu0 %v4807_v2  ;;  %v4671_v31 = vpop.f32.mrf.mxu1  ;;  %v4630_v37 = vpop.f32.mrf.mxu0 }
 0x5cc   : > { %v4593_v32 = vpop.f32.mrf.mxu3  ;;  %v4672_v16 = vadd.f32 %v4671_v31, %v4623_v27 }
 0x5cd   : > { %5117 = vmatmul.bf16.vlgmr.msra.gmra.mxu1 %v4793_v56  ;;  %v4594_v18 = vadd.f32 %v4593_v32, %v4545_v29 }
 0x5ce   : > { %v4708_v6 = vpop.f32.mrf.mxu2 }
 0x5cf   : > { %v4709_v28 = vadd.f32 %v4708_v6, %v4660_v36  ;;  %v4789_v3 = vmax.f32 %v4594_v18, 0.0 }
 0x5d1   : > { %v4751_v46 = vmax.f32 %v4709_v28, 0.0  ;;  %v4813_v8 = vpack.c.bf16 %v4789_v3, %v4786_v19 }
 0x5d3   : > { %v4674_v26 = vpop.f32.mrf.mxu1  ;;  %v4632_v43 = vpop.f32.mrf.mxu0 }
 0x5d4   : > { %v4675_v58 = vadd.f32 %v4674_v26, %v4626_v24  ;;  %v4633_v1 = vadd.f32 %v4632_v43, %v9270_v30 }
 0x5d6   : > { %v4710_v17 = vpop.f32.mrf.mxu2 }
 0x5d7   : > { %v4711_v5 = vadd.f32 %v4710_v17, %v4662_v15  ;;  %v4631_v17 = vadd.f32 %v4630_v37, %v9270_v30 }
 0x5d9   : > { %v4754_v25 = vmax.f32 %v4711_v5, 0.0 }
 0x5db   : > { %v4796_v62 = vpack.c.bf16 %v4754_v25, %v4751_v46  ;;  %5098 = vmatmul.bf16.gmra.mxu0 %v4810_v54  ;;  %v4676_v51 = vpop.f32.mrf.mxu1  ;;  %v4635_v22 = vpop.f32.mrf.mxu0 }
 0x5dc   : > { %v4677_v10 = vadd.f32 %v4676_v51, %v4628_v41  ;;  %v4636_v29 = vadd.f32 %v4635_v22, %v9270_v30 }
 0x5dd   : > { %5122 = vmatmul.bf16.gmra.mxu1 %v4796_v62 }
 0x5de   : > { %v4713_v55 = vpop.f32.mrf.mxu2 }
 0x5df   : > { %v4714_v21 = vadd.f32 %v4713_v55, %v4665_v7  ;;  %v5020_v7 = vpop.f32.mrf.mxu3 }
 0x5e1   : > { %v4757_v57 = vmax.f32 %v4714_v21, 0.0 }
 0x5e3   : > { %v4679_v45 = vpop.f32.mrf.mxu1  ;;  %v4637_v20 = vpop.f32.mrf.mxu0 }
 0x5e4   : > { %v4680_v5 = vadd.f32 %v4679_v45, %v4631_v17  ;;  %v4638_v39 = vadd.f32 %v4637_v20, %v9270_v30 }
 0x5e6   : > { %v4715_v52 = vpop.f32.mrf.mxu2 }
 0x5e7   : > { %v4716_v12 = vadd.f32 %v4715_v52, %v4667_v59 }
 0x5e9   : > { %v4760_v60 = vmax.f32 %v4716_v12, 0.0 }
 0x5eb   : > { %v4799_v13 = vpack.c.bf16 %v4760_v60, %v4757_v57  ;;  %5103 = vmatmul.bf16.gmra.mxu0 %v4813_v8  ;;  %v4681_v28 = vpop.f32.mrf.mxu1  ;;  %v4640_v49 = vpop.f32.mrf.mxu0 }
 0x5ec   : > { %v4682_v46 = vadd.f32 %v4681_v28, %v4633_v1  ;;  %v4641_v57 = vadd.f32 %v4640_v49, %v9270_v30  ;;  %v5022_v60 = vpop.f32.mrf.mxu3 }
 0x5ed   : > { %5127 = vmatmul.bf16.gmra.mxu1 %v4799_v13 }
 0x5ee   : > { %v4718_v48 = vpop.f32.mrf.mxu2 }
 0x5ef   : > { %v4719_v0 = vadd.f32 %v4718_v48, %v4670_v61 }
 0x5f1   : > { %v4763_v47 = vmax.f32 %v4719_v0, 0.0 }
 0x5f3   : > { %v4684_v25 = vpop.f32.mrf.mxu1  ;;  %v4642_v23 = vpop.f32.mrf.mxu0 }
 0x5f4   : > { %v4685_v18 = vadd.f32 %v4684_v25, %v4636_v29  ;;  %v4643_v13 = vadd.f32 %v4642_v23, %v9270_v30 }
 0x5f6   : > { %v4720_v2 = vpop.f32.mrf.mxu2 }
 0x5f7   : > { %v4721_v53 = vadd.f32 %v4720_v2, %v4672_v16  ;;  %v5025_v2 = vpop.f32.mrf.mxu3 }
 0x5f9   : > { %v4766_v56 = vmax.f32 %v4721_v53, 0.0 }
 0x5fb   : > { %v4802_v38 = vpack.c.bf16 %v4766_v56, %v4763_v47  ;;  %v4686_v35 = vpop.f32.mrf.mxu1  ;;  %v5069_v21 = vpop.f32.mrf.mxu0  ;;  %v9313_v47 = vld [vmem:[%s9369_s12] ss:$0 sm:$0xff] }
 0x5fc   : > { %v4687_v14 = vadd.f32 %v4686_v35, %v4638_v39  ;;  %v5023_v45 = vadd.f32 %v9313_v47, %v5022_v60 }
 0x5fd   : > { %5132 = vmatmul.bf16.gmra.mxu1 %v4802_v38  ;;  %v5021_v38 = vadd.f32 %v9313_v47, %v5020_v7 }
 0x5fe   : > { %v4723_v6 = vpop.f32.mrf.mxu2 }
 0x5ff   : > { %v4724_v33 = vadd.f32 %v4723_v6, %v4675_v58  ;;  %v5027_v30 = vpop.f32.mrf.mxu3  ;;  %v5070_v6 = vadd.f32 %v5069_v21, %v5021_v38 }
 0x601   : > { %v4769_v63 = vmax.f32 %v4724_v33, 0.0 }
 0x603   : > { %v4689_v19 = vpop.f32.mrf.mxu1  ;;  %v5071_v37 = vpop.f32.mrf.mxu0 }
 0x604   : > { %v4690_v26 = vadd.f32 %v4689_v19, %v4641_v57  ;;  %v5072_v33 = vadd.f32 %v5071_v37, %v5023_v45 }
 0x606   : > { %v4725_v50 = vpop.f32.mrf.mxu2 }
 0x607   : > { %v4726_v42 = vadd.f32 %v4725_v50, %v4677_v10  ;;  %v5030_v41 = vpop.f32.mrf.mxu3 }
 0x609   : > { %v4772_v36 = vmax.f32 %v4726_v42, 0.0  ;;  %v5026_v42 = vadd.f32 %v9313_v47, %v5025_v2 }
 0x60b   : > { %v4805_v4 = vpack.c.bf16 %v4772_v36, %v4769_v63  ;;  %v4691_v48 = vpop.f32.mrf.mxu1  ;;  %v5074_v51 = vpop.f32.mrf.mxu0 }
 0x60c   : > { %v4692_v27 = vadd.f32 %v4691_v48, %v4643_v13  ;;  %v5075_v36 = vadd.f32 %v5074_v51, %v5026_v42 }
 0x60d   : > { %5137 = vmatmul.bf16.gmra.mxu1 %v4805_v4 }
 0x60e   : > { %v4728_v15 = vpop.f32.mrf.mxu2 }
 0x60f   : > { %v4729_v54 = vadd.f32 %v4728_v15, %v4680_v5  ;;  %v5032_v63 = vpop.f32.mrf.mxu3  ;;  %v5028_v15 = vadd.f32 %v9313_v47, %v5027_v30 }
 0x611   : > { %v4775_v44 = vmax.f32 %v4729_v54, 0.0 }
 0x613   : > { %v5076_v56 = vpop.f32.mrf.mxu0 }
 0x614   : > { %v5077_v17 = vadd.f32 %v5076_v56, %v5028_v15 }
 0x616   : > { %v4730_v9 = vpop.f32.mrf.mxu2 }
 0x617   : > { %v4731_v62 = vadd.f32 %v4730_v9, %v4682_v46  ;;  %v5035_v1 = vpop.f32.mrf.mxu3  ;;  %v5031_v46 = vadd.f32 %v9313_v47, %v5030_v41 }
 0x618   : > { %v5036_v39 = vadd.f32 %v9313_v47, %v5035_v1 }
 0x619   : > { %v4778_v32 = vmax.f32 %v4731_v62, 0.0 }
 0x61b   : > { %v4808_v55 = vpack.c.bf16 %v4778_v32, %v4775_v44  ;;  %v5079_v58 = vpop.f32.mrf.mxu0 }
 0x61c   : > { %v5080_v25 = vadd.f32 %v5079_v58, %v5031_v46 }
 0x61d   : > { %5142 = vmatmul.bf16.gmra.mxu1 %v4808_v55  ;;  %v5033_v55 = vadd.f32 %v9313_v47, %v5032_v63 }
 0x61e   : > { %v4733_v34 = vpop.f32.mrf.mxu2 }
 0x61f   : > { %v4734_v40 = vadd.f32 %v4733_v34, %v4685_v18  ;;  %v5037_v44 = vpop.f32.mrf.mxu3 }
 0x621   : > { %v4781_v59 = vmax.f32 %v4734_v40, 0.0 }
 0x623   : > { %v5081_v20 = vpop.f32.mrf.mxu0 }
 0x624   : > { %v5082_v23 = vadd.f32 %v5081_v20, %v5033_v55 }
 0x626   : > { %v4735_v31 = vpop.f32.mrf.mxu2 }
 0x627   : > { %v4736_v3 = vadd.f32 %v4735_v31, %v4687_v14  ;;  %v5040_v35 = vpop.f32.mrf.mxu3  ;;  %v5038_v31 = vadd.f32 %v9313_v47, %v5037_v44 }
 0x629   : > { %v4784_v52 = vmax.f32 %v4736_v3, 0.0 }
 0x62b   : > { %v4811_v12 = vpack.c.bf16 %v4784_v52, %v4781_v59  ;;  %v5084_v54 = vpop.f32.mrf.mxu0 }
 0x62c   : > { %v5085_v40 = vadd.f32 %v5084_v54, %v5036_v39 }
 0x62d   : > { %5147 = vmatmul.bf16.gmra.mxu1 %v4811_v12  ;;  %v5041_v12 = vadd.f32 %v9313_v47, %v5040_v35 }
 0x62e   : > { %v4738_v8 = vpop.f32.mrf.mxu2 }
 0x62f   : > { %v4739_v11 = vadd.f32 %v4738_v8, %v4690_v26  ;;  %v5042_v3 = vpop.f32.mrf.mxu3 }
 0x630   : > { %v5043_v26 = vadd.f32 %v9313_v47, %v5042_v3 }
 0x631   : > { %v4787_v16 = vmax.f32 %v4739_v11, 0.0 }
 0x633   : > { %v5086_v32 = vpop.f32.mrf.mxu0 }
 0x634   : > { %v5087_v21 = vadd.f32 %v5086_v32, %v5038_v31 }
 0x636   : > { %v4740_v61 = vpop.f32.mrf.mxu2 }
 0x637   : > { %v4741_v0 = vadd.f32 %v4740_v61, %v4692_v27  ;;  %v5045_v57 = vpop.f32.mrf.mxu3 }
 0x639   : > { %v4790_v43 = vmax.f32 %v4741_v0, 0.0 }
 0x63b   : > { %v4814_v53 = vpack.c.bf16 %v4790_v43, %v4787_v16  ;;  %v5089_v18 = vpop.f32.mrf.mxu0  ;;  %v5046_v16 = vadd.f32 %v9313_v47, %v5045_v57 }
 0x63c   : > { %v5090_v8 = vadd.f32 %v5089_v18, %v5041_v12 }
 0x63d   : > { %5152 = vmatmul.bf16.gmra.mxu1 %v4814_v53 }
 0x63f   : > { %v5047_v61 = vpop.f32.mrf.mxu3 }
 0x640   : > { %v5048_v30 = vadd.f32 %v9313_v47, %v5047_v61 }
 0x643   : > { %v5091_v59 = vpop.f32.mrf.mxu0 }
 0x644   : > { %v5092_v48 = vadd.f32 %v5091_v59, %v5043_v26 }
 0x647   : > { %v5050_v51 = vpop.f32.mrf.mxu3 }
 0x64a   : > { %v5118_v24 = vpop.f32.mrf.mxu1 }
 0x64b   : > { %v5119_v22 = vadd.f32 %v5118_v24, %v5070_v6  ;;  %v5094_v37 = vpop.f32.mrf.mxu0 }
 0x64c   : > { %v5095_v43 = vadd.f32 %v5094_v37, %v5046_v16 }
 0x64d   : > { %5158 = vst [vmem:[%s9321_s26] sm:$0xff] %v5119_v22  ;;  %v5051_v22 = vadd.f32 %v9313_v47, %v5050_v51 }
 0x64f   : > { %v5052_v41 = vpop.f32.mrf.mxu3 }
 0x652   : > { %v5120_v10 = vpop.f32.mrf.mxu1 }
 0x653   : > { %v5121_v50 = vadd.f32 %v5120_v10, %v5072_v33  ;;  %v5096_v0 = vpop.f32.mrf.mxu0 }
 0x654   : > { %v5097_v38 = vadd.f32 %v5096_v0, %v5048_v30 }
 0x655   : > { %5159 = vst [vmem:[%s9321_s26 + $0x8] sm:$0xff] %v5121_v50  ;;  %v5053_v50 = vadd.f32 %v9313_v47, %v5052_v41 }
 0x657   : > { %v5055_v63 = vpop.f32.mrf.mxu3 }
 0x65a   : > { %v5123_v4 = vpop.f32.mrf.mxu1 }
 0x65b   : > { %v5124_v28 = vadd.f32 %v5123_v4, %v5075_v36  ;;  %v5099_v56 = vpop.f32.mrf.mxu0 }
 0x65c   : > { %v5100_v45 = vadd.f32 %v5099_v56, %v5051_v22 }
 0x65d   : > { %5160 = vst [vmem:[%s9321_s26 + $0x10] sm:$0xff] %v5124_v28  ;;  %v5056_v28 = vadd.f32 %v9313_v47, %v5055_v63 }
 0x662   : > { %v5125_v5 = vpop.f32.mrf.mxu1 }
 0x663   : > { %v5126_v49 = vadd.f32 %v5125_v5, %v5077_v17  ;;  %v5101_v58 = vpop.f32.mrf.mxu0  ;;  %v5057_v5 = vpop.f32.mrf.mxu3 }
 0x664   : > { %v5102_v42 = vadd.f32 %v5101_v58, %v5053_v50  ;;  %v5058_v54 = vadd.f32 %v9313_v47, %v5057_v5 }
 0x665   : > { %5161 = vst [vmem:[%s9321_s26 + $0x18] sm:$0xff] %v5126_v49 }
 0x66a   : > { %v5128_v9 = vpop.f32.mrf.mxu1 }
 0x66b   : > { %v5129_v62 = vadd.f32 %v5128_v9, %v5080_v25  ;;  %v5104_v4 = vpop.f32.mrf.mxu0 }
 0x66c   : > { %v5105_v15 = vadd.f32 %v5104_v4, %v5056_v28 }
 0x66d   : > { %5162 = vst [vmem:[%s9321_s26 + $0x20] sm:$0xff] %v5129_v62 }
 0x672   : > { %v5130_v34 = vpop.f32.mrf.mxu1 }
 0x673   : > { %v5131_v29 = vadd.f32 %v5130_v34, %v5082_v23  ;;  %v5106_v49 = vpop.f32.mrf.mxu0 }
 0x674   : > { %v5107_v46 = vadd.f32 %v5106_v49, %v5058_v54 }
 0x675   : > { %5163 = vst [vmem:[%s9321_s26 + $0x28] sm:$0xff] %v5131_v29 }
 0x67a   : > { %v5133_v14 = vpop.f32.mrf.mxu1 }
 0x67b   : > { %v5134_v7 = vadd.f32 %v5133_v14, %v5085_v40 }
 0x67d   : > { %5164 = vst [vmem:[%s9321_s26 + $0x30] sm:$0xff] %v5134_v7 }
 0x682   : > { %v5135_v52 = vpop.f32.mrf.mxu1 }
 0x683   : > { %v5136_v19 = vadd.f32 %v5135_v52, %v5087_v21 }
 0x685   : > { %5165 = vst [vmem:[%s9321_s26 + $0x38] sm:$0xff] %v5136_v19 }
 0x68a   : > { %v5138_v60 = vpop.f32.mrf.mxu1 }
 0x68b   : > { %v5139_v13 = vadd.f32 %v5138_v60, %v5090_v8 }
 0x68d   : > { %5166 = vst [vmem:[%s9321_s26 + $0x40] sm:$0xff] %v5139_v13 }
 0x692   : > { %v5140_v11 = vpop.f32.mrf.mxu1 }
 0x693   : > { %v5141_v27 = vadd.f32 %v5140_v11, %v5092_v48 }
 0x695   : > { %5167 = vst [vmem:[%s9321_s26 + $0x48] sm:$0xff] %v5141_v27 }
 0x69a   : > { %v5143_v2 = vpop.f32.mrf.mxu1 }
 0x69b   : > { %v5144_v53 = vadd.f32 %v5143_v2, %v5095_v43 }
 0x69d   : > { %5168 = vst [vmem:[%s9321_s26 + $0x50] sm:$0xff] %v5144_v53 }
 0x6a2   : > { %v5145_v6 = vpop.f32.mrf.mxu1 }
 0x6a3   : > { %v5146_v24 = vadd.f32 %v5145_v6, %v5097_v38 }
 0x6a5   : > { %5169 = vst [vmem:[%s9321_s26 + $0x58] sm:$0xff] %v5146_v24 }
 0x6aa   : > { %v5148_v33 = vpop.f32.mrf.mxu1 }
 0x6ab   : > { %v5149_v10 = vadd.f32 %v5148_v33, %v5100_v45 }
 0x6ad   : > { %5170 = vst [vmem:[%s9321_s26 + $0x60] sm:$0xff] %v5149_v10 }
 0x6b2   : > { %v5150_v36 = vpop.f32.mrf.mxu1 }
 0x6b3   : > { %v5151_v20 = vadd.f32 %v5150_v36, %v5102_v42 }
 0x6b5   : > { %5171 = vst [vmem:[%s9321_s26 + $0x68] sm:$0xff] %v5151_v20 }
 0x6ba   : > { %v5153_v17 = vpop.f32.mrf.mxu1 }
 0x6bb   : > { %v5154_v1 = vadd.f32 %v5153_v17, %v5105_v15 }
 0x6bd   : > { %5172 = vst [vmem:[%s9321_s26 + $0x70] sm:$0xff] %v5154_v1 }
 0x6c2   : > { %v5155_v25 = vpop.f32.mrf.mxu1 }
 0x6c3   : > { %v5156_v9 = vadd.f32 %v5155_v25, %v5107_v46 }
 0x6c5   : > { %5173 = vst [vmem:[%s9321_s26 + $0x78] sm:$0xff] %v5156_v9 }
 0x6c6 PF: > { %s25_s25 = sadd.s32 1, %s7044_s25  }
 0x6c7   : > { %p22_p7 = scmp.ge.s32.totalorder %s25_s25, 5  }
 0x6c9   :  { %24 = sbr.rel (!%p22_p7) target bundleno = 2 (0x2), region = 115 }
 0x6ce   :  { %5196 = vsyncpa [#allocation3], 1 }
 0x6cf   :  { %5198 = vsyncpa [#allocation3 + $0x1], 1 }
 0x6d0   :  { %5199 = vsyncpa [#allocation5], 1 }

</bundles_post_ra>
